<compile_context>
chip_gen: v7x
topology: tpu7x:2x2x1
jax: 0.10.0
libtpu: 0.0.40
codegen_flags: <defaults>
</compile_context>

<pallas_src>
import math
from functools import partial

import jax
import jax.numpy as jnp
from jax import lax
from jax.experimental import pallas as pl
from jax.experimental.pallas import tpu as pltpu


_SILU_ONE = 0.7310585786300049  # silu(1): P_0 == 1 needs no transcendental


def _silu(v):
    return v * jax.nn.sigmoid(v)


def _round_up(v, m):
    return (v + m - 1) // m * m


# ------------------------------ fused kernel ---------------------------------

def _fused_gram_kan_kernel(beta_ref, x_ref, w_ref, o_ref, gbuf, *,
                           degree, k, stride, dilation, pad,
                           H, W, OH, OW, Cg, Cexp, Og, eps):
    """One (group, batch) cell: expand -> fused conv -> InstanceNorm -> SiLU."""
    Hp, Wp, Kp = gbuf.shape
    Np = w_ref.shape[-1]
    bdt = gbuf.dtype

    # -- keep the conv zero-padding border and the K-pad channels at zero -----
    # (re-done every step: no cross-step scratch state, safe under "parallel")
    if pad > 0:
        zr = jnp.zeros((pad, Wp, Kp), bdt)
        gbuf[pl.ds(0, pad), :, :] = zr
        gbuf[pl.ds(Hp - pad, pad), :, :] = zr
        zc = jnp.zeros((Hp, pad, Kp), bdt)
        gbuf[:, pl.ds(0, pad), :] = zc
        gbuf[:, pl.ds(Wp - pad, pad), :] = zc
    if Kp > Cexp:
        gbuf[pl.ds(pad, H), pl.ds(pad, W), pl.ds(Cexp, Kp - Cexp)] = (
            jnp.zeros((H, W, Kp - Cexp), bdt))

    # -- fused channel expansion: [silu(x) | silu(P_0) | ... | silu(P_deg)] ----
    x = x_ref[0, 0, :, :, :].astype(jnp.float32)          # (H, W, Cg)
    hs, ws = pl.ds(pad, H), pl.ds(pad, W)

    def put(block, val):                                   # interior store
        gbuf[hs, ws, pl.ds(block * Cg, Cg)] = val.astype(bdt)

    put(0, _silu(x))                                       # base-conv input
    put(1, jnp.full_like(x, _SILU_ONE))                    # silu(P_0), P_0 = 1
    t = jnp.tanh(x)
    p0 = jnp.ones_like(t)
    p1 = t
    if degree >= 1:
        put(2, _silu(p1))
        for i in range(2, degree + 1):
            p2 = t * p1 - beta_ref[i - 2] * p0             # Gram recurrence
            put(i + 1, _silu(p2))
            p0, p1 = p1, p2
    # TODO(synk): degree == 0 special case (torch returns p0.unsqueeze(-1)) not replicated.

    # -- base+poly conv as k*k shifted-window MXU matmuls (in-kernel im2col) ---
    S = OH * OW
    acc = jnp.zeros((S, Np), jnp.float32)
    for kh in range(k):
        for kw in range(k):
            r0, c0 = kh * dilation, kw * dilation
            if stride == 1:
                win = gbuf[pl.ds(r0, OH), pl.ds(c0, OW), :]
            else:
                win = gbuf[pl.ds(r0, OH, stride), pl.ds(c0, OW, stride), :]
            a = win.reshape(S, Kp).astype(jnp.bfloat16)    # bf16 operands,
            acc += jnp.dot(a, w_ref[0, kh, kw],            # f32 accumulation
                           preferred_element_type=jnp.float32)

    # -- InstanceNorm2d (affine=False, biased var, eps=1e-5) + SiLU ------------
    y = acc[:, :Og]                                        # drop lane padding
    mean = jnp.sum(y, axis=0, keepdims=True) * (1.0 / S)
    cen = y - mean
    var = jnp.sum(cen * cen, axis=0, keepdims=True) * (1.0 / S)
    yn = cen * lax.rsqrt(var + eps)
    o_ref[0, 0, :, :] = _silu(yn)


# ------------------------------ forward wrapper -------------------------------

def gram_kan_conv2d_forward(x, base_w, poly_w, beta_w, *, degree, groups,
                            stride=1, padding=0, dilation=1, eps=1e-5):
    """GRAMKANConvNDLayer.forward for ndim=2 (conv2d + InstanceNorm2d + SiLU)."""
    N, Cin, H, W = x.shape
    G = groups
    Cg = Cin // G
    Og = base_w.shape[1]
    k = base_w.shape[-1]
    Cexp = Cg * (degree + 2)                      # [base | P_0 .. P_degree]
    OH = (H + 2 * padding - dilation * (k - 1) - 1) // stride + 1
    OW = (W + 2 * padding - dilation * (k - 1) - 1) // stride + 1
    Hp, Wp = H + 2 * padding, W + 2 * padding
    S = OH * OW
    Kp = _round_up(Cexp, 128)                     # MXU-aligned contraction depth (VMEM only)
    Np = _round_up(Og, 128)                       # MXU-aligned output lanes (weights only)

    # (N, Cin, H, W) -> (groups, N, H, W, Cg): channels-last so the matmul
    # contraction sits on the lane axis; group selection is a grid axis.
    xg = x.reshape(N, G, Cg, H, W).transpose(1, 0, 3, 4, 2)

    # Pack base + poly weights into one (K, N) matrix per (group, kh, kw) tap;
    # input-channel order [base(Cg) | P_0(Cg) | ... | P_degree(Cg)] matches gbuf.
    w_comb = jnp.concatenate([base_w, poly_w], axis=2)            # (G, Og, Cexp, k, k)
    w_comb = jnp.transpose(w_comb, (0, 3, 4, 2, 1))               # (G, k, k, Cexp, Og)
    w_pad = jnp.zeros((G, k, k, Kp, Np), jnp.bfloat16)
    w_pad = w_pad.at[:, :, :, :Cexp, :Og].set(w_comb.astype(jnp.bfloat16))

    # Gram recurrence coefficients beta(i-1, i), passed via SMEM (traced).
    if degree >= 2:
        n_ = jnp.arange(1, degree, dtype=jnp.float32)             # n = i-1, i = 2..degree
        m_ = n_ + 1.0
        gram_betas = ((m_ + n_) * (m_ - n_) * n_ ** 2 * (4.0 * n_ ** 2 - 1.0)
                      / m_ ** 2 * beta_w[1:degree].astype(jnp.float32))
    else:
        gram_betas = jnp.zeros((1,), jnp.float32)                 # unused placeholder

    kernel = partial(_fused_gram_kan_kernel, degree=degree, k=k, stride=stride,
                     dilation=dilation, pad=padding, H=H, W=W, OH=OH, OW=OW,
                     Cg=Cg, Cexp=Cexp, Og=Og, eps=eps)

    out = pl.pallas_call(
        kernel,
        out_shape=jax.ShapeDtypeStruct((G, N, S, Og), jnp.float32),
        grid=(G, N),
        in_specs=[
            pl.BlockSpec(memory_space=pltpu.MemorySpace.SMEM),                # gram betas
            pl.BlockSpec((1, 1, H, W, Cg), lambda g, n: (g, n, 0, 0, 0)),     # x (per group)
            pl.BlockSpec((1, k, k, Kp, Np), lambda g, n: (g, 0, 0, 0, 0)),    # packed weights
        ],
        out_specs=pl.BlockSpec((1, 1, S, Og), lambda g, n: (g, n, 0, 0)),
        scratch_shapes=[pltpu.VMEM((Hp, Wp, Kp), jnp.float32)],               # padded expansion
        compiler_params=pltpu.CompilerParams(
            dimension_semantics=("parallel", "parallel")),
    )(gram_betas, xg, w_pad)

    # (G, N, OH*OW, Og) -> (N, G*Og, OH, OW)  (this also performs the group concat)
    return (out.reshape(G, N, OH, OW, Og)
               .transpose(1, 0, 4, 2, 3)
               .reshape(N, G * Og, OH, OW))


# --------------------------- param initialization ----------------------------

def init_params(key, input_dim, output_dim, groups, degree, k, ndim=2):
    Cg = input_dim // groups
    Og = output_dim // groups
    k1, k2, k3 = jax.random.split(key, 3)
    # kaiming_uniform_(nonlinearity='linear'): bound = sqrt(3 / fan_in)
    b_base = math.sqrt(3.0 / (Cg * k * k))
    base_w = jax.random.uniform(k1, (groups, Og, Cg, k, k),
                                minval=-b_base, maxval=b_base, dtype=jnp.float32)
    fan_in_poly = Og * (Cg * (degree + 1) * k * k)
    b_poly = math.sqrt(3.0 / fan_in_poly)
    poly_w = jax.random.uniform(k2, (groups, Og, Cg * (degree + 1), k, k),
                                minval=-b_poly, maxval=b_poly, dtype=jnp.float32)
    std = 1.0 / (k ** ndim * input_dim * (degree + 1.0))
    beta_w = jax.random.normal(k3, (degree + 1,), dtype=jnp.float32) * std
    return base_w, poly_w, beta_w


# ----------------------------- pure-JAX reference ----------------------------

def reference_forward(x, base_w, poly_w, beta_w, *, degree, groups,
                      stride, padding, dilation):
    def conv(inp, w):
        return lax.conv_general_dilated(
            inp, w, window_strides=(stride, stride),
            padding=[(padding, padding), (padding, padding)],
            rhs_dilation=(dilation, dilation),
            dimension_numbers=('NCHW', 'OIHW', 'NCHW'))
    N, Cin, H, W = x.shape
    Cg = Cin // groups
    outs = []
    for g in range(groups):
        xg = x[:, g * Cg:(g + 1) * Cg]
        basis = conv(jax.nn.silu(xg), base_w[g])
        t = jnp.tanh(xg)
        p0 = jnp.ones_like(t)
        grams = [p0]
        p1 = t
        grams.append(p1)
        for i in range(2, degree + 1):
            n, m = i - 1, i
            beta = (m + n) * (m - n) * n ** 2 * (4.0 * n ** 2 - 1.0) / m ** 2 * beta_w[n]
            p2 = t * p1 - beta * p0
            grams.append(p2)
            p0, p1 = p1, p2
        gb = jax.nn.silu(jnp.concatenate(grams, axis=1))
        y = conv(gb, poly_w[g]) + basis
        mean = y.mean(axis=(2, 3), keepdims=True)
        var = y.var(axis=(2, 3), keepdims=True)
        outs.append(jax.nn.silu((y - mean) / jnp.sqrt(var + 1e-5)))
    return jnp.concatenate(outs, axis=1)


# ------------------------------------ main ------------------------------------

if __name__ == "__main__":
    key = jax.random.PRNGKey(0)
    kx, kp = jax.random.split(key)

    N, Cin, H, W = 2, 4, 16, 16
    Cout, groups, degree, ksz = 8, 2, 3, 3
    stride, padding, dilation = 1, 1, 1

    x = jax.random.normal(kx, (N, Cin, H, W), dtype=jnp.float32)
    base_w, poly_w, beta_w = init_params(kp, Cin, Cout, groups, degree, ksz)

    fwd = jax.jit(partial(gram_kan_conv2d_forward, degree=degree, groups=groups,
                          stride=stride, padding=padding, dilation=dilation))
    y = jax.block_until_ready(fwd(x, base_w, poly_w, beta_w))
    assert y.shape == (N, Cout, H, W)

    y_ref = reference_forward(x, base_w, poly_w, beta_w, degree=degree,
                              groups=groups, stride=stride, padding=padding,
                              dilation=dilation)
    err = float(jnp.max(jnp.abs(y - y_ref)))
    # bf16 matmul operands with f32 accumulation -> slightly looser tolerance
    # than the pure-f32 reference.
    assert jnp.allclose(y, y_ref, rtol=3e-2, atol=3e-2), err

    print("KERNEL_OK")
</pallas_src>

<mosaic_0001>
module attributes {stable_mosaic.version = 11 : i64} {
  func.func @_fused_gram_kan_kernel(%arg0: i32, %arg1: i32, %arg2: memref<2xf32, #tpu.memory_space<smem>>, %arg3: memref<1x1x16x16x2xf32, #tpu.memory_space<vmem>>, %arg4: memref<1x3x3x128x128xbf16, #tpu.memory_space<vmem>>, %arg5: memref<1x1x256x4xf32, #tpu.memory_space<vmem>>, %arg6: memref<18x18x128xf32, #tpu.memory_space<vmem>>) attributes {dimension_semantics = [#tpu.dimension_semantics<parallel>, #tpu.dimension_semantics<parallel>], iteration_bounds = array<i64: 2, 2>, scalar_prefetch = 0 : i64, scratch_operands = 1 : i64, tpu.core_type = #tpu.core_type<tc>, window_params = [{transform_indices = @transform_0, window_bounds = array<i64: 2>}, {transform_indices = @transform_1, window_bounds = array<i64: 1, 1, 16, 16, 2>}, {transform_indices = @transform_2, window_bounds = array<i64: 1, 3, 3, 128, 128>}, {transform_indices = @transform_3, window_bounds = array<i64: 1, 1, 256, 4>}]} {
    %cst = arith.constant 0.000000e+00 : f32
    %0 = vector.broadcast %cst : f32 to vector<1x18x128xf32>
    %c0 = arith.constant 0 : index
    %c0_0 = arith.constant 0 : index
    %c0_1 = arith.constant 0 : index
    %1 = vector.load %arg6[%c0, %c0_0, %c0_1] : memref<18x18x128xf32, #tpu.memory_space<vmem>>, vector<1x18x128xf32>
    tpu.vector_store %arg6[%c0, %c0_0, %c0_1], %0 {strides = array<i32>} : memref<18x18x128xf32, #tpu.memory_space<vmem>>, vector<1x18x128xf32>,
    %c17 = arith.constant 17 : index
    %c0_2 = arith.constant 0 : index
    %c0_3 = arith.constant 0 : index
    %2 = vector.load %arg6[%c17, %c0_2, %c0_3] : memref<18x18x128xf32, #tpu.memory_space<vmem>>, vector<1x18x128xf32>
    tpu.vector_store %arg6[%c17, %c0_2, %c0_3], %0 {strides = array<i32>} : memref<18x18x128xf32, #tpu.memory_space<vmem>>, vector<1x18x128xf32>,
    %cst_4 = arith.constant 0.000000e+00 : f32
    %3 = vector.broadcast %cst_4 : f32 to vector<18x1x128xf32>
    %c0_5 = arith.constant 0 : index
    %c0_6 = arith.constant 0 : index
    %c0_7 = arith.constant 0 : index
    %4 = vector.load %arg6[%c0_5, %c0_6, %c0_7] : memref<18x18x128xf32, #tpu.memory_space<vmem>>, vector<18x1x128xf32>
    tpu.vector_store %arg6[%c0_5, %c0_6, %c0_7], %3 {strides = array<i32>} : memref<18x18x128xf32, #tpu.memory_space<vmem>>, vector<18x1x128xf32>,
    %c0_8 = arith.constant 0 : index
    %c17_9 = arith.constant 17 : index
    %c0_10 = arith.constant 0 : index
    %5 = vector.load %arg6[%c0_8, %c17_9, %c0_10] : memref<18x18x128xf32, #tpu.memory_space<vmem>>, vector<18x1x128xf32>
    tpu.vector_store %arg6[%c0_8, %c17_9, %c0_10], %3 {strides = array<i32>} : memref<18x18x128xf32, #tpu.memory_space<vmem>>, vector<18x1x128xf32>,
    %cst_11 = arith.constant 0.000000e+00 : f32
    %6 = vector.broadcast %cst_11 : f32 to vector<16x16x118xf32>
    %c1 = arith.constant 1 : index
    %c1_12 = arith.constant 1 : index
    %c10 = arith.constant 10 : index
    %7 = vector.load %arg6[%c1, %c1_12, %c10] : memref<18x18x128xf32, #tpu.memory_space<vmem>>, vector<16x16x118xf32>
    tpu.vector_store %arg6[%c1, %c1_12, %c10], %6 {strides = array<i32>} : memref<18x18x128xf32, #tpu.memory_space<vmem>>, vector<16x16x118xf32>,
    %c0_13 = arith.constant 0 : index
    %c0_14 = arith.constant 0 : index
    %c0_15 = arith.constant 0 : index
    %c0_16 = arith.constant 0 : index
    %c0_17 = arith.constant 0 : index
    %8 = vector.load %arg3[%c0_13, %c0_14, %c0_15, %c0_16, %c0_17] : memref<1x1x16x16x2xf32, #tpu.memory_space<vmem>>, vector<1x1x16x16x2xf32>
    %9 = vector.shape_cast %8 : vector<1x1x16x16x2xf32> to vector<16x16x2xf32>
    %10 = arith.negf %9 : vector<16x16x2xf32>
    %11 = math.exp %10 : vector<16x16x2xf32>
    %cst_18 = arith.constant 1.000000e+00 : f32
    %12 = vector.broadcast %cst_18 : f32 to vector<16x16x2xf32>
    %13 = arith.addf %12, %11 : vector<16x16x2xf32>
    %14 = arith.divf %12, %13 : vector<16x16x2xf32>
    %15 = arith.mulf %9, %14 : vector<16x16x2xf32>
    %c1_19 = arith.constant 1 : index
    %c1_20 = arith.constant 1 : index
    %c0_21 = arith.constant 0 : index
    %16 = vector.load %arg6[%c1_19, %c1_20, %c0_21] : memref<18x18x128xf32, #tpu.memory_space<vmem>>, vector<16x16x2xf32>
    tpu.vector_store %arg6[%c1_19, %c1_20, %c0_21], %15 {strides = array<i32>} : memref<18x18x128xf32, #tpu.memory_space<vmem>>, vector<16x16x2xf32>,
    %cst_22 = arith.constant 0.731058597 : f32
    %17 = vector.broadcast %cst_22 : f32 to vector<16x16x2xf32>
    %c1_23 = arith.constant 1 : index
    %c1_24 = arith.constant 1 : index
    %c2 = arith.constant 2 : index
    %18 = vector.load %arg6[%c1_23, %c1_24, %c2] : memref<18x18x128xf32, #tpu.memory_space<vmem>>, vector<16x16x2xf32>
    tpu.vector_store %arg6[%c1_23, %c1_24, %c2], %17 {strides = array<i32>} : memref<18x18x128xf32, #tpu.memory_space<vmem>>, vector<16x16x2xf32>,
    %19 = math.tanh %9 : vector<16x16x2xf32>
    %cst_25 = arith.constant 1.000000e+00 : f32
    %20 = vector.broadcast %cst_25 : f32 to vector<16x16x2xf32>
    %21 = arith.negf %19 : vector<16x16x2xf32>
    %22 = math.exp %21 : vector<16x16x2xf32>
    %cst_26 = arith.constant 1.000000e+00 : f32
    %23 = vector.broadcast %cst_26 : f32 to vector<16x16x2xf32>
    %24 = arith.addf %23, %22 : vector<16x16x2xf32>
    %25 = arith.divf %23, %24 : vector<16x16x2xf32>
    %26 = arith.mulf %19, %25 : vector<16x16x2xf32>
    %c1_27 = arith.constant 1 : index
    %c1_28 = arith.constant 1 : index
    %c4 = arith.constant 4 : index
    %27 = vector.load %arg6[%c1_27, %c1_28, %c4] : memref<18x18x128xf32, #tpu.memory_space<vmem>>, vector<16x16x2xf32>
    tpu.vector_store %arg6[%c1_27, %c1_28, %c4], %26 {strides = array<i32>} : memref<18x18x128xf32, #tpu.memory_space<vmem>>, vector<16x16x2xf32>,
    %28 = arith.mulf %19, %19 : vector<16x16x2xf32>
    %c0_29 = arith.constant 0 : index
    %29 = memref.load %arg2[%c0_29] : memref<2xf32, #tpu.memory_space<smem>>
    %30 = vector.broadcast %29 : f32 to vector<16x16x2xf32>
    %31 = arith.mulf %30, %20 : vector<16x16x2xf32>
    %32 = arith.subf %28, %31 : vector<16x16x2xf32>
    %33 = arith.negf %32 : vector<16x16x2xf32>
    %34 = math.exp %33 : vector<16x16x2xf32>
    %cst_30 = arith.constant 1.000000e+00 : f32
    %35 = vector.broadcast %cst_30 : f32 to vector<16x16x2xf32>
    %36 = arith.addf %35, %34 : vector<16x16x2xf32>
    %37 = arith.divf %35, %36 : vector<16x16x2xf32>
    %38 = arith.mulf %32, %37 : vector<16x16x2xf32>
    %c1_31 = arith.constant 1 : index
    %c1_32 = arith.constant 1 : index
    %c6 = arith.constant 6 : index
    %39 = vector.load %arg6[%c1_31, %c1_32, %c6] : memref<18x18x128xf32, #tpu.memory_space<vmem>>, vector<16x16x2xf32>
    tpu.vector_store %arg6[%c1_31, %c1_32, %c6], %38 {strides = array<i32>} : memref<18x18x128xf32, #tpu.memory_space<vmem>>, vector<16x16x2xf32>,
    %40 = arith.mulf %19, %32 : vector<16x16x2xf32>
    %c1_33 = arith.constant 1 : index
    %41 = memref.load %arg2[%c1_33] : memref<2xf32, #tpu.memory_space<smem>>
    %42 = vector.broadcast %41 : f32 to vector<16x16x2xf32>
    %43 = arith.mulf %42, %19 : vector<16x16x2xf32>
    %44 = arith.subf %40, %43 : vector<16x16x2xf32>
    %45 = arith.negf %44 : vector<16x16x2xf32>
    %46 = math.exp %45 : vector<16x16x2xf32>
    %cst_34 = arith.constant 1.000000e+00 : f32
    %47 = vector.broadcast %cst_34 : f32 to vector<16x16x2xf32>
    %48 = arith.addf %47, %46 : vector<16x16x2xf32>
    %49 = arith.divf %47, %48 : vector<16x16x2xf32>
    %50 = arith.mulf %44, %49 : vector<16x16x2xf32>
    %c1_35 = arith.constant 1 : index
    %c1_36 = arith.constant 1 : index
    %c8 = arith.constant 8 : index
    %51 = vector.load %arg6[%c1_35, %c1_36, %c8] : memref<18x18x128xf32, #tpu.memory_space<vmem>>, vector<16x16x2xf32>
    tpu.vector_store %arg6[%c1_35, %c1_36, %c8], %50 {strides = array<i32>} : memref<18x18x128xf32, #tpu.memory_space<vmem>>, vector<16x16x2xf32>,
    %cst_37 = arith.constant 0.000000e+00 : f32
    %52 = vector.broadcast %cst_37 : f32 to vector<256x128xf32>
    %c0_38 = arith.constant 0 : index
    %c0_39 = arith.constant 0 : index
    %c0_40 = arith.constant 0 : index
    %53 = vector.load %arg6[%c0_38, %c0_39, %c0_40] : memref<18x18x128xf32, #tpu.memory_space<vmem>>, vector<16x16x128xf32>
    %54 = vector.shape_cast %53 : vector<16x16x128xf32> to vector<256x128xf32>
    %55 = arith.truncf %54 : vector<256x128xf32> to vector<256x128xbf16>
    %c0_41 = arith.constant 0 : index
    %c0_42 = arith.constant 0 : index
    %c0_43 = arith.constant 0 : index
    %c0_44 = arith.constant 0 : index
    %c0_45 = arith.constant 0 : index
    %56 = vector.load %arg4[%c0_41, %c0_42, %c0_43, %c0_44, %c0_45] : memref<1x3x3x128x128xbf16, #tpu.memory_space<vmem>>, vector<1x1x1x128x128xbf16>
    %57 = vector.shape_cast %56 : vector<1x1x1x128x128xbf16> to vector<128x128xbf16>
    %cst_46 = arith.constant dense<0.000000e+00> : vector<256x128xf32>
    %58 = tpu.matmul %55, %57, %cst_46 {dimension_numbers = #tpu.dot_dimension_numbers<[1], [0], [0], [1], [0, 0, 1, 1], [], []>} : vector<256x128xbf16>, vector<128x128xbf16>, vector<256x128xf32> -> vector<256x128xf32>
    %59 = arith.addf %52, %58 : vector<256x128xf32>
    %c0_47 = arith.constant 0 : index
    %c1_48 = arith.constant 1 : index
    %c0_49 = arith.constant 0 : index
    %60 = vector.load %arg6[%c0_47, %c1_48, %c0_49] : memref<18x18x128xf32, #tpu.memory_space<vmem>>, vector<16x16x128xf32>
    %61 = vector.shape_cast %60 : vector<16x16x128xf32> to vector<256x128xf32>
    %62 = arith.truncf %61 : vector<256x128xf32> to vector<256x128xbf16>
    %c0_50 = arith.constant 0 : index
    %c0_51 = arith.constant 0 : index
    %c1_52 = arith.constant 1 : index
    %c0_53 = arith.constant 0 : index
    %c0_54 = arith.constant 0 : index
    %63 = vector.load %arg4[%c0_50, %c0_51, %c1_52, %c0_53, %c0_54] : memref<1x3x3x128x128xbf16, #tpu.memory_space<vmem>>, vector<1x1x1x128x128xbf16>
    %64 = vector.shape_cast %63 : vector<1x1x1x128x128xbf16> to vector<128x128xbf16>
    %cst_55 = arith.constant dense<0.000000e+00> : vector<256x128xf32>
    %65 = tpu.matmul %62, %64, %cst_55 {dimension_numbers = #tpu.dot_dimension_numbers<[1], [0], [0], [1], [0, 0, 1, 1], [], []>} : vector<256x128xbf16>, vector<128x128xbf16>, vector<256x128xf32> -> vector<256x128xf32>
    %66 = arith.addf %59, %65 : vector<256x128xf32>
    %c0_56 = arith.constant 0 : index
    %c2_57 = arith.constant 2 : index
    %c0_58 = arith.constant 0 : index
    %67 = vector.load %arg6[%c0_56, %c2_57, %c0_58] : memref<18x18x128xf32, #tpu.memory_space<vmem>>, vector<16x16x128xf32>
    %68 = vector.shape_cast %67 : vector<16x16x128xf32> to vector<256x128xf32>
    %69 = arith.truncf %68 : vector<256x128xf32> to vector<256x128xbf16>
    %c0_59 = arith.constant 0 : index
    %c0_60 = arith.constant 0 : index
    %c2_61 = arith.constant 2 : index
    %c0_62 = arith.constant 0 : index
    %c0_63 = arith.constant 0 : index
    %70 = vector.load %arg4[%c0_59, %c0_60, %c2_61, %c0_62, %c0_63] : memref<1x3x3x128x128xbf16, #tpu.memory_space<vmem>>, vector<1x1x1x128x128xbf16>
    %71 = vector.shape_cast %70 : vector<1x1x1x128x128xbf16> to vector<128x128xbf16>
    %cst_64 = arith.constant dense<0.000000e+00> : vector<256x128xf32>
    %72 = tpu.matmul %69, %71, %cst_64 {dimension_numbers = #tpu.dot_dimension_numbers<[1], [0], [0], [1], [0, 0, 1, 1], [], []>} : vector<256x128xbf16>, vector<128x128xbf16>, vector<256x128xf32> -> vector<256x128xf32>
    %73 = arith.addf %66, %72 : vector<256x128xf32>
    %c1_65 = arith.constant 1 : index
    %c0_66 = arith.constant 0 : index
    %c0_67 = arith.constant 0 : index
    %74 = vector.load %arg6[%c1_65, %c0_66, %c0_67] : memref<18x18x128xf32, #tpu.memory_space<vmem>>, vector<16x16x128xf32>
    %75 = vector.shape_cast %74 : vector<16x16x128xf32> to vector<256x128xf32>
    %76 = arith.truncf %75 : vector<256x128xf32> to vector<256x128xbf16>
    %c0_68 = arith.constant 0 : index
    %c1_69 = arith.constant 1 : index
    %c0_70 = arith.constant 0 : index
    %c0_71 = arith.constant 0 : index
    %c0_72 = arith.constant 0 : index
    %77 = vector.load %arg4[%c0_68, %c1_69, %c0_70, %c0_71, %c0_72] : memref<1x3x3x128x128xbf16, #tpu.memory_space<vmem>>, vector<1x1x1x128x128xbf16>
    %78 = vector.shape_cast %77 : vector<1x1x1x128x128xbf16> to vector<128x128xbf16>
    %cst_73 = arith.constant dense<0.000000e+00> : vector<256x128xf32>
    %79 = tpu.matmul %76, %78, %cst_73 {dimension_numbers = #tpu.dot_dimension_numbers<[1], [0], [0], [1], [0, 0, 1, 1], [], []>} : vector<256x128xbf16>, vector<128x128xbf16>, vector<256x128xf32> -> vector<256x128xf32>
    %80 = arith.addf %73, %79 : vector<256x128xf32>
    %c1_74 = arith.constant 1 : index
    %c1_75 = arith.constant 1 : index
    %c0_76 = arith.constant 0 : index
    %81 = vector.load %arg6[%c1_74, %c1_75, %c0_76] : memref<18x18x128xf32, #tpu.memory_space<vmem>>, vector<16x16x128xf32>
    %82 = vector.shape_cast %81 : vector<16x16x128xf32> to vector<256x128xf32>
    %83 = arith.truncf %82 : vector<256x128xf32> to vector<256x128xbf16>
    %c0_77 = arith.constant 0 : index
    %c1_78 = arith.constant 1 : index
    %c1_79 = arith.constant 1 : index
    %c0_80 = arith.constant 0 : index
    %c0_81 = arith.constant 0 : index
    %84 = vector.load %arg4[%c0_77, %c1_78, %c1_79, %c0_80, %c0_81] : memref<1x3x3x128x128xbf16, #tpu.memory_space<vmem>>, vector<1x1x1x128x128xbf16>
    %85 = vector.shape_cast %84 : vector<1x1x1x128x128xbf16> to vector<128x128xbf16>
    %cst_82 = arith.constant dense<0.000000e+00> : vector<256x128xf32>
    %86 = tpu.matmul %83, %85, %cst_82 {dimension_numbers = #tpu.dot_dimension_numbers<[1], [0], [0], [1], [0, 0, 1, 1], [], []>} : vector<256x128xbf16>, vector<128x128xbf16>, vector<256x128xf32> -> vector<256x128xf32>
    %87 = arith.addf %80, %86 : vector<256x128xf32>
    %c1_83 = arith.constant 1 : index
    %c2_84 = arith.constant 2 : index
    %c0_85 = arith.constant 0 : index
    %88 = vector.load %arg6[%c1_83, %c2_84, %c0_85] : memref<18x18x128xf32, #tpu.memory_space<vmem>>, vector<16x16x128xf32>
    %89 = vector.shape_cast %88 : vector<16x16x128xf32> to vector<256x128xf32>
    %90 = arith.truncf %89 : vector<256x128xf32> to vector<256x128xbf16>
    %c0_86 = arith.constant 0 : index
    %c1_87 = arith.constant 1 : index
    %c2_88 = arith.constant 2 : index
    %c0_89 = arith.constant 0 : index
    %c0_90 = arith.constant 0 : index
    %91 = vector.load %arg4[%c0_86, %c1_87, %c2_88, %c0_89, %c0_90] : memref<1x3x3x128x128xbf16, #tpu.memory_space<vmem>>, vector<1x1x1x128x128xbf16>
    %92 = vector.shape_cast %91 : vector<1x1x1x128x128xbf16> to vector<128x128xbf16>
    %cst_91 = arith.constant dense<0.000000e+00> : vector<256x128xf32>
    %93 = tpu.matmul %90, %92, %cst_91 {dimension_numbers = #tpu.dot_dimension_numbers<[1], [0], [0], [1], [0, 0, 1, 1], [], []>} : vector<256x128xbf16>, vector<128x128xbf16>, vector<256x128xf32> -> vector<256x128xf32>
    %94 = arith.addf %87, %93 : vector<256x128xf32>
    %c2_92 = arith.constant 2 : index
    %c0_93 = arith.constant 0 : index
    %c0_94 = arith.constant 0 : index
    %95 = vector.load %arg6[%c2_92, %c0_93, %c0_94] : memref<18x18x128xf32, #tpu.memory_space<vmem>>, vector<16x16x128xf32>
    %96 = vector.shape_cast %95 : vector<16x16x128xf32> to vector<256x128xf32>
    %97 = arith.truncf %96 : vector<256x128xf32> to vector<256x128xbf16>
    %c0_95 = arith.constant 0 : index
    %c2_96 = arith.constant 2 : index
    %c0_97 = arith.constant 0 : index
    %c0_98 = arith.constant 0 : index
    %c0_99 = arith.constant 0 : index
    %98 = vector.load %arg4[%c0_95, %c2_96, %c0_97, %c0_98, %c0_99] : memref<1x3x3x128x128xbf16, #tpu.memory_space<vmem>>, vector<1x1x1x128x128xbf16>
    %99 = vector.shape_cast %98 : vector<1x1x1x128x128xbf16> to vector<128x128xbf16>
    %cst_100 = arith.constant dense<0.000000e+00> : vector<256x128xf32>
    %100 = tpu.matmul %97, %99, %cst_100 {dimension_numbers = #tpu.dot_dimension_numbers<[1], [0], [0], [1], [0, 0, 1, 1], [], []>} : vector<256x128xbf16>, vector<128x128xbf16>, vector<256x128xf32> -> vector<256x128xf32>
    %101 = arith.addf %94, %100 : vector<256x128xf32>
    %c2_101 = arith.constant 2 : index
    %c1_102 = arith.constant 1 : index
    %c0_103 = arith.constant 0 : index
    %102 = vector.load %arg6[%c2_101, %c1_102, %c0_103] : memref<18x18x128xf32, #tpu.memory_space<vmem>>, vector<16x16x128xf32>
    %103 = vector.shape_cast %102 : vector<16x16x128xf32> to vector<256x128xf32>
    %104 = arith.truncf %103 : vector<256x128xf32> to vector<256x128xbf16>
    %c0_104 = arith.constant 0 : index
    %c2_105 = arith.constant 2 : index
    %c1_106 = arith.constant 1 : index
    %c0_107 = arith.constant 0 : index
    %c0_108 = arith.constant 0 : index
    %105 = vector.load %arg4[%c0_104, %c2_105, %c1_106, %c0_107, %c0_108] : memref<1x3x3x128x128xbf16, #tpu.memory_space<vmem>>, vector<1x1x1x128x128xbf16>
    %106 = vector.shape_cast %105 : vector<1x1x1x128x128xbf16> to vector<128x128xbf16>
    %cst_109 = arith.constant dense<0.000000e+00> : vector<256x128xf32>
    %107 = tpu.matmul %104, %106, %cst_109 {dimension_numbers = #tpu.dot_dimension_numbers<[1], [0], [0], [1], [0, 0, 1, 1], [], []>} : vector<256x128xbf16>, vector<128x128xbf16>, vector<256x128xf32> -> vector<256x128xf32>
    %108 = arith.addf %101, %107 : vector<256x128xf32>
    %c2_110 = arith.constant 2 : index
    %c2_111 = arith.constant 2 : index
    %c0_112 = arith.constant 0 : index
    %109 = vector.load %arg6[%c2_110, %c2_111, %c0_112] : memref<18x18x128xf32, #tpu.memory_space<vmem>>, vector<16x16x128xf32>
    %110 = vector.shape_cast %109 : vector<16x16x128xf32> to vector<256x128xf32>
    %111 = arith.truncf %110 : vector<256x128xf32> to vector<256x128xbf16>
    %c0_113 = arith.constant 0 : index
    %c2_114 = arith.constant 2 : index
    %c2_115 = arith.constant 2 : index
    %c0_116 = arith.constant 0 : index
    %c0_117 = arith.constant 0 : index
    %112 = vector.load %arg4[%c0_113, %c2_114, %c2_115, %c0_116, %c0_117] : memref<1x3x3x128x128xbf16, #tpu.memory_space<vmem>>, vector<1x1x1x128x128xbf16>
    %113 = vector.shape_cast %112 : vector<1x1x1x128x128xbf16> to vector<128x128xbf16>
    %cst_118 = arith.constant dense<0.000000e+00> : vector<256x128xf32>
    %114 = tpu.matmul %111, %113, %cst_118 {dimension_numbers = #tpu.dot_dimension_numbers<[1], [0], [0], [1], [0, 0, 1, 1], [], []>} : vector<256x128xbf16>, vector<128x128xbf16>, vector<256x128xf32> -> vector<256x128xf32>
    %115 = arith.addf %108, %114 : vector<256x128xf32>
    %116 = vector.extract_strided_slice %115 {offsets = [0, 0], sizes = [256, 4], strides = [1, 1]} : vector<256x128xf32> to vector<256x4xf32>
    %cst_119 = arith.constant dense<0.000000e+00> : vector<4xf32>
    %117 = vector.multi_reduction <add>, %116, %cst_119 [0] : vector<256x4xf32> to vector<4xf32>
    %118 = vector.shape_cast %117 : vector<4xf32> to vector<1x4xf32>
    %cst_120 = arith.constant 3.906250e-03 : f32
    %119 = vector.broadcast %cst_120 : f32 to vector<1x4xf32>
    %120 = arith.mulf %118, %119 : vector<1x4xf32>
    %121 = vector.broadcast %120 : vector<1x4xf32> to vector<256x4xf32>
    %122 = arith.subf %116, %121 : vector<256x4xf32>
    %123 = arith.mulf %122, %122 : vector<256x4xf32>
    %cst_121 = arith.constant dense<0.000000e+00> : vector<4xf32>
    %124 = vector.multi_reduction <add>, %123, %cst_121 [0] : vector<256x4xf32> to vector<4xf32>
    %125 = vector.shape_cast %124 : vector<4xf32> to vector<1x4xf32>
    %cst_122 = arith.constant 3.906250e-03 : f32
    %126 = vector.broadcast %cst_122 : f32 to vector<1x4xf32>
    %127 = arith.mulf %125, %126 : vector<1x4xf32>
    %cst_123 = arith.constant 9.99999974E-6 : f32
    %128 = vector.broadcast %cst_123 : f32 to vector<1x4xf32>
    %129 = arith.addf %127, %128 : vector<1x4xf32>
    %130 = math.rsqrt %129 : vector<1x4xf32>
    %131 = vector.broadcast %130 : vector<1x4xf32> to vector<256x4xf32>
    %132 = arith.mulf %122, %131 : vector<256x4xf32>
    %133 = arith.negf %132 : vector<256x4xf32>
    %134 = math.exp %133 : vector<256x4xf32>
    %cst_124 = arith.constant 1.000000e+00 : f32
    %135 = vector.broadcast %cst_124 : f32 to vector<256x4xf32>
    %136 = arith.addf %135, %134 : vector<256x4xf32>
    %137 = arith.divf %135, %136 : vector<256x4xf32>
    %138 = arith.mulf %132, %137 : vector<256x4xf32>
    %c0_125 = arith.constant 0 : index
    %c0_126 = arith.constant 0 : index
    %c0_127 = arith.constant 0 : index
    %c0_128 = arith.constant 0 : index
    %139 = vector.load %arg5[%c0_125, %c0_126, %c0_127, %c0_128] : memref<1x1x256x4xf32, #tpu.memory_space<vmem>>, vector<1x1x256x4xf32>
    %140 = vector.shape_cast %139 : vector<1x1x256x4xf32> to vector<256x4xf32>
    %141 = vector.shape_cast %138 : vector<256x4xf32> to vector<1x1x256x4xf32>
    tpu.vector_store %arg5[%c0_125, %c0_126, %c0_127, %c0_128], %141 {strides = array<i32>} : memref<1x1x256x4xf32, #tpu.memory_space<vmem>>, vector<1x1x256x4xf32>,
    return
  }
  func.func @transform_0(%arg0: i32, %arg1: i32) -> i32 {
    %c0_i32 = arith.constant 0 : i32
    %c0_i32_0 = arith.constant 0 : i32
    return %c0_i32 : i32
  }
  func.func @transform_1(%arg0: i32, %arg1: i32) -> (i32, i32, i32, i32, i32) {
    %c0_i32 = arith.constant 0 : i32
    %c0_i32_0 = arith.constant 0 : i32
    %c0_i32_1 = arith.constant 0 : i32
    %c0_i32_2 = arith.constant 0 : i32
    return %arg0, %arg1, %c0_i32, %c0_i32_0, %c0_i32_1 : i32, i32, i32, i32, i32
  }
  func.func @transform_2(%arg0: i32, %arg1: i32) -> (i32, i32, i32, i32, i32) {
    %c0_i32 = arith.constant 0 : i32
    %c0_i32_0 = arith.constant 0 : i32
    %c0_i32_1 = arith.constant 0 : i32
    %c0_i32_2 = arith.constant 0 : i32
    %c0_i32_3 = arith.constant 0 : i32
    return %arg0, %c0_i32, %c0_i32_0, %c0_i32_1, %c0_i32_2 : i32, i32, i32, i32, i32
  }
  func.func @transform_3(%arg0: i32, %arg1: i32) -> (i32, i32, i32, i32) {
    %c0_i32 = arith.constant 0 : i32
    %c0_i32_0 = arith.constant 0 : i32
    %c0_i32_1 = arith.constant 0 : i32
    return %arg0, %arg1, %c0_i32, %c0_i32_0 : i32, i32, i32, i32
  }
}

</mosaic_0001>

<bundles_post_ra>
// kernel: gram_kan_conv2d_forward.1
= control target key start
LH: loop header
LB: loop body
LE: loop exit
PB: predicated region body
PF: predicated region fallthrough
CT: control target
= control target key end

     0   :  { %8 = vsyncpa [#allocation4], 0  ;;  %s7555_s12 = smov 0   ;;  %s7557_s13 = smov 0   ;;  %s9911_s0 = inlined_call_operand.vmem [shape: f32[2], index: 0, kind: input, shape index: {}]   ;;  %s9912_s1 = inlined_call_operand.vmem [shape: f32[2,2,16,16,2], index: 1, kind: input, shape index: {}]   ;;  %s9913_s2 = inlined_call_operand.vmem [shape: bf16[2,3,3,128,128], index: 2, kind: input, shape index: {}]   ;;  %s9914_s3 = inlined_call_operand.vmem [shape: f32[2,2,256,4], index: 3, kind: output, shape index: {}]  }
   0x1   :  { %s7559_s14 = smov 0   ;;  %s7561_s15 = smov 0  }
   0x2   :  { %s7563_s16 = smov 0  }
   0x3 LB: > { %s5297_s17 = sadd.s32 4294967295, %s7527_s16   ;;  %s23_s18 = sadd.s32 1, %s7519_s14  ;;  %s7527_s16 = sphi %s7563_s16, %s14_s16   ;;  %s7523_s15 = sphi %s7561_s15, %s9923_s15   ;;  %s7519_s14 = sphi %s7559_s14, %s9922_s14   ;;  %s7515_s13 = sphi %s7557_s13, %s9921_s13   ;;  %s7511_s12 = sphi %s7555_s12, %s9920_s12  }
   0x4   : > { %p24_p0 = scmp.ge.s32.totalorder %s23_s18, 2  ;;  %s26_s19 = sadd.s32 1, %s7523_s15 }
   0x5   : > { %p5299_p1 = scmp.ge.s32.totalorder %s7527_s16, 1  ;;  %p134_p2 = scmp.lt.s32.totalorder %s7527_s16, 5 }
   0x6   : > { %s9925_s18 = smov (%p24_p0, %s23_s18), 0  ;;  %s9927_s19 = smov (!%p24_p0, %s26_s19), %s7523_s15 }
   0x7   : > { %p7588_p3 = pnand %p5299_p1, %p134_p2  ;;  %p28_p4 = scmp.ge.s32.totalorder %s9927_s19, 2 }
   0x8   : > { %p7592_p5 = scmp.eq.s32.totalorder %s5297_s17, 0  ;;  %s147_s24 = sshll.u32 %s9911_s0, 4  ;;  %s148_s24 = int_to_ptr.vmem [resolvable:$true] %s147_s24 }
   0x9   : > { %p6599_p6 = pneg %p7588_p3  ;;  %s9929_s19 = smov (%p28_p4, %s9927_s19), 0 }
   0xa   : > { %s7470_s25 = scalar_lea.vmem %s148_s24, 16  ;;  %p7478_p12 = scmp.lt.s32.totalorder %s148_s24, %s148_s24 }
   0xb   : > { %p6600_p7 = pnand %p7592_p5, %p6599_p6  ;;  %p7471_p8 = scmp.ne.s32.totalorder %s148_s24, %s7470_s25 }
   0xc   : > { %p7479_p13 = scmp.lt.s32.totalorder %s7470_s25, %s7470_s25 }
   0xd   : > { %p7472_p9 = pneg %p6600_p7 }
   0xe   : > { %p7480_p0 = por %p7479_p13, %p7478_p12 }
   0xf   : > { %p7473_p10 = pnand %p7472_p9, %p7471_p8 }
  0x11   : > { %p7474_p11 = pneg %p7473_p10 }
  0x13   : > { %p7481_p1 = pnand %p7480_p0, %p7474_p11 }
  0x15   : > { %7484 = shalt.err (!%p7481_p1)
}
  0x16   : > { %s7529_s26 = smov [#allocation3]   ;;  %180 = sbr.rel (%p7588_p3) target bundleno = 1086 (0x43e), region = 32 }
  0x17   : > { %6602 = dma.vmem_to_smem (!%p6600_p7), %s148_s24, 16, %s7529_s26, [#allocation4]  }
  0x1d   : > { %7506 = dma.done.wait (%p7592_p5), [#allocation4], 16  }
  0x1e   : > { %7508 = vsyncadd (%p7592_p5), [#allocation4], 4294967280 }
  0x1f   : > { %186 = sfence }
  0x20   : > { %p218_p2 = scmp.lt.s32.totalorder %s7515_s13, 1  ;;  %p220_p4 = scmp.lt.s32.totalorder %s7511_s12, 1  ;;  %vm286_vm0 = vcmask 1047632   ;;  %vm575_vm1 = vcmask 15360   ;;  %vm608_vm2 = vcmask 31760   ;;  %vm1025_vm3 = vcmask 48160  }
  0x21   : > { %s1090_s11 = sld [smem:[#allocation3]]  ;;  %s7532_s17 = smov 6   ;;  %vm1476_vm4 = vcmask 64560   ;;  %vm1959_vm5 = vcmask 80960   ;;  %vm4682_vm6 = vcmask 31744  }
  0x22   : > { %s9931_s13 = smov (!%p218_p2, %s7515_s13), 1  ;;  %s9933_s12 = smov (!%p220_p4, %s7511_s12), 1 }
  0x23   : > { %s5305_s27 = sshll.u32 %s9931_s13, 6  ;;  %s6594_s28 = smul.u32 576, %s9931_s13 }
  0x24   : > { %s5304_s29 = sshll.u32 %s9933_s12, 5  ;;  %s7682_s12 = sld [smem:[#allocation3 + $0x1]] }
  0x25   : > { %s7615_s30 = sadd.s32 %s5305_s27, %s5304_s29  ;;  %s7620_s6 = scalar_lea.vmem %s9913_s2, %s6594_s28 }
  0x26   : > { %s5306_s7 = sshll.u32 %s7615_s30, 3  ;;  %s7530_s13 = smov 4  }
  0x27   : > { %s7628_s10 = scalar_lea.vmem %s9912_s1, %s5306_s7  ;;  %v7656_v21 = vstv %s1090_s11  ;;  %s7533_s20 = smov 8  }
  0x28   : > { %v321_v0 = vld [vmem:[%s7628_s10 + $0x10] sm:$0xff]  ;;  %v319_v1 = vld [vmem:[%s7628_s10] sm:$0xff]  ;;  %v322_v2 = vld [vmem:[%s7628_s10 + $0x18] sm:$0xff]  ;;  %s9786_s23 = scalar_lea.vmem %s9914_s3, %s5306_s7 }
  0x29   : > { %6723 = vtanh.f32 %v321_v0  ;;  %v320_v3 = vld [vmem:[%s7628_s10 + $0x8] sm:$0xff]  ;;  %v323_v5 = vld [vmem:[%s7628_s10 + $0x20] sm:$0xff]  ;;  %v326_v6 = vld [vmem:[%s7628_s10 + $0x38] sm:$0xff] }
  0x2a   : > { %6725 = vtanh.f32 %v319_v1  ;;  %v324_v4 = vld [vmem:[%s7628_s10 + $0x28] sm:$0xff]  ;;  %v325_v7 = vld [vmem:[%s7628_s10 + $0x30] sm:$0xff]  ;;  %v327_v9 = vld [vmem:[%s7628_s10 + $0x40] sm:$0xff] }
  0x2b   : > { %6727 = vtanh.f32 %v322_v2  ;;  %v328_v8 = vld [vmem:[%s7628_s10 + $0x48] sm:$0xff]  ;;  %v330_v10 = vld [vmem:[%s7628_s10 + $0x58] sm:$0xff]  ;;  %v329_v11 = vld [vmem:[%s7628_s10 + $0x50] sm:$0xff] }
  0x2c   : > { %6729 = vtanh.f32 %v320_v3  ;;  %v332_v12 = vld [vmem:[%s7628_s10 + $0x68] sm:$0xff] }
  0x2d   : > { %6731 = vtanh.f32 %v324_v4 }
  0x2e   : > { %6733 = vtanh.f32 %v323_v5 }
  0x2f   : > { %6735 = vtanh.f32 %v326_v6 }
  0x30   : > { %6737 = vtanh.f32 %v325_v7 }
  0x31   : > { %6739 = vtanh.f32 %v328_v8 }
  0x32   : > { %6741 = vtanh.f32 %v327_v9  ;;  %v7744_v9 = vstv %s7682_s12 }
  0x33   : > { %v7643_v13 = vpop.eup %6723  ;;  %6743 = vtanh.f32 %v330_v10 }
  0x34   : > { %v7645_v14 = vpop.eup %6725  ;;  %v5345_v15 = vmul.f32 -1.442695, %v7643_v13  ;;  %6745 = vtanh.f32 %v329_v11  ;;  %v1060_v16 = vmul.f32 %v7643_v13, %v7643_v13 }
  0x35   : > { %v7650_v17 = vpop.eup %6727  ;;  %v5343_v18 = vmul.f32 -1.442695, %v7645_v14  ;;  %6747 = vtanh.f32 %v332_v12  ;;  %v1058_v22 = vmul.f32 %v7645_v14, %v7645_v14 }
  0x36   : > { %v7653_v19 = vpop.eup %6729  ;;  %6749 = vpow2.f32 %v5345_v15  ;;  %v5346_v20 = vmul.f32 -1.442695, %v7650_v17  ;;  %v7666_v26 = vsub.f32 %v1060_v16, %v7656_v21  ;;  %v1061_v31 = vmul.f32 %v7650_v17, %v7650_v17 }
  0x37   : > { %v7660_v23 = vpop.eup %6731  ;;  %6751 = vpow2.f32 %v5343_v18  ;;  %v5344_v24 = vmul.f32 -1.442695, %v7653_v19  ;;  %v1059_v25 = vmul.f32 %v7653_v19, %v7653_v19  ;;  %v7688_v37 = vsub.f32 %v1058_v22, %v7656_v21 }
  0x38   : > { %v7668_v27 = vpop.eup %6733  ;;  %6753 = vpow2.f32 %v5346_v20  ;;  %v5348_v28 = vmul.f32 -1.442695, %v7660_v23  ;;  %v7691_v38 = vmul.f32 -1.442695, %v7666_v26  ;;  %v1063_v41 = vmul.f32 %v7660_v23, %v7660_v23 }
  0x39   : > { %v7671_v29 = vpop.eup %6735  ;;  %6755 = vpow2.f32 %v5344_v24  ;;  %v5347_v30 = vmul.f32 -1.442695, %v7668_v27  ;;  %v7680_v34 = vsub.f32 %v1059_v25, %v7656_v21  ;;  %v1062_v42 = vmul.f32 %v7668_v27, %v7668_v27 }
  0x3a   : > { %v7676_v32 = vpop.eup %6737  ;;  %6757 = vpow2.f32 %v5348_v28  ;;  %v5350_v33 = vmul.f32 -1.442695, %v7671_v29  ;;  %v7704_v45 = vsub.f32 %v1061_v31, %v7656_v21  ;;  %v1065_v51 = vmul.f32 %v7671_v29, %v7671_v29 }
  0x3b   : > { %v7684_v35 = vpop.eup %6739  ;;  %6759 = vpow2.f32 %v5347_v30  ;;  %v5349_v36 = vmul.f32 -1.442695, %v7676_v32  ;;  %v5376_v48 = vmul.f32 -1.442695, %v7680_v34  ;;  %v1064_v52 = vmul.f32 %v7676_v32, %v7676_v32 }
  0x3c   : > { %v7693_v39 = vpop.eup %6741  ;;  %6761 = vpow2.f32 %v5350_v33  ;;  %v5352_v40 = vmul.f32 -1.442695, %v7684_v35  ;;  %v7718_v54 = vmul.f32 -1.442695, %v7688_v37  ;;  %v7721_v55 = vsub.f32 %v1063_v41, %v7656_v21 }
  0x3d   : > { %v7700_v43 = vpop.eup %6743  ;;  %6763 = vpow2.f32 %v5349_v36  ;;  %v5351_v44 = vmul.f32 -1.442695, %v7693_v39  ;;  %v7724_v56 = vsub.f32 %v1062_v42, %v7656_v21  ;;  %v7727_v59 = vmul.f32 -1.442695, %v7704_v45 }
  0x3e   : > { %v7706_v46 = vpop.eup %6745  ;;  %6765 = vpow2.f32 %v5352_v40  ;;  %v5354_v47 = vmul.f32 -1.442695, %v7700_v43  ;;  %v7730_v0 = vsub.f32 %v1065_v51, %v7656_v21  ;;  %v7733_v1 = vsub.f32 %v1064_v52, %v7656_v21 }
  0x3f   : > { %v7710_v49 = vpop.eup %6747  ;;  %6767 = vpow2.f32 %v5351_v44  ;;  %v5353_v50 = vmul.f32 -1.442695, %v7706_v46  ;;  %v7736_v4 = vmul.f32 -1.442695, %v7721_v55  ;;  %v7739_v5 = vmul.f32 -1.442695, %v7724_v56 }
  0x40   : > { %v6750_v53 = vpop.eup %6749  ;;  %6769 = vpow2.f32 %v5354_v47  ;;  %v1067_v8 = vmul.f32 %v7684_v35, %v7684_v35  ;;  %v7747_v16 = vmul.f32 -1.442695, %v7730_v0  ;;  %v7750_v18 = vmul.f32 -1.442695, %v7733_v1 }
  0x41   : > { %v6752_v57 = vpop.eup %6751  ;;  %v771_v58 = vadd.f32 1.0, %v6750_v53  ;;  %6771 = vpow2.f32 %v5353_v50  ;;  %v1543_v24 = vmul.f32 %v7645_v14, %v7744_v9  ;;  %v1545_v25 = vmul.f32 %v7643_v13, %v7744_v9 }
  0x42   : > { %v6754_v60 = vpop.eup %6753  ;;  %v769_v61 = vadd.f32 1.0, %v6752_v57  ;;  %6773 = vpow2.f32 %v5376_v48  ;;  %v7757_v31 = vsub.f32 %v1067_v8, %v7656_v21  ;;  %v1066_v33 = vmul.f32 %v7693_v39, %v7693_v39 }
  0x43   : > { %v6756_v62 = vpop.eup %6755  ;;  %6775 = vrcp.f32 %v771_v58  ;;  %v772_v63 = vadd.f32 1.0, %v6754_v60  ;;  %v1510_v41 = vmul.f32 %v7653_v19, %v7680_v34  ;;  %v1544_v42 = vmul.f32 %v7653_v19, %v7744_v9 }
  0x44   : > { %v6758_v2 = vpop.eup %6757  ;;  %6777 = vrcp.f32 %v769_v61  ;;  %v770_v3 = vadd.f32 1.0, %v6756_v62  ;;  %v1509_v48 = vmul.f32 %v7645_v14, %v7688_v37  ;;  %v1512_v50 = vmul.f32 %v7650_v17, %v7704_v45 }
  0x45   : > { %v6760_v6 = vpop.eup %6759  ;;  %6779 = vrcp.f32 %v772_v63  ;;  %v774_v7 = vadd.f32 1.0, %v6758_v2  ;;  %v1546_v53 = vmul.f32 %v7650_v17, %v7744_v9  ;;  %v1511_v57 = vmul.f32 %v7643_v13, %v7666_v26 }
  0x46   : > { %v6762_v10 = vpop.eup %6761  ;;  %6781 = vrcp.f32 %v770_v3  ;;  %v773_v11 = vadd.f32 1.0, %v6760_v6  ;;  %v5384_v61 = vmul.f32 -1.442695, %v7757_v31  ;;  %v7775_v62 = vsub.f32 %v1066_v33, %v7656_v21 }
  0x47   : > { %v6764_v12 = vpop.eup %6763  ;;  %6783 = vrcp.f32 %v774_v7  ;;  %v776_v15 = vadd.f32 1.0, %v6762_v10  ;;  %v1514_v3 = vmul.f32 %v7660_v23, %v7721_v55  ;;  %v1548_v6 = vmul.f32 %v7660_v23, %v7744_v9 }
  0x48   : > { %v6766_v20 = vpop.eup %6765  ;;  %6785 = vrcp.f32 %v773_v11  ;;  %v775_v22 = vadd.f32 1.0, %v6764_v12  ;;  %v7783_v10 = vsub.f32 %v1510_v41, %v1544_v42  ;;  %v7785_v11 = vsub.f32 %v1509_v48, %v1543_v24 }
  0x49   : > { %v6768_v28 = vpop.eup %6767  ;;  %6787 = vrcp.f32 %v776_v15  ;;  %v778_v30 = vadd.f32 1.0, %v6766_v20  ;;  %v7790_v15 = vsub.f32 %v1512_v50, %v1546_v53  ;;  %v7792_v20 = vsub.f32 %v1511_v57, %v1545_v25 }
  0x4a   : > { %v6770_v36 = vpop.eup %6769  ;;  %6789 = vrcp.f32 %v775_v22  ;;  %v777_v40 = vadd.f32 1.0, %v6768_v28  ;;  %v1513_v24 = vmul.f32 %v7668_v27, %v7724_v56  ;;  %v1547_v28 = vmul.f32 %v7668_v27, %v7744_v9 }
  0x4b   : > { %v6772_v44 = vpop.eup %6771  ;;  %6791 = vrcp.f32 %v778_v30  ;;  %v780_v47 = vadd.f32 1.0, %v6770_v36  ;;  %v7803_v25 = vsub.f32 %v1514_v3, %v1548_v6  ;;  %v5408_v36 = vmul.f32 -1.442695, %v7785_v11 }
  0x4c   : > { %v6774_v51 = vpop.eup %6773  ;;  %6793 = vrcp.f32 %v777_v40  ;;  %v779_v52 = vadd.f32 1.0, %v6772_v44  ;;  %v7816_v42 = vsub.f32 %v1513_v24, %v1547_v28 }
  0x4d   : > { %v6776_v58 = vpop.eup %6775  ;;  %6795 = vrcp.f32 %v780_v47  ;;  %v1221_v60 = vadd.f32 1.0, %v6774_v51  ;;  %v1550_v47 = vmul.f32 %v7671_v29, %v7744_v9 }
  0x4e   : > { %v6778_v63 = vpop.eup %6777  ;;  %v867_v2 = vmul.f32 %v6776_v58, %v7643_v13  ;;  %6797 = vrcp.f32 %v779_v52  ;;  %v7839_v53 = vmul.f32 -1.442695, %v7816_v42 }
  0x4f   : > { %v6780_v7 = vpop.eup %6779  ;;  %v865_v8 = vmul.f32 %v6778_v63, %v7645_v14  ;;  %6799 = vrcp.f32 %v1221_v60  ;;  %v7845_v60 = vmul.f32 %v7676_v32, %v7733_v1 }
  0x50   : > { %v6782_v12 = vpop.eup %6781  ;;  %933 = vrot.lane.b32.xlu1 %v867_v2, %s7530_s13  ;;  %v868_v13 = vmul.f32 %v6780_v7, %v7650_v17  ;;  %6801 = vpow2.f32 %v7718_v54  ;;  %v5383_v54 = vmul.f32 -1.442695, %v7775_v62 }
  0x51   : > { %v6784_v22 = vpop.eup %6783  ;;  %929 = vrot.lane.b32.xlu0 %v865_v8, %s7530_s13  ;;  %v866_v14 = vmul.f32 %v6782_v12, %v7653_v19  ;;  %6803 = vpow2.f32 %v7727_v59  ;;  %v5409_v19 = vmul.f32 -1.442695, %v7783_v10 }
  0x52   : > { %v6786_v17 = vpop.eup %6785  ;;  %6805 = vpow2.f32 %v7691_v38  ;;  %v870_v59 = vmul.f32 %v6784_v22, %v7660_v23  ;;  %v5411_v38 = vmul.f32 -1.442695, %v7790_v15  ;;  %v7820_v23 = vmul.f32 -1.442695, %v7803_v25 }
  0x53   : > { %v6788_v30 = vpop.eup %6787  ;;  %6807 = vpow2.f32 %v7736_v4  ;;  %v869_v41 = vmul.f32 %v6786_v17, %v7668_v27  ;;  %v5410_v4 = vmul.f32 -1.442695, %v7792_v20  ;;  %v1069_v27 = vmul.f32 %v7700_v43, %v7700_v43 }
  0x54   : > { %v6790_v33 = vpop.eup %6789  ;;  %935 = vrot.lane.b32.xlu1 %v868_v13, %s7530_s13  ;;  %6809 = vpow2.f32 %v7739_v5  ;;  %v1516_v5 = vmul.f32 %v7671_v29, %v7730_v0  ;;  %v7871_v17 = vmul.f32 %v7693_v39, %v7775_v62 }
  0x55   : > { %v6792_v40 = vpop.eup %6791  ;;  %931 = vrot.lane.b32.xlu0 %v866_v14, %s7530_s13  ;;  %6811 = vpow2.f32 %v7747_v16  ;;  %v1068_v16 = vmul.f32 %v7706_v46, %v7706_v46  ;;  %v871_v52 = vmul.f32 %v6790_v33, %v7676_v32  ;;  %v7852_v2 = vsub.f32 %v1069_v27, %v7656_v21 }
  0x56   : > { %v6794_v44 = vpop.eup %6793  ;;  %6813 = vpow2.f32 %v7750_v18  ;;  %v872_v18 = vmul.f32 %v6788_v30, %v7671_v29  ;;  %v7841_v58 = vsub.f32 %v1516_v5, %v1550_v47  ;;  %v7849_v29 = vmul.f32 %v7676_v32, %v7744_v9 }
  0x57   : > { %v6796_v48 = vpop.eup %6795  ;;  %6815 = vpow2.f32 %v5384_v61  ;;  %v7855_v3 = vsub.f32 %v1068_v16, %v7656_v21  ;;  %v874_v7 = vmul.f32 %v6792_v40, %v7684_v35  ;;  %v7861_v32 = vmul.f32 %v7684_v35, %v7757_v31 }
  0x58   : > { %v7830_v50 = vpop.eup %6797  ;;  %939 = vrot.lane.b32.xlu1 %v870_v59, %s7530_s13  ;;  %6817 = vpow2.f32 %v5383_v54  ;;  %v873_v13 = vmul.f32 %v6794_v44, %v7693_v39  ;;  %v7867_v14 = vmul.f32 %v7684_v35, %v7744_v9  ;;  %v7874_v30 = vmul.f32 %v6796_v48, %v7700_v43 }
  0x59   : > { %v7834_v51 = vpop.eup %6799  ;;  %937 = vrot.lane.b32.xlu0 %v869_v41, %s7530_s13  ;;  %6819 = vpow2.f32 %v5409_v19  ;;  %v7878_v33 = vmul.f32 %v7693_v39, %v7744_v9  ;;  %v7531_v59 = vmov 0.0   ;;  %v875_v40 = vmul.f32 %v7830_v50, %v7706_v46 }
  0x5a   : > { %v6802_v57 = vpop.eup %6801  ;;  %6821 = vpow2.f32 %v5408_v36  ;;  %242 = vst [vmem:[#allocation2] sm:$0xff] %v7531_v59  ;;  %243 = vst [vmem:[#allocation2 + $0x8] sm:$0xff] %v7531_v59  ;;  %v7921_v36 = vmul.f32 %v7700_v43, %v7852_v2  ;;  %v1519_v5 = vmul.f32 %v7706_v46, %v7855_v3  ;;  %v1553_v47 = vmul.f32 %v7706_v46, %v7744_v9 }
  0x5b   : > { %v6804_v61 = vpop.eup %6803  ;;  %v1220_v63 = vadd.f32 1.0, %v6802_v57  ;;  %6823 = vpow2.f32 %v5411_v38  ;;  %244 = vst [vmem:[#allocation2 + $0x10] sm:$0x3] %v7531_v59  ;;  %246 = vst [vmem:[#allocation2 + $0x198] sm:$0xff] %v7531_v59  ;;  %v8002_v16 = vsub.f32 %v7845_v60, %v7849_v29  ;;  %v8010_v57 = vsub.f32 %v7861_v32, %v7867_v14 }
  0x5c   : > { %v6806_v6 = vpop.eup %6805  ;;  %943 = vrot.lane.b32.xlu1 %v872_v18, %s7530_s13  ;;  %v1223_v8 = vadd.f32 1.0, %v6804_v61  ;;  %6825 = vpow2.f32 %v5410_v4  ;;  %247 = vst [vmem:[#allocation2 + $0x1a0] sm:$0xff] %v7531_v59  ;;  %248 = vst [vmem:[#allocation2 + $0x1a8] sm:$0x3] %v7531_v59  ;;  %v1554_v4 = vmul.f32 %v7700_v43, %v7744_v9  ;;  %v1317_v18 = vmul.f32 %v7834_v51, %v7680_v34 }
  0x5d   : > { %v6808_v12 = vpop.eup %6807  ;;  %941 = vrot.lane.b32.xlu0 %v871_v52, %s7530_s13  ;;  %6827 = vrcp.f32 %v1220_v63  ;;  %v1222_v22 = vadd.f32 1.0, %v6806_v6  ;;  %250 = vst [vmem:[#allocation2 + $0x18] sm:$0x1] %v7531_v59  ;;  %251 = vst [vmem:[#allocation2 + $0x30] sm:$0x1] %v7531_v59  ;;  %v8015_v60 = vsub.f32 %v7871_v17, %v7878_v33  ;;  %v8021_v6 = vsub.f32 %v1519_v5, %v1553_v47 }
  0x5e   : > { %v6810_v24 = vpop.eup %6809  ;;  %6829 = vrcp.f32 %v1223_v8  ;;  %v1225_v28 = vadd.f32 1.0, %v6808_v12  ;;  %252 = vst [vmem:[#allocation2 + $0x48] sm:$0x1] %v7531_v59  ;;  %253 = vst [vmem:[#allocation2 + $0x60] sm:$0x1] %v7531_v59  ;;  %v8018_v29 = vsub.f32 %v7921_v36, %v1554_v4  ;;  %v334_v4 = vld [vmem:[%s7628_s10 + $0x78] sm:$0xff]  ;;  %v1071_v5 = vmul.f32 %v7710_v49, %v7710_v49 }
  0x5f   : > { %v6812_v54 = vpop.eup %6811  ;;  %6831 = vrcp.f32 %v1222_v22  ;;  %v1224_v19 = vadd.f32 1.0, %v6810_v24  ;;  %254 = vst [vmem:[#allocation2 + $0x78] sm:$0x1] %v7531_v59  ;;  %255 = vst [vmem:[#allocation2 + $0x90] sm:$0x1] %v7531_v59 }
  0x60   : > { %256 = vst [vmem:[#allocation2 + $0xa8] sm:$0x1] %v7531_v59  ;;  %257 = vst [vmem:[#allocation2 + $0xc0] sm:$0x1] %v7531_v59  ;;  %v6814_v35 = vpop.eup %6813  ;;  %947 = vrot.lane.b32.xlu1 %v874_v7, %s7530_s13  ;;  %6833 = vrcp.f32 %v1225_v28  ;;  %v1227_v39 = vadd.f32 1.0, %v6812_v54 }
  0x61   : > { %258 = vst [vmem:[#allocation2 + $0xd8] sm:$0x1] %v7531_v59  ;;  %259 = vst [vmem:[#allocation2 + $0xf0] sm:$0x1] %v7531_v59  ;;  %v6816_v38 = vpop.eup %6815  ;;  %945 = vrot.lane.b32.xlu0 %v873_v13, %s7530_s13  ;;  %6835 = vrcp.f32 %v1224_v19  ;;  %v1226_v41 = vadd.f32 1.0, %v6814_v35 }
  0x62   : > { %260 = vst [vmem:[#allocation2 + $0x108] sm:$0x1] %v7531_v59  ;;  %261 = vst [vmem:[#allocation2 + $0x120] sm:$0x1] %v7531_v59  ;;  %v6818_v43 = vpop.eup %6817  ;;  %6837 = vrcp.f32 %v1227_v39  ;;  %v1229_v44 = vadd.f32 1.0, %v6816_v38 }
  0x63   : > { %262 = vst [vmem:[#allocation2 + $0x138] sm:$0x1] %v7531_v59  ;;  %263 = vst [vmem:[#allocation2 + $0x150] sm:$0x1] %v7531_v59  ;;  %v6820_v48 = vpop.eup %6819  ;;  %6839 = vrcp.f32 %v1226_v41  ;;  %v1228_v27 = vadd.f32 1.0, %v6818_v43  ;;  %v331_v41 = vld [vmem:[%s7628_s10 + $0x60] sm:$0xff] }
  0x64   : > { %264 = vst [vmem:[#allocation2 + $0x168] sm:$0x1] %v7531_v59  ;;  %265 = vst [vmem:[#allocation2 + $0x180] sm:$0x1] %v7531_v59  ;;  %v6822_v50 = vpop.eup %6821  ;;  %951 = vrot.lane.b32.xlu1 %v7874_v30, %s7530_s13  ;;  %6841 = vrcp.f32 %v1229_v44  ;;  %v1704_v52 = vadd.f32 1.0, %v6820_v48 }
  0x65   : > { %268 = vst [vmem:[#allocation2 + $0x29] sm:$0x1] %v7531_v59  ;;  %269 = vst [vmem:[#allocation2 + $0x41] sm:$0x1] %v7531_v59  ;;  %v6824_v46 = vpop.eup %6823  ;;  %949 = vrot.lane.b32.xlu0 %v875_v40, %s7530_s13  ;;  %6843 = vrcp.f32 %v1228_v27  ;;  %v1703_v61 = vadd.f32 1.0, %v6822_v50 }
  0x66   : > { %270 = vst [vmem:[#allocation2 + $0x59] sm:$0x1] %v7531_v59  ;;  %271 = vst [vmem:[#allocation2 + $0x71] sm:$0x1] %v7531_v59  ;;  %v6826_v63 = vpop.eup %6825  ;;  %6845 = vrcp.f32 %v1704_v52  ;;  %v1706_v34 = vadd.f32 1.0, %v6824_v46 }
  0x67   : > { %272 = vst [vmem:[#allocation2 + $0x89] sm:$0x1] %v7531_v59  ;;  %273 = vst [vmem:[#allocation2 + $0xa1] sm:$0x1] %v7531_v59  ;;  %v5415_v51 = vmul.f32 -1.442695, %v7841_v58  ;;  %v6828_v7 = vpop.eup %6827  ;;  %6847 = vrcp.f32 %v1703_v61  ;;  %v8055_v61 = vsub.f32 %v1071_v5, %v7656_v21 }
  0x68   : > { %274 = vst [vmem:[#allocation2 + $0xb9] sm:$0x1] %v7531_v59  ;;  %275 = vst [vmem:[#allocation2 + $0xd1] sm:$0x1] %v7531_v59  ;;  %v1705_v8 = vadd.f32 1.0, %v6826_v63  ;;  %v6830_v13 = vpop.eup %6829  ;;  %1382 = vrot.lane.b32.xlu1 %v1317_v18, %s7532_s17  ;;  %v1316_v22 = vmul.f32 %v6828_v7, %v7688_v37  ;;  %6849 = vrcp.f32 %v1706_v34 }
  0x69   : > { %276 = vst [vmem:[#allocation2 + $0xe9] sm:$0x1] %v7531_v59  ;;  %277 = vst [vmem:[#allocation2 + $0x101] sm:$0x1] %v7531_v59  ;;  %v5414_v32 = vmul.f32 -1.442695, %v8002_v16  ;;  %v6832_v28 = vpop.eup %6831  ;;  %v1319_v17 = vmul.f32 %v6830_v13, %v7704_v45 }
  0x6a   : > { %278 = vst [vmem:[#allocation2 + $0x119] sm:$0x1] %v7531_v59  ;;  %279 = vst [vmem:[#allocation2 + $0x131] sm:$0x1] %v7531_v59  ;;  %v5386_v12 = vmul.f32 -1.442695, %v7852_v2  ;;  %6851 = vrcp.f32 %v1705_v8  ;;  %v6834_v19 = vpop.eup %6833  ;;  %1380 = vrot.lane.b32.xlu0 %v1316_v22, %s7532_s17  ;;  %v1318_v33 = vmul.f32 %v6832_v28, %v7666_v26  ;;  %v1556_v8 = vmul.f32 %v7710_v49, %v7744_v9 }
  0x6b   : > { %280 = vst [vmem:[#allocation2 + $0x149] sm:$0x1] %v7531_v59  ;;  %281 = vst [vmem:[#allocation2 + $0x161] sm:$0x1] %v7531_v59  ;;  %v5385_v14 = vmul.f32 -1.442695, %v7855_v3  ;;  %6853 = vpow2.f32 %v7820_v23  ;;  %v6836_v35 = vpop.eup %6835  ;;  %v1321_v39 = vmul.f32 %v6834_v19, %v7721_v55 }
  0x6c   : > { %282 = vst [vmem:[#allocation2 + $0x179] sm:$0x1] %v7531_v59  ;;  %283 = vst [vmem:[#allocation2 + $0x191] sm:$0x1] %v7531_v59  ;;  %v5417_v24 = vmul.f32 -1.442695, %v8010_v57  ;;  %6855 = vpow2.f32 %v7839_v53  ;;  %v6838_v45 = vpop.eup %6837  ;;  %1386 = vrot.lane.b32.xlu1 %v1319_v17, %s7532_s17  ;;  %v1320_v23 = vmul.f32 %v6836_v35, %v7724_v56 }
  0x6d   : > { %249 = vst [vmem:[#allocation2] sm:$0x1] %v7531_v59  ;;  %266 = vst [vmem:[#allocation2 + $0x198] sm:$0x1] %v7531_v59  ;;  %v5416_v54 = vmul.f32 -1.442695, %v8015_v60  ;;  %6857 = vpow2.f32 %v5415_v51  ;;  %v6840_v36 = vpop.eup %6839  ;;  %v1323_v53 = vmul.f32 %v6838_v45, %v7730_v0 }
  0x6e   : > { %267 = vst [vmem:[#allocation2 + $0x11] sm:$0x1] %v7531_v59  ;;  %284 = vst [vmem:[#allocation2 + $0x1a9] sm:$0x1] %v7531_v59  ;;  %v5419_v30 = vmul.f32 -1.442695, %v8018_v29  ;;  %6859 = vpow2.f32 %v5414_v32  ;;  %v6842_v26 = vpop.eup %6841  ;;  %1384 = vrot.lane.b32.xlu0 %v1318_v33, %s7532_s17  ;;  %v1322_v44 = vmul.f32 %v6840_v36, %v7733_v1 }
  0x6f   : > { %289 = vst.msk [vmem:[#allocation2 + $0x31] sm:$0xff] %vm286_vm0, %v7531_v59  ;;  %287 = vst.msk [vmem:[#allocation2 + $0x19] sm:$0xff] %vm286_vm0, %v7531_v59  ;;  %v5418_v37 = vmul.f32 -1.442695, %v8021_v6  ;;  %6861 = vpow2.f32 %v5386_v12  ;;  %v6844_v38 = vpop.eup %6843  ;;  %v1325_v0 = vmul.f32 %v6842_v26, %v7757_v31  ;;  %v5388_v36 = vmul.f32 -1.442695, %v8055_v61 }
  0x70   : > { %288 = vst.msk [vmem:[#allocation2 + $0x21] sm:$0xff] %vm286_vm0, %v7531_v59  ;;  %290 = vst.msk [vmem:[#allocation2 + $0x39] sm:$0xff] %vm286_vm0, %v7531_v59  ;;  %6863 = vpow2.f32 %v5385_v14  ;;  %v6846_v40 = vpop.eup %6845  ;;  %1390 = vrot.lane.b32.xlu1 %v1321_v39, %s7532_s17  ;;  %v1324_v1 = vmul.f32 %v6844_v38, %v7775_v62  ;;  %v1522_v62 = vmul.f32 %v7710_v49, %v8055_v61  ;;  %v333_v39 = vld [vmem:[%s7628_s10 + $0x70] sm:$0xff] }
  0x71   : > { %291 = vst.msk [vmem:[#allocation2 + $0x49] sm:$0xff] %vm286_vm0, %v7531_v59  ;;  %292 = vst.msk [vmem:[#allocation2 + $0x51] sm:$0xff] %vm286_vm0, %v7531_v59  ;;  %6865 = vpow2.f32 %v5417_v24  ;;  %v6848_v55 = vpop.eup %6847  ;;  %v1800_v31 = vmul.f32 %v6846_v40, %v7783_v10 }
  0x72   : > { %293 = vst.msk [vmem:[#allocation2 + $0x61] sm:$0xff] %vm286_vm0, %v7531_v59  ;;  %294 = vst.msk [vmem:[#allocation2 + $0x69] sm:$0xff] %vm286_vm0, %v7531_v59  ;;  %6867 = vpow2.f32 %v5416_v54  ;;  %v6850_v43 = vpop.eup %6849  ;;  %1388 = vrot.lane.b32.xlu0 %v1320_v23, %s7532_s17  ;;  %v1799_v12 = vmul.f32 %v6848_v55, %v7785_v11  ;;  %v6651_v11 = vld [vmem:[%s7620_s6 + $0x40] sm:$0xff]  }
  0x73   : > { %295 = vst.msk [vmem:[#allocation2 + $0x79] sm:$0xff] %vm286_vm0, %v7531_v59  ;;  %296 = vst.msk [vmem:[#allocation2 + $0x81] sm:$0xff] %vm286_vm0, %v7531_v59  ;;  %6869 = vpow2.f32 %v5419_v30  ;;  %v1802_v24 = vmul.f32 %v6850_v43, %v7790_v15  ;;  %v8067_v30 = vsub.f32 %v1522_v62, %v1556_v8  ;;  %5890 = vmatprep.subr.bf16.mxu1 %v6651_v11 }
  0x74   : > { %297 = vst.msk [vmem:[#allocation2 + $0x91] sm:$0xff] %vm286_vm0, %v7531_v59  ;;  %298 = vst.msk [vmem:[#allocation2 + $0x99] sm:$0xff] %vm286_vm0, %v7531_v59  ;;  %v6852_v56 = vpop.eup %6851  ;;  %6871 = vpow2.f32 %v5418_v37  ;;  %1394 = vrot.lane.b32.xlu1 %v1323_v53, %s7532_s17  ;;  %5891 = vmatpush3.bf16.msra.mxu1 %v6651_v11  ;;  %v6652_v53 = vld [vmem:[%s7620_s6 + $0x48] sm:$0xff]  }
  0x75   : > { %299 = vst.msk [vmem:[#allocation2 + $0xa9] sm:$0xff] %vm286_vm0, %v7531_v59  ;;  %300 = vst.msk [vmem:[#allocation2 + $0xb1] sm:$0xff] %vm286_vm0, %v7531_v59  ;;  %v6854_v47 = vpop.eup %6853  ;;  %v1801_v33 = vmul.f32 %v6852_v56, %v7792_v20  ;;  %v5421_v40 = vmul.f32 -1.442695, %v8067_v30  ;;  %5892 = vmatprep.subr.bf16.mxu1 %v6652_v53 }
  0x76   : > { %301 = vst.msk [vmem:[#allocation2 + $0xc1] sm:$0xff] %vm286_vm0, %v7531_v59  ;;  %302 = vst.msk [vmem:[#allocation2 + $0xc9] sm:$0xff] %vm286_vm0, %v7531_v59  ;;  %v6856_v48 = vpop.eup %6855  ;;  %v1708_v27 = vadd.f32 1.0, %v6854_v47  ;;  %1392 = vrot.lane.b32.xlu0 %v1322_v44, %s7532_s17 }
  0x77   : > { %303 = vst.msk [vmem:[#allocation2 + $0xd9] sm:$0xff] %vm286_vm0, %v7531_v59  ;;  %304 = vst.msk [vmem:[#allocation2 + $0xe1] sm:$0xff] %vm286_vm0, %v7531_v59  ;;  %v6858_v50 = vpop.eup %6857  ;;  %v1707_v18 = vadd.f32 1.0, %v6856_v48 }
  0x78   : > { %305 = vst.msk [vmem:[#allocation2 + $0xf1] sm:$0xff] %vm286_vm0, %v7531_v59  ;;  %306 = vst.msk [vmem:[#allocation2 + $0xf9] sm:$0xff] %vm286_vm0, %v7531_v59  ;;  %v6860_v52 = vpop.eup %6859  ;;  %v1710_v46 = vadd.f32 1.0, %v6858_v50  ;;  %1398 = vrot.lane.b32.xlu1 %v1325_v0, %s7532_s17  ;;  %5893 = vmatpush3.bf16.msra.mxu1 %v6652_v53 }
  0x79   : > { %307 = vst.msk [vmem:[#allocation2 + $0x109] sm:$0xff] %vm286_vm0, %v7531_v59  ;;  %308 = vst.msk [vmem:[#allocation2 + $0x111] sm:$0xff] %vm286_vm0, %v7531_v59  ;;  %v6862_v63 = vpop.eup %6861  ;;  %v1709_v34 = vadd.f32 1.0, %v6860_v52  ;;  %v6654_v52 = vld [vmem:[%s7620_s6 + $0x50] sm:$0xff]  }
  0x7a   : > { %309 = vst.msk [vmem:[#allocation2 + $0x121] sm:$0xff] %vm286_vm0, %v7531_v59  ;;  %310 = vst.msk [vmem:[#allocation2 + $0x129] sm:$0xff] %vm286_vm0, %v7531_v59  ;;  %v6864_v51 = vpop.eup %6863  ;;  %v1231_v7 = vadd.f32 1.0, %v6862_v63  ;;  %1396 = vrot.lane.b32.xlu0 %v1324_v1, %s7532_s17  ;;  %5894 = vmatprep.subr.bf16.mxu1 %v6654_v52 }
  0x7b   : > { %311 = vst.msk [vmem:[#allocation2 + $0x139] sm:$0xff] %vm286_vm0, %v7531_v59  ;;  %312 = vst.msk [vmem:[#allocation2 + $0x141] sm:$0xff] %vm286_vm0, %v7531_v59  ;;  %v6866_v32 = vpop.eup %6865  ;;  %v1230_v13 = vadd.f32 1.0, %v6864_v51 }
  0x7c   : > { %313 = vst.msk [vmem:[#allocation2 + $0x151] sm:$0xff] %vm286_vm0, %v7531_v59  ;;  %314 = vst.msk [vmem:[#allocation2 + $0x159] sm:$0xff] %vm286_vm0, %v7531_v59  ;;  %v6868_v10 = vpop.eup %6867  ;;  %v1712_v22 = vadd.f32 1.0, %v6866_v32  ;;  %1865 = vrot.lane.b32.xlu1 %v1800_v31, %s7533_s20  ;;  %5895 = vmatpush3.bf16.msra.mxu1 %v6654_v52 }
  0x7d   : > { %315 = vst.msk [vmem:[#allocation2 + $0x169] sm:$0xff] %vm286_vm0, %v7531_v59  ;;  %316 = vst.msk [vmem:[#allocation2 + $0x171] sm:$0xff] %vm286_vm0, %v7531_v59  ;;  %v6870_v14 = vpop.eup %6869  ;;  %v1711_v28 = vadd.f32 1.0, %v6868_v10  ;;  %v6656_v10 = vld [vmem:[%s7620_s6 + $0x58] sm:$0xff]  }
  0x7e   : > { %317 = vst.msk [vmem:[#allocation2 + $0x181] sm:$0xff] %vm286_vm0, %v7531_v59  ;;  %318 = vst.msk [vmem:[#allocation2 + $0x189] sm:$0xff] %vm286_vm0, %v7531_v59  ;;  %v5356_v59 = vmul.f32 -1.442695, %v7710_v49  ;;  %v6872_v17 = vpop.eup %6871  ;;  %v1714_v54 = vadd.f32 1.0, %v6870_v14  ;;  %1863 = vrot.lane.b32.xlu0 %v1799_v12, %s7533_s20  ;;  %5896 = vmatprep.subr.bf16.mxu1 %v6656_v10 }
  0x7f   : > { %v1713_v37 = vadd.f32 1.0, %v6872_v17  ;;  %v337_v17 = vld [vmem:[%s7628_s10 + $0x90] sm:$0xff] }
  0x80   : > { %6873 = vpow2.f32 %v5356_v59  ;;  %1869 = vrot.lane.b32.xlu1 %v1802_v24, %s7533_s20  ;;  %5897 = vmatpush3.bf16.msra.mxu1 %v6656_v10 }
  0x81   : > { %6875 = vtanh.f32 %v331_v41  ;;  %v6653_v41 = vld [vmem:[%s7620_s6 + $0x100] sm:$0xff]  }
  0x82   : > { %6877 = vtanh.f32 %v334_v4  ;;  %1867 = vrot.lane.b32.xlu0 %v1801_v33, %s7533_s20  ;;  %6082 = vmatprep.subr.bf16.mxu0 %v6653_v41 }
  0x83   : > { %6879 = vrcp.f32 %v1708_v27  ;;  %6083 = vmatpush3.bf16.msra.mxu0 %v6653_v41 }
  0x84   : > { %6881 = vrcp.f32 %v1707_v18 }
  0x85   : > { %6883 = vrcp.f32 %v1710_v46  ;;  %v6655_v46 = vld [vmem:[%s7620_s6 + $0x108] sm:$0xff]  }
  0x86   : > { %6885 = vrcp.f32 %v1709_v34  ;;  %v336_v34 = vld [vmem:[%s7628_s10 + $0x88] sm:$0xff]  ;;  %6084 = vmatprep.subr.bf16.mxu0 %v6655_v46 }
  0x87   : > { %6887 = vrcp.f32 %v1231_v7  ;;  %6085 = vmatpush3.bf16.msra.mxu0 %v6655_v46 }
  0x88   : > { %6889 = vrcp.f32 %v1230_v13  ;;  %v335_v13 = vld [vmem:[%s7628_s10 + $0x80] sm:$0xff] }
  0x89   : > { %6891 = vrcp.f32 %v1712_v22  ;;  %v6657_v22 = vld [vmem:[%s7620_s6 + $0x110] sm:$0xff]  }
  0x8a   : > { %v6874_v19 = vpop.eup %6873  ;;  %6893 = vrcp.f32 %v1711_v28  ;;  %6086 = vmatprep.subr.bf16.mxu0 %v6657_v22 }
  0x8b   : > { %v8072_v59 = vpop.eup %6875  ;;  %6895 = vrcp.f32 %v1714_v54  ;;  %v782_v15 = vadd.f32 1.0, %v6874_v19  ;;  %6087 = vmatpush3.bf16.msra.mxu0 %v6657_v22 }
  0x8c   : > { %v8074_v35 = vpop.eup %6877  ;;  %6897 = vrcp.f32 %v1713_v37  ;;  %v5355_v45 = vmul.f32 -1.442695, %v8072_v59  ;;  %v1070_v20 = vmul.f32 %v8072_v59, %v8072_v59  ;;  %v1555_v44 = vmul.f32 %v8072_v59, %v7744_v9  ;;  %v6659_v37 = vld [vmem:[%s7620_s6 + $0x118] sm:$0xff]  }
  0x8d   : > { %v6880_v26 = vpop.eup %6879  ;;  %6899 = vrcp.f32 %v782_v15  ;;  %v5358_v23 = vmul.f32 -1.442695, %v8074_v35  ;;  %v1073_v38 = vmul.f32 %v8074_v35, %v8074_v35  ;;  %v1558_v0 = vmul.f32 %v8074_v35, %v7744_v9  ;;  %6088 = vmatprep.subr.bf16.mxu0 %v6659_v37 }
  0x8e   : > { %v6882_v55 = vpop.eup %6881  ;;  %v1804_v4 = vmul.f32 %v6880_v26, %v7803_v25  ;;  %6901 = vpow2.f32 %v5355_v45  ;;  %v8091_v43 = vsub.f32 %v1070_v20, %v7656_v21 }
  0x8f   : > { %v6884_v56 = vpop.eup %6883  ;;  %v1803_v5 = vmul.f32 %v6882_v55, %v7816_v42  ;;  %6903 = vpow2.f32 %v5358_v23  ;;  %v8097_v47 = vsub.f32 %v1073_v38, %v7656_v21  ;;  %6089 = vmatpush3.bf16.msra.mxu0 %v6659_v37  ;;  %v6660_v37 = vld [vmem:[%s7620_s6 + $0x68] sm:$0xff]  }
  0x90   : > { %v6886_v25 = vpop.eup %6885  ;;  %1873 = vrot.lane.b32.xlu1 %v1804_v4, %s7533_s20  ;;  %v1806_v48 = vmul.f32 %v6884_v56, %v7841_v58  ;;  %6905 = vtanh.f32 %v333_v39  ;;  %v5387_v42 = vmul.f32 -1.442695, %v8091_v43  ;;  %v1521_v27 = vmul.f32 %v8072_v59, %v8091_v43 }
  0x91   : > { %v6888_v50 = vpop.eup %6887  ;;  %6907 = vpow2.f32 %v5388_v36  ;;  %v5390_v1 = vmul.f32 -1.442695, %v8097_v47  ;;  %v1524_v18 = vmul.f32 %v8074_v35, %v8097_v47  ;;  %1871 = vrot.lane.b32.xlu0 %v1803_v5, %s7533_s20  ;;  %v1805_v58 = vmul.f32 %v6886_v25, %v8002_v16 }
  0x92   : > { %v6890_v63 = vpop.eup %6889  ;;  %6909 = vpow2.f32 %v5387_v42  ;;  %v8113_v31 = vsub.f32 %v1521_v27, %v1555_v44  ;;  %v1327_v8 = vmul.f32 %v6888_v50, %v7852_v2  ;;  %v338_v2 = vld [vmem:[%s7628_s10 + $0x98] sm:$0xff] }
  0x93   : > { %v6892_v51 = vpop.eup %6891  ;;  %6911 = vpow2.f32 %v5390_v1  ;;  %v8116_v7 = vsub.f32 %v1524_v18, %v1558_v0  ;;  %v1326_v24 = vmul.f32 %v6890_v63, %v7855_v3  ;;  %v6658_v3 = vld [vmem:[%s7620_s6 + $0x60] sm:$0xff]  }
  0x94   : > { %v6894_v62 = vpop.eup %6893  ;;  %1877 = vrot.lane.b32.xlu1 %v1806_v48, %s7533_s20  ;;  %6913 = vpow2.f32 %v5421_v40  ;;  %v5420_v16 = vmul.f32 -1.442695, %v8113_v31  ;;  %v1808_v11 = vmul.f32 %v6892_v51, %v8010_v57  ;;  %5898 = vmatprep.subr.bf16.mxu1 %v6658_v3 }
  0x95   : > { %v6896_v32 = vpop.eup %6895  ;;  %v5423_v12 = vmul.f32 -1.442695, %v8116_v7  ;;  %6915 = vtanh.f32 %v336_v34  ;;  %1875 = vrot.lane.b32.xlu0 %v1805_v58, %s7533_s20  ;;  %v1807_v45 = vmul.f32 %v6894_v62, %v8015_v60  ;;  %5899 = vmatpush3.bf16.msra.mxu1 %v6658_v3 }
  0x96   : > { %v6898_v14 = vpop.eup %6897  ;;  %6917 = vpow2.f32 %v5420_v16  ;;  %v1810_v23 = vmul.f32 %v6896_v32, %v8018_v29  ;;  %5900 = vmatprep.subr.bf16.mxu1 %v6660_v37 }
  0x97   : > { %v6900_v28 = vpop.eup %6899  ;;  %6919 = vpow2.f32 %v5423_v12  ;;  %v1809_v4 = vmul.f32 %v6898_v14, %v8021_v6 }
  0x98   : > { %v6902_v54 = vpop.eup %6901  ;;  %1402 = vrot.lane.b32.xlu1 %v1327_v8, %s7532_s17  ;;  %6921 = vtanh.f32 %v335_v13  ;;  %v878_v48 = vmul.f32 %v6900_v28, %v7710_v49 }
  0x99   : > { %v6904_v19 = vpop.eup %6903  ;;  %v781_v33 = vadd.f32 1.0, %v6902_v54  ;;  %6923 = vtanh.f32 %v338_v2  ;;  %1400 = vrot.lane.b32.xlu0 %v1326_v24, %s7532_s17  ;;  %5901 = vmatpush3.bf16.msra.mxu1 %v6660_v37 }
  0x9a   : > { %v8133_v15 = vpop.eup %6905  ;;  %v784_v39 = vadd.f32 1.0, %v6904_v19  ;;  %6925 = vtanh.f32 %v337_v17 }
  0x9b   : > { %v6908_v36 = vpop.eup %6907  ;;  %6927 = vrcp.f32 %v781_v33  ;;  %v5357_v57 = vmul.f32 -1.442695, %v8133_v15  ;;  %v1072_v20 = vmul.f32 %v8133_v15, %v8133_v15  ;;  %v1557_v41 = vmul.f32 %v8133_v15, %v7744_v9 }
  0x9c   : > { %v6910_v26 = vpop.eup %6909  ;;  %1881 = vrot.lane.b32.xlu1 %v1808_v11, %s7533_s20  ;;  %6929 = vrcp.f32 %v784_v39  ;;  %v1233_v38 = vadd.f32 1.0, %v6908_v36 }
  0x9d   : > { %v6912_v60 = vpop.eup %6911  ;;  %6931 = vpow2.f32 %v5357_v57  ;;  %v1232_v40 = vadd.f32 1.0, %v6910_v26  ;;  %v8143_v53 = vsub.f32 %v1072_v20, %v7656_v21  ;;  %1879 = vrot.lane.b32.xlu0 %v1807_v45, %s7533_s20  ;;  %v6661_v45 = vld [vmem:[%s7620_s6 + $0x120] sm:$0xff]  }
  0x9e   : > { %v6914_v55 = vpop.eup %6913  ;;  %6933 = vrcp.f32 %v1233_v38  ;;  %v1235_v29 = vadd.f32 1.0, %v6912_v60  ;;  %6090 = vmatprep.subr.bf16.mxu0 %v6661_v45  ;;  %v340_v60 = vld [vmem:[%s7628_s10 + $0xa8] sm:$0xff] }
  0x9f   : > { %v8149_v44 = vpop.eup %6915  ;;  %6935 = vrcp.f32 %v1232_v40  ;;  %v5389_v56 = vmul.f32 -1.442695, %v8143_v53  ;;  %v1716_v5 = vadd.f32 1.0, %v6914_v55  ;;  %v1523_v0 = vmul.f32 %v8133_v15, %v8143_v53  ;;  %6091 = vmatpush3.bf16.msra.mxu0 %v6661_v45  ;;  %v6662_v55 = vld [vmem:[%s7620_s6 + $0x70] sm:$0xff]  }
  0xa0   : > { %v6918_v25 = vpop.eup %6917  ;;  %1885 = vrot.lane.b32.xlu1 %v1810_v23, %s7533_s20  ;;  %6937 = vrcp.f32 %v1235_v29  ;;  %v1075_v6 = vmul.f32 %v8149_v44, %v8149_v44  ;;  %v5360_v1 = vmul.f32 -1.442695, %v8149_v44  ;;  %v1560_v49 = vmul.f32 %v8149_v44, %v7744_v9  ;;  %5902 = vmatprep.subr.bf16.mxu1 %v6662_v55 }
  0xa1   : > { %v6920_v42 = vpop.eup %6919  ;;  %6939 = vpow2.f32 %v5389_v56  ;;  %v1715_v27 = vadd.f32 1.0, %v6918_v25  ;;  %v8158_v50 = vsub.f32 %v1523_v0, %v1557_v41  ;;  %1883 = vrot.lane.b32.xlu0 %v1809_v4, %s7533_s20  ;;  %v339_v41 = vld [vmem:[%s7628_s10 + $0xa0] sm:$0xff]  ;;  %v6663_v4 = vld [vmem:[%s7620_s6 + $0x128] sm:$0xff]   ;;  %5903 = vmatpush3.bf16.msra.mxu1 %v6662_v55 }
  0xa2   : > { %v8161_v18 = vpop.eup %6921  ;;  %6941 = vrcp.f32 %v1716_v5  ;;  %v1718_v52 = vadd.f32 1.0, %v6920_v42  ;;  %v8165_v46 = vsub.f32 %v1075_v6, %v7656_v21  ;;  %6092 = vmatprep.subr.bf16.mxu0 %v6663_v4 }
  0xa3   : > { %v8169_v63 = vpop.eup %6923  ;;  %6943 = vrcp.f32 %v1715_v27  ;;  %v5422_v58 = vmul.f32 -1.442695, %v8158_v50  ;;  %v5359_v34 = vmul.f32 -1.442695, %v8161_v18  ;;  %v1074_v51 = vmul.f32 %v8161_v18, %v8161_v18  ;;  %6093 = vmatpush3.bf16.msra.mxu0 %v6663_v4  ;;  %v6664_v27 = vld [vmem:[%s7620_s6 + $0x78] sm:$0xff]  }
  0xa4   : > { %v8175_v62 = vpop.eup %6925  ;;  %955 = vrot.lane.b32.xlu1 %v878_v48, %s7530_s13  ;;  %6945 = vrcp.f32 %v1718_v52  ;;  %v5392_v8 = vmul.f32 -1.442695, %v8165_v46  ;;  %v1526_v16 = vmul.f32 %v8149_v44, %v8165_v46  ;;  %v1559_v13 = vmul.f32 %v8161_v18, %v7744_v9  ;;  %5904 = vmatprep.subr.bf16.mxu1 %v6664_v27 }
  0xa5   : > { %v6928_v32 = vpop.eup %6927  ;;  %6947 = vpow2.f32 %v5422_v58  ;;  %v8182_v12 = vsub.f32 %v1074_v51, %v7656_v21  ;;  %v5362_v19 = vmul.f32 -1.442695, %v8169_v63  ;;  %v5361_v20 = vmul.f32 -1.442695, %v8175_v62  ;;  %v8221_v58 = vld [vmem:[%s7628_s10 + $0x10] sm:$0xff]  ;;  %5905 = vmatpush3.bf16.msra.mxu1 %v6664_v27 }
  0xa6   : > { %v6930_v10 = vpop.eup %6929  ;;  %v877_v22 = vmul.f32 %v6928_v32, %v8072_v59  ;;  %6949 = vpow2.f32 %v5360_v1  ;;  %v8187_v14 = vsub.f32 %v1526_v16, %v1560_v49  ;;  %v1077_v42 = vmul.f32 %v8169_v63, %v8169_v63  ;;  %v6665_v1 = vld [vmem:[%s7620_s6 + $0x130] sm:$0xff]  }
  0xa7   : > { %v6932_v24 = vpop.eup %6931  ;;  %v880_v2 = vmul.f32 %v6930_v10, %v8074_v35  ;;  %6951 = vpow2.f32 %v5359_v34  ;;  %v5391_v28 = vmul.f32 -1.442695, %v8182_v12  ;;  %v1525_v17 = vmul.f32 %v8161_v18, %v8182_v12  ;;  %v2057_v51 = vld [vmem:[#allocation2 + $0x9] sm:$0xff]  ;;  %6094 = vmatprep.subr.bf16.mxu0 %v6665_v1 }
  0xa8   : > { %v6934_v54 = vpop.eup %6933  ;;  %953 = vrot.lane.b32.xlu0 %v877_v22, %s7530_s13  ;;  %v783_v11 = vadd.f32 1.0, %v6932_v24  ;;  %6953 = vpow2.f32 %v5392_v8  ;;  %v5425_v59 = vmul.f32 -1.442695, %v8187_v14  ;;  %v5313_v34 = vmul.f32 -1.442695, %v8221_v58  ;;  %6095 = vmatpush3.bf16.msra.mxu0 %v6665_v1 }
  0xa9   : > { %v8196_v33 = vpop.eup %6935  ;;  %959 = vrot.lane.b32.xlu1 %v880_v2, %s7530_s13  ;;  %v1329_v35 = vmul.f32 %v6934_v54, %v8055_v61  ;;  %6955 = vpow2.f32 %v5391_v28  ;;  %v8200_v3 = vsub.f32 %v1525_v17, %v1559_v13  ;;  %v1076_v32 = vmul.f32 %v8175_v62, %v8175_v62  ;;  %v6666_v54 = vld [vmem:[%s7620_s6 + $0x138] sm:$0xff]  }
  0xaa   : > { %v6938_v39 = vpop.eup %6937  ;;  %6957 = vrcp.f32 %v783_v11  ;;  %v8230_v17 = vsub.f32 %v1077_v42, %v7656_v21  ;;  %6096 = vmatprep.subr.bf16.mxu0 %v6666_v54 }
  0xab   : > { %v6940_v36 = vpop.eup %6939  ;;  %6959 = vpow2.f32 %v5425_v59  ;;  %v5424_v57 = vmul.f32 -1.442695, %v8200_v3  ;;  %v1331_v38 = vmul.f32 %v6938_v39, %v8097_v47  ;;  %v8241_v45 = vsub.f32 %v1076_v32, %v7656_v21 }
  0xac   : > { %v6942_v61 = vpop.eup %6941  ;;  %v1234_v26 = vadd.f32 1.0, %v6940_v36  ;;  %6961 = vpow2.f32 %v5362_v19  ;;  %6097 = vmatpush3.bf16.msra.mxu0 %v6666_v54 }
  0xad   : > { %v8206_v23 = vpop.eup %6943  ;;  %1406 = vrot.lane.b32.xlu1 %v1329_v35, %s7532_s17  ;;  %6963 = vpow2.f32 %v5424_v57  ;;  %v1812_v47 = vmul.f32 %v6942_v61, %v8067_v30  ;;  %v2056_v30 = vld [vmem:[#allocation2 + $0x1] sm:$0xff]  ;;  %v8248_v57 = vld [vmem:[%s7628_s10 + $0x18] sm:$0xff]  ;;  %v5393_v55 = vmul.f32 -1.442695, %v8241_v45 }
  0xae   : > { %v6946_v40 = vpop.eup %6945  ;;  %6965 = vrcp.f32 %v1234_v26  ;;  %v2088_v13 = vpack.c.bf16 %v2057_v51, %v2056_v30  ;;  %v1811_v27 = vmul.f32 %v8206_v23, %v8113_v31  ;;  %v8287_v31 = vld [vmem:[%s7628_s10 + $0x28] sm:$0xff] }
  0xaf   : > { %v6948_v29 = vpop.eup %6947  ;;  %6967 = vpow2.f32 %v5361_v20  ;;  %v1814_v24 = vmul.f32 %v6946_v40, %v8116_v7  ;;  %v8237_v7 = vld [vmem:[%s7628_s10] sm:$0xff]  ;;  %v5314_v20 = vmul.f32 -1.442695, %v8248_v57  ;;  %v5316_v23 = vmul.f32 -1.442695, %v8287_v31 }
  0xb0   : > { %v6950_v56 = vpop.eup %6949  ;;  %v1717_v5 = vadd.f32 1.0, %v6948_v29  ;;  %6969 = vtanh.f32 %v340_v60  ;;  %5906 = vmatprep.mubr.bf16.mxu1 %v2088_v13  ;;  %v5311_v19 = vmul.f32 -1.442695, %v8237_v7 }
  0xb1   : > { %v6952_v0 = vpop.eup %6951  ;;  %1410 = vrot.lane.b32.xlu1 %v1331_v38, %s7532_s17  ;;  %v786_v25 = vadd.f32 1.0, %v6950_v56  ;;  %6971 = vtanh.f32 %v339_v41  ;;  %v1528_v56 = vmul.f32 %v8169_v63, %v8230_v17 }
  0xb2   : > { %v6954_v48 = vpop.eup %6953  ;;  %6973 = vrcp.f32 %v1717_v5  ;;  %v785_v6 = vadd.f32 1.0, %v6952_v0  ;;  %v1562_v5 = vmul.f32 %v8169_v63, %v7744_v9 }
  0xb3   : > { %v6956_v52 = vpop.eup %6955  ;;  %6975 = vrcp.f32 %v786_v25  ;;  %v1237_v49 = vadd.f32 1.0, %v6954_v48  ;;  %v8271_v25 = vld [vmem:[%s7628_s10 + $0x8] sm:$0xff] }
  0xb4   : > { %v6958_v8 = vpop.eup %6957  ;;  %6977 = vrcp.f32 %v785_v6  ;;  %v1236_v16 = vadd.f32 1.0, %v6956_v52  ;;  %v5312_v48 = vmul.f32 -1.442695, %v8271_v25  ;;  %v8284_v30 = vsub.f32 %v1528_v56, %v1562_v5 }
  0xb5   : > { %v6960_v10 = vpop.eup %6959  ;;  %v879_v22 = vmul.f32 %v6958_v8, %v8133_v15  ;;  %1889 = vrot.lane.b32.xlu1 %v1812_v47, %s7533_s20  ;;  %6979 = vrcp.f32 %v1237_v49  ;;  %v1328_v15 = vmul.f32 %v8196_v33, %v8091_v43  ;;  %v5394_v33 = vmul.f32 -1.442695, %v8230_v17 }
  0xb6   : > { %v6962_v2 = vpop.eup %6961  ;;  %6981 = vrcp.f32 %v1236_v16  ;;  %v1720_v28 = vadd.f32 1.0, %v6960_v10  ;;  %v8291_v16 = vld [vmem:[%s7628_s10 + $0x20] sm:$0xff]  ;;  %v1527_v10 = vmul.f32 %v8175_v62, %v8241_v45  ;;  %v5427_v54 = vmul.f32 -1.442695, %v8284_v30 }
  0xb7   : > { %v6964_v11 = vpop.eup %6963  ;;  %957 = vrot.lane.b32.xlu0 %v879_v22, %s7530_s13  ;;  %v788_v59 = vadd.f32 1.0, %v6962_v2  ;;  %6983 = vpow2.f32 %v5313_v34  ;;  %v5315_v32 = vmul.f32 -1.442695, %v8291_v16  ;;  %v1561_v22 = vmul.f32 %v8175_v62, %v7744_v9 }
  0xb8   : > { %v6966_v35 = vpop.eup %6965  ;;  %6985 = vrcp.f32 %v1720_v28  ;;  %v1719_v37 = vadd.f32 1.0, %v6964_v11 }
  0xb9   : > { %v6968_v39 = vpop.eup %6967  ;;  %1893 = vrot.lane.b32.xlu1 %v1814_v24, %s7533_s20  ;;  %6987 = vrcp.f32 %v788_v59  ;;  %v1330_v26 = vmul.f32 %v6966_v35, %v8143_v53 }
  0xba   : > { %v8244_v36 = vpop.eup %6969  ;;  %6989 = vrcp.f32 %v1719_v37  ;;  %v787_v43 = vadd.f32 1.0, %v6968_v39 }
  0xbb   : > { %v8251_v61 = vpop.eup %6971  ;;  %1404 = vrot.lane.b32.xlu0 %v1328_v15, %s7532_s17  ;;  %v5364_v38 = vmul.f32 -1.442695, %v8244_v36  ;;  %6991 = vpow2.f32 %v5311_v19  ;;  %v1079_v60 = vmul.f32 %v8244_v36, %v8244_v36  ;;  %v8307_v19 = vsub.f32 %v1527_v10, %v1561_v22 }
  0xbc   : > { %v6974_v40 = vpop.eup %6973  ;;  %6993 = vrcp.f32 %v787_v43  ;;  %v5363_v41 = vmul.f32 -1.442695, %v8251_v61  ;;  %v1078_v4 = vmul.f32 %v8251_v61, %v8251_v61  ;;  %v1563_v5 = vmul.f32 %v8251_v61, %v7744_v9 }
  0xbd   : > { %v6976_v29 = vpop.eup %6975  ;;  %6995 = vpow2.f32 %v5364_v38  ;;  %v8263_v53 = vsub.f32 %v1079_v60, %v7656_v21  ;;  %v5426_v60 = vmul.f32 -1.442695, %v8307_v19 }
  0xbe   : > { %v6978_v0 = vpop.eup %6977  ;;  %v882_v47 = vmul.f32 %v6976_v29, %v8149_v44  ;;  %6997 = vpow2.f32 %v5363_v41  ;;  %v8275_v6 = vsub.f32 %v1078_v4, %v7656_v21  ;;  %v1564_v4 = vmul.f32 %v8244_v36, %v7744_v9 }
  0xbf   : > { %v6980_v42 = vpop.eup %6979  ;;  %1408 = vrot.lane.b32.xlu0 %v1330_v26, %s7532_s17  ;;  %6999 = vpow2.f32 %v5394_v33  ;;  %v5396_v1 = vmul.f32 -1.442695, %v8263_v53  ;;  %v881_v59 = vmul.f32 %v6978_v0, %v8161_v18 }
  0xc0   : > { %v6982_v44 = vpop.eup %6981  ;;  %963 = vrot.lane.b32.xlu1 %v882_v47, %s7530_s13  ;;  %v1333_v52 = vmul.f32 %v6980_v42, %v8165_v46  ;;  %7001 = vpow2.f32 %v5393_v55  ;;  %v5395_v34 = vmul.f32 -1.442695, %v8275_v6  ;;  %v1813_v46 = vmul.f32 %v6974_v40, %v8158_v50  ;;  %v8315_v40 = vld [vmem:[%s7620_s6 + $0x140] sm:$0xff]  }
  0xc1   : > { %v6984_v49 = vpop.eup %6983  ;;  %7003 = vpow2.f32 %v5314_v20  ;;  %v1332_v18 = vmul.f32 %v6982_v44, %v8182_v12  ;;  %v1530_v55 = vmul.f32 %v8244_v36, %v8263_v53  ;;  %v1529_v56 = vmul.f32 %v8251_v61, %v8275_v6  ;;  %6130 = vmatprep.subr.bf16.mxu0 %v8315_v40 }
  0xc2   : > { %v6986_v51 = vpop.eup %6985  ;;  %v449_v8 = vadd.f32 1.0, %v6984_v49  ;;  %7005 = vpow2.f32 %v5312_v48  ;;  %v934_v47 = vpop.permute.xlu1 %933 }
  0xc3   : > { %v6988_v13 = vpop.eup %6987  ;;  %1887 = vrot.lane.b32.xlu0 %v1811_v27, %s7533_s20  ;;  %7007 = vpow2.f32 %v5396_v1  ;;  %v1816_v2 = vmul.f32 %v6986_v51, %v8187_v14  ;;  %v930_v44 = vpop.permute.xlu0 %929 }
  0xc4   : > { %v6990_v24 = vpop.eup %6989  ;;  %1414 = vrot.lane.b32.xlu1 %v1333_v52, %s7532_s17  ;;  %7009 = vrcp.f32 %v449_v8  ;;  %v884_v14 = vmul.f32 %v6988_v13, %v8169_v63  ;;  %v7534_v13 = vmov 0.7310586  }
  0xc5   : > { %v6992_v28 = vpop.eup %6991  ;;  %7011 = vpow2.f32 %v5395_v34  ;;  %v1815_v27 = vmul.f32 %v6990_v24, %v8200_v3  ;;  %v8330_v34 = vsub.f32 %v1530_v55, %v1564_v4 }
  0xc6   : > { %v8303_v11 = vpop.eup %6993  ;;  %v447_v50 = vadd.f32 1.0, %v6992_v28  ;;  %7013 = vpow2.f32 %v5316_v23  ;;  %v8334_v23 = vld [vmem:[%s7628_s10 + $0x38] sm:$0xff] }
  0xc7   : > { %v6996_v15 = vpop.eup %6995  ;;  %1891 = vrot.lane.b32.xlu0 %v1813_v46, %s7533_s20  ;;  %7015 = vpow2.f32 %v5315_v32  ;;  %v5318_v3 = vmul.f32 -1.442695, %v8334_v23  ;;  %v8337_v32 = vsub.f32 %v1529_v56, %v1563_v5  ;;  %v8341_v46 = vpop.permute.xlu1 %935  ;;  %v883_v24 = vmul.f32 %v8303_v11, %v8175_v62 }
  0xc8   : > { %v6998_v35 = vpop.eup %6997  ;;  %1897 = vrot.lane.b32.xlu1 %v1816_v2, %s7533_s20  ;;  %v790_v37 = vadd.f32 1.0, %v6996_v15  ;;  %7017 = vrcp.f32 %v447_v50  ;;  %v932_v28 = vpop.permute.xlu0 %931 }
  0xc9   : > { %v7000_v39 = vpop.eup %6999  ;;  %v789_v43 = vadd.f32 1.0, %v6998_v35  ;;  %7019 = vpow2.f32 %v5427_v54  ;;  %v8349_v54 = vld [vmem:[%s7628_s10 + $0x30] sm:$0xff]  ;;  %v5429_v35 = vmul.f32 -1.442695, %v8330_v34  ;;  %v5428_v62 = vmul.f32 -1.442695, %v8337_v32 }
  0xca   : > { %v7002_v33 = vpop.eup %7001  ;;  %7021 = vrcp.f32 %v790_v37  ;;  %v1239_v20 = vadd.f32 1.0, %v7000_v39  ;;  %v5317_v50 = vmul.f32 -1.442695, %v8349_v54  ;;  %v8361_v39 = vld [vmem:[%s7628_s10 + $0x48] sm:$0xff] }
  0xcb   : > { %v7004_v26 = vpop.eup %7003  ;;  %961 = vrot.lane.b32.xlu0 %v881_v59, %s7530_s13  ;;  %7023 = vrcp.f32 %v789_v43  ;;  %v1238_v38 = vadd.f32 1.0, %v7002_v33  ;;  %v8358_v11 = vpop.permute.xlu1 %939  ;;  %v5320_v43 = vmul.f32 -1.442695, %v8361_v39 }
  0xcc   : > { %v7006_v63 = vpop.eup %7005  ;;  %967 = vrot.lane.b32.xlu1 %v884_v14, %s7530_s13  ;;  %7025 = vrcp.f32 %v1239_v20  ;;  %v450_v41 = vadd.f32 1.0, %v7004_v26  ;;  %v8369_v26 = vpop.permute.xlu0 %937 }
  0xcd   : > { %v7008_v29 = vpop.eup %7007  ;;  %7027 = vrcp.f32 %v1238_v38  ;;  %v448_v12 = vadd.f32 1.0, %v7006_v63 }
  0xce   : > { %v7010_v0 = vpop.eup %7009  ;;  %7029 = vrcp.f32 %v450_v41  ;;  %v1241_v48 = vadd.f32 1.0, %v7008_v29 }
  0xcf   : > { %v7012_v42 = vpop.eup %7011  ;;  %1412 = vrot.lane.b32.xlu0 %v1332_v18, %s7532_s17  ;;  %v545_v1 = vmul.f32 %v8221_v58, %v7010_v0  ;;  %7031 = vrcp.f32 %v448_v12  ;;  %v8372_v18 = vld [vmem:[%s7628_s10 + $0x40] sm:$0xff]  ;;  %v8378_v29 = vpop.permute.xlu1 %943 }
  0xd0   : > { %v7014_v52 = vpop.eup %7013  ;;  %7033 = vrcp.f32 %v1241_v48  ;;  %v1240_v49 = vadd.f32 1.0, %v7012_v42  ;;  %v5319_v38 = vmul.f32 -1.442695, %v8372_v18  ;;  %v8386_v5 = vpop.permute.xlu0 %941 }
  0xd1   : > { %v7016_v51 = vpop.eup %7015  ;;  %578 = vst.msk [vmem:[#allocation2 + $0x31] sm:$0xff] %vm575_vm1, %v545_v1  ;;  %v452_v8 = vadd.f32 1.0, %v7014_v52  ;;  %7035 = vpow2.f32 %v5426_v60  ;;  %v344_v52 = vld [vmem:[%s7628_s10 + $0xc8] sm:$0xff] }
  0xd2   : > { %v7018_v58 = vpop.eup %7017  ;;  %611 = vst.msk [vmem:[#allocation2 + $0x31] sm:$0xff] %vm608_vm2, %v7534_v13  ;;  %7037 = vrcp.f32 %v1240_v49  ;;  %v451_v10 = vadd.f32 1.0, %v7016_v51 }
  0xd3   : > { %v7020_v22 = vpop.eup %7019  ;;  %1895 = vrot.lane.b32.xlu0 %v1815_v27, %s7533_s20  ;;  %1028 = vst.msk [vmem:[#allocation2 + $0x31] sm:$0xff] %vm1025_vm3, %v934_v47  ;;  %v543_v2 = vmul.f32 %v8237_v7, %v7018_v58  ;;  %7039 = vrcp.f32 %v452_v8 }
  0xd4   : > { %v7022_v15 = vpop.eup %7021  ;;  %7041 = vrcp.f32 %v451_v10  ;;  %v1722_v59 = vadd.f32 1.0, %v7020_v22 }
  0xd5   : > { %v7024_v14 = vpop.eup %7023  ;;  %v886_v37 = vmul.f32 %v7022_v15, %v8244_v36  ;;  %576 = vst.msk [vmem:[#allocation2 + $0x19] sm:$0xff] %vm575_vm1, %v543_v2  ;;  %7043 = vpow2.f32 %v5318_v3  ;;  %v8412_v3 = vpop.permute.xlu0 %945 }
  0xd6   : > { %v7026_v7 = vpop.eup %7025  ;;  %609 = vst.msk [vmem:[#allocation2 + $0x19] sm:$0xff] %vm608_vm2, %v7534_v13  ;;  %7045 = vrcp.f32 %v1722_v59  ;;  %v885_v36 = vmul.f32 %v7024_v14, %v8251_v61  ;;  %v342_v61 = vld [vmem:[%s7628_s10 + $0xb8] sm:$0xff] }
  0xd7   : > { %v7028_v33 = vpop.eup %7027  ;;  %965 = vrot.lane.b32.xlu0 %v883_v24, %s7530_s13  ;;  %971 = vrot.lane.b32.xlu1 %v886_v37, %s7530_s13  ;;  %1026 = vst.msk [vmem:[#allocation2 + $0x19] sm:$0xff] %vm1025_vm3, %v930_v44  ;;  %v1335_v20 = vmul.f32 %v7026_v7, %v8230_v17  ;;  %7047 = vpow2.f32 %v5317_v50  ;;  %v341_v17 = vld [vmem:[%s7628_s10 + $0xb0] sm:$0xff]  ;;  %v8405_v44 = vpop.permute.xlu1 %947 }
  0xd8   : > { %v7030_v60 = vpop.eup %7029  ;;  %7049 = vpow2.f32 %v5429_v35  ;;  %v1334_v56 = vmul.f32 %v7028_v33, %v8241_v45  ;;  %v8396_v45 = vld [vmem:[%s7628_s10 + $0x50] sm:$0xff]  ;;  %v8441_v33 = vld [vmem:[%s7620_s6] sm:$0xff]  }
  0xd9   : > { %v7032_v63 = vpop.eup %7031  ;;  %v546_v41 = vmul.f32 %v8248_v57, %v7030_v60  ;;  %7051 = vpow2.f32 %v5428_v62  ;;  %v346_v60 = vld [vmem:[%s7628_s10 + $0xd8] sm:$0xff]  ;;  %5938 = vmatprep.subr.bf16.mxu1 %v8441_v33 }
  0xda   : > { %v7034_v55 = vpop.eup %7033  ;;  %v544_v4 = vmul.f32 %v8271_v25, %v7032_v63  ;;  %7053 = vpow2.f32 %v5320_v43  ;;  %v8389_v25 = vld [vmem:[%s7628_s10 + $0x58] sm:$0xff] }
  0xdb   : > { %v7036_v12 = vpop.eup %7035  ;;  %969 = vrot.lane.b32.xlu0 %v885_v36, %s7530_s13  ;;  %1418 = vrot.lane.b32.xlu1 %v1335_v20, %s7532_s17  ;;  %579 = vst.msk [vmem:[#allocation2 + $0x39] sm:$0xff] %vm575_vm1, %v546_v41  ;;  %v1337_v57 = vmul.f32 %v7034_v55, %v8263_v53  ;;  %7055 = vpow2.f32 %v5319_v38  ;;  %v5322_v0 = vmul.f32 -1.442695, %v8389_v25  ;;  %v5321_v53 = vmul.f32 -1.442695, %v8396_v45  ;;  %v8424_v24 = vpop.permute.xlu1 %951 }
  0xdc   : > { %v7038_v47 = vpop.eup %7037  ;;  %612 = vst.msk [vmem:[#allocation2 + $0x39] sm:$0xff] %vm608_vm2, %v7534_v13  ;;  %v1721_v48 = vadd.f32 1.0, %v7036_v12  ;;  %7057 = vtanh.f32 %v342_v61 }
  0xdd   : > { %577 = vst.msk [vmem:[#allocation2 + $0x21] sm:$0xff] %vm575_vm1, %v544_v4  ;;  %v7040_v42 = vpop.eup %7039  ;;  %7059 = vtanh.f32 %v341_v17  ;;  %v1336_v51 = vmul.f32 %v7038_v47, %v8275_v6 }
  0xde   : > { %1029 = vst.msk [vmem:[#allocation2 + $0x39] sm:$0xff] %vm1025_vm3, %v8341_v46  ;;  %v7042_v27 = vpop.eup %7041  ;;  %v548_v1 = vmul.f32 %v8287_v31, %v7040_v42  ;;  %7061 = vrcp.f32 %v1721_v48  ;;  %v343_v46 = vld [vmem:[%s7628_s10 + $0xc0] sm:$0xff] }
  0xdf   : > { %610 = vst.msk [vmem:[#allocation2 + $0x21] sm:$0xff] %vm608_vm2, %v7534_v13  ;;  %v7044_v49 = vpop.eup %7043  ;;  %1416 = vrot.lane.b32.xlu0 %v1334_v56, %s7532_s17  ;;  %1422 = vrot.lane.b32.xlu1 %v1337_v57, %s7532_s17  ;;  %v547_v8 = vmul.f32 %v8291_v16, %v7042_v27  ;;  %7063 = vpow2.f32 %v5322_v0  ;;  %v1383_v62 = vpop.permute.xlu1 %1382 }
  0xe0   : > { %1027 = vst.msk [vmem:[#allocation2 + $0x21] sm:$0xff] %vm1025_vm3, %v932_v28  ;;  %v7046_v58 = vpop.eup %7045  ;;  %v454_v31 = vadd.f32 1.0, %v7044_v49  ;;  %7065 = vpow2.f32 %v5321_v53  ;;  %v8430_v28 = vpop.permute.xlu0 %949 }
  0xe1   : > { %581 = vst.msk [vmem:[#allocation2 + $0x51] sm:$0xff] %vm575_vm1, %v548_v1  ;;  %v7048_v10 = vpop.eup %7047  ;;  %580 = vst.msk [vmem:[#allocation2 + $0x49] sm:$0xff] %vm575_vm1, %v547_v8  ;;  %v1818_v22 = vmul.f32 %v7046_v58, %v8284_v30  ;;  %7067 = vtanh.f32 %v344_v52 }
  0xe2   : > { %614 = vst.msk [vmem:[#allocation2 + $0x51] sm:$0xff] %vm608_vm2, %v7534_v13  ;;  %v7050_v6 = vpop.eup %7049  ;;  %613 = vst.msk [vmem:[#allocation2 + $0x49] sm:$0xff] %vm608_vm2, %v7534_v13  ;;  %7069 = vrcp.f32 %v454_v31  ;;  %v453_v16 = vadd.f32 1.0, %v7048_v10 }
  0xe3   : > { %1031 = vst.msk [vmem:[#allocation2 + $0x51] sm:$0xff] %vm1025_vm3, %v8358_v11  ;;  %v7052_v2 = vpop.eup %7051  ;;  %1420 = vrot.lane.b32.xlu0 %v1336_v51, %s7532_s17  ;;  %1030 = vst.msk [vmem:[#allocation2 + $0x49] sm:$0xff] %vm1025_vm3, %v8369_v26  ;;  %1901 = vrot.lane.b32.xlu1 %v1818_v22, %s7533_s20  ;;  %v1724_v30 = vadd.f32 1.0, %v7050_v6  ;;  %7071 = vtanh.f32 %v343_v46  ;;  %v1387_v56 = vpop.permute.xlu1 %1386 }
  0xe4   : > { %v7054_v50 = vpop.eup %7053  ;;  %7073 = vrcp.f32 %v453_v16  ;;  %v1723_v15 = vadd.f32 1.0, %v7052_v2  ;;  %1478 = vst.msk [vmem:[#allocation2 + $0x21] sm:$0xff] %vm1476_vm4, %v1383_v62  ;;  %v1381_v26 = vpop.permute.xlu0 %1380  ;;  %1480 = vst.msk [vmem:[#allocation2 + $0x39] sm:$0xff] %vm1476_vm4, %v1387_v56 }
  0xe5   : > { %v7056_v59 = vpop.eup %7055  ;;  %7075 = vrcp.f32 %v1724_v30  ;;  %v456_v35 = vadd.f32 1.0, %v7054_v50  ;;  %1477 = vst.msk [vmem:[#allocation2 + $0x19] sm:$0xff] %vm1476_vm4, %v1381_v26 }
  0xe6   : > { %v8432_v14 = vpop.eup %7057  ;;  %7077 = vrcp.f32 %v1723_v15  ;;  %v455_v37 = vadd.f32 1.0, %v7056_v59 }
  0xe7   : > { %v8434_v7 = vpop.eup %7059  ;;  %7079 = vrcp.f32 %v456_v35  ;;  %v5366_v11 = vmul.f32 -1.442695, %v8432_v14  ;;  %v1081_v43 = vmul.f32 %v8432_v14, %v8432_v14  ;;  %v1566_v55 = vmul.f32 %v8432_v14, %v7744_v9  ;;  %v1391_v6 = vpop.permute.xlu1 %1390 }
  0xe8   : > { %v7062_v36 = vpop.eup %7061  ;;  %7081 = vrcp.f32 %v455_v37  ;;  %v5365_v20 = vmul.f32 -1.442695, %v8434_v7  ;;  %v1080_v38 = vmul.f32 %v8434_v7, %v8434_v7  ;;  %v1385_v1 = vpop.permute.xlu0 %1384  ;;  %1482 = vst.msk [vmem:[#allocation2 + $0x51] sm:$0xff] %vm1476_vm4, %v1391_v6 }
  0xe9   : > { %v7064_v63 = vpop.eup %7063  ;;  %v1817_v41 = vmul.f32 %v7062_v36, %v8307_v19  ;;  %7083 = vpow2.f32 %v5366_v11  ;;  %v8450_v61 = vsub.f32 %v1081_v43, %v7656_v21  ;;  %v1565_v19 = vmul.f32 %v8434_v7, %v7744_v9  ;;  %1479 = vst.msk [vmem:[#allocation2 + $0x31] sm:$0xff] %vm1476_vm4, %v1385_v1 }
  0xea   : > { %v7066_v4 = vpop.eup %7065  ;;  %7085 = vpow2.f32 %v5365_v20  ;;  %v458_v17 = vadd.f32 1.0, %v7064_v63  ;;  %v8456_v12 = vsub.f32 %v1080_v38, %v7656_v21 }
  0xeb   : > { %v8460_v57 = vpop.eup %7067  ;;  %1899 = vrot.lane.b32.xlu0 %v1817_v41, %s7533_s20  ;;  %v457_v0 = vadd.f32 1.0, %v7066_v4  ;;  %v5398_v47 = vmul.f32 -1.442695, %v8450_v61  ;;  %v1532_v48 = vmul.f32 %v8432_v14, %v8450_v61  ;;  %7087 = vtanh.f32 %v346_v60 }
  0xec   : > { %v7070_v53 = vpop.eup %7069  ;;  %7089 = vrcp.f32 %v458_v17  ;;  %v5368_v42 = vmul.f32 -1.442695, %v8460_v57  ;;  %v5397_v27 = vmul.f32 -1.442695, %v8456_v12  ;;  %v1083_v52 = vmul.f32 %v8460_v57, %v8460_v57 }
  0xed   : > { %v8471_v49 = vpop.eup %7071  ;;  %v550_v51 = vmul.f32 %v8334_v23, %v7070_v53  ;;  %7091 = vrcp.f32 %v457_v0  ;;  %v8475_v8 = vsub.f32 %v1532_v48, %v1566_v55  ;;  %v1531_v58 = vmul.f32 %v8434_v7, %v8456_v12 }
  0xee   : > { %v7074_v31 = vpop.eup %7073  ;;  %7093 = vpow2.f32 %v5368_v42  ;;  %v5367_v46 = vmul.f32 -1.442695, %v8471_v49  ;;  %v8481_v10 = vsub.f32 %v1083_v52, %v7656_v21  ;;  %v1082_v22 = vmul.f32 %v8471_v49, %v8471_v49 }
  0xef   : > { %v7076_v23 = vpop.eup %7075  ;;  %583 = vst.msk [vmem:[#allocation2 + $0x69] sm:$0xff] %vm575_vm1, %v550_v51  ;;  %v549_v16 = vmul.f32 %v8349_v54, %v7074_v31  ;;  %7095 = vpow2.f32 %v5398_v47  ;;  %v5431_v2 = vmul.f32 -1.442695, %v8475_v8  ;;  %v8489_v30 = vsub.f32 %v1531_v58, %v1565_v19  ;;  %v1389_v54 = vpop.permute.xlu0 %1388 }
  0xf0   : > { %v7078_v50 = vpop.eup %7077  ;;  %616 = vst.msk [vmem:[#allocation2 + $0x69] sm:$0xff] %vm608_vm2, %v7534_v13  ;;  %v1820_v15 = vmul.f32 %v7076_v23, %v8330_v34  ;;  %7097 = vpow2.f32 %v5367_v46  ;;  %v5400_v59 = vmul.f32 -1.442695, %v8481_v10  ;;  %v8496_v35 = vsub.f32 %v1082_v22, %v7656_v21 }
  0xf1   : > { %v7080_v37 = vpop.eup %7079  ;;  %1033 = vst.msk [vmem:[#allocation2 + $0x69] sm:$0xff] %vm1025_vm3, %v8378_v29  ;;  %v1819_v62 = vmul.f32 %v7078_v50, %v8337_v32  ;;  %7099 = vpow2.f32 %v5397_v27  ;;  %v5430_v34 = vmul.f32 -1.442695, %v8489_v30  ;;  %v1534_v11 = vmul.f32 %v8460_v57, %v8481_v10  ;;  %v1395_v32 = vpop.permute.xlu1 %1394 }
  0xf2   : > { %582 = vst.msk [vmem:[#allocation2 + $0x61] sm:$0xff] %vm575_vm1, %v549_v16  ;;  %v7082_v43 = vpop.eup %7081  ;;  %1905 = vrot.lane.b32.xlu1 %v1820_v15, %s7533_s20  ;;  %v552_v29 = vmul.f32 %v8361_v39, %v7080_v37  ;;  %7101 = vpow2.f32 %v5400_v59  ;;  %v5399_v36 = vmul.f32 -1.442695, %v8496_v35  ;;  %v1568_v20 = vmul.f32 %v8460_v57, %v7744_v9 }
  0xf3   : > { %1481 = vst.msk [vmem:[#allocation2 + $0x49] sm:$0xff] %vm1476_vm4, %v1389_v54  ;;  %v7084_v26 = vpop.eup %7083  ;;  %1903 = vrot.lane.b32.xlu0 %v1819_v62, %s7533_s20  ;;  %v551_v38 = vmul.f32 %v8372_v18, %v7082_v43  ;;  %7103 = vpow2.f32 %v5431_v2  ;;  %1484 = vst.msk [vmem:[#allocation2 + $0x69] sm:$0xff] %vm1476_vm4, %v1395_v32  ;;  %v1533_v39 = vmul.f32 %v8471_v49, %v8496_v35  ;;  %v1393_v55 = vpop.permute.xlu0 %1392  ;;  %v8569_v43 = vld [vmem:[%s7628_s10 + $0xd0] sm:$0xff] }
  0xf4   : > { %615 = vst.msk [vmem:[#allocation2 + $0x61] sm:$0xff] %vm608_vm2, %v7534_v13  ;;  %v1567_v60 = vmul.f32 %v8471_v49, %v7744_v9  ;;  %v7086_v63 = vpop.eup %7085  ;;  %v792_v41 = vadd.f32 1.0, %v7084_v26  ;;  %7105 = vpow2.f32 %v5399_v36 }
  0xf5   : > { %1032 = vst.msk [vmem:[#allocation2 + $0x61] sm:$0xff] %vm1025_vm3, %v8386_v5  ;;  %v8523_v5 = vsub.f32 %v1534_v11, %v1568_v20  ;;  %v8525_v4 = vpop.eup %7087  ;;  %v791_v18 = vadd.f32 1.0, %v7086_v63  ;;  %7107 = vpow2.f32 %v5430_v34  ;;  %v1399_v0 = vpop.permute.xlu1 %1398  ;;  %v8573_v20 = vld [vmem:[%s7628_s10 + $0xe8] sm:$0xff] }
  0xf6   : > { %585 = vst.msk [vmem:[#allocation2 + $0x81] sm:$0xff] %vm575_vm1, %v552_v29  ;;  %584 = vst.msk [vmem:[#allocation2 + $0x79] sm:$0xff] %vm575_vm1, %v551_v38  ;;  %v8531_v17 = vsub.f32 %v1533_v39, %v1567_v60  ;;  %v7090_v56 = vpop.eup %7089  ;;  %7109 = vrcp.f32 %v792_v41  ;;  %v5370_v47 = vmul.f32 -1.442695, %v8525_v4  ;;  %v1085_v52 = vmul.f32 %v8525_v4, %v8525_v4 }
  0xf7   : > { %618 = vst.msk [vmem:[#allocation2 + $0x81] sm:$0xff] %vm608_vm2, %v7534_v13  ;;  %617 = vst.msk [vmem:[#allocation2 + $0x79] sm:$0xff] %vm608_vm2, %v7534_v13  ;;  %v5433_v19 = vmul.f32 -1.442695, %v8523_v5  ;;  %v7092_v48 = vpop.eup %7091  ;;  %7111 = vrcp.f32 %v791_v18  ;;  %v554_v53 = vmul.f32 %v8389_v25, %v7090_v56  ;;  %v1397_v1 = vpop.permute.xlu0 %1396  ;;  %v1570_v54 = vmul.f32 %v8525_v4, %v7744_v9 }
  0xf8   : > { %1483 = vst.msk [vmem:[#allocation2 + $0x61] sm:$0xff] %vm1476_vm4, %v1393_v55  ;;  %v5432_v42 = vmul.f32 -1.442695, %v8531_v17  ;;  %v553_v27 = vmul.f32 %v8396_v45, %v7092_v48  ;;  %v8560_v16 = vsub.f32 %v1085_v52, %v7656_v21 }
  0xf9   : > { %1035 = vst.msk [vmem:[#allocation2 + $0x81] sm:$0xff] %vm1025_vm3, %v8405_v44  ;;  %1034 = vst.msk [vmem:[#allocation2 + $0x79] sm:$0xff] %vm1025_vm3, %v8412_v3  ;;  %v7094_v44 = vpop.eup %7093  ;;  %7113 = vpow2.f32 %v5433_v19  ;;  %v1866_v58 = vpop.permute.xlu1 %1865 }
  0xfa   : > { %1486 = vst.msk [vmem:[#allocation2 + $0x81] sm:$0xff] %vm1476_vm4, %v1399_v0  ;;  %v7096_v51 = vpop.eup %7095  ;;  %v794_v3 = vadd.f32 1.0, %v7094_v44  ;;  %7115 = vpow2.f32 %v5432_v42  ;;  %1485 = vst.msk [vmem:[#allocation2 + $0x79] sm:$0xff] %vm1476_vm4, %v1397_v1  ;;  %v5402_v48 = vmul.f32 -1.442695, %v8560_v16  ;;  %v6676_v42 = vld [vmem:[%s7620_s6 + $0x8] sm:$0xff]  }
  0xfb   : > { %587 = vst.msk [vmem:[#allocation2 + $0x99] sm:$0xff] %vm575_vm1, %v554_v53  ;;  %v7098_v25 = vpop.eup %7097  ;;  %586 = vst.msk [vmem:[#allocation2 + $0x91] sm:$0xff] %vm575_vm1, %v553_v27  ;;  %v1243_v45 = vadd.f32 1.0, %v7096_v51  ;;  %7117 = vpow2.f32 %v5370_v47  ;;  %v1864_v23 = vpop.permute.xlu0 %1863  ;;  %v8585_v47 = vld [vmem:[%s7628_s10 + $0xe0] sm:$0xff] }
  0xfc   : > { %620 = vst.msk [vmem:[#allocation2 + $0x99] sm:$0xff] %vm608_vm2, %v7534_v13  ;;  %v7100_v31 = vpop.eup %7099  ;;  %619 = vst.msk [vmem:[#allocation2 + $0x91] sm:$0xff] %vm608_vm2, %v7534_v13  ;;  %7119 = vrcp.f32 %v794_v3  ;;  %v793_v46 = vadd.f32 1.0, %v7098_v25 }
  0xfd   : > { %1037 = vst.msk [vmem:[#allocation2 + $0x99] sm:$0xff] %vm1025_vm3, %v8424_v24  ;;  %v7102_v22 = vpop.eup %7101  ;;  %1036 = vst.msk [vmem:[#allocation2 + $0x91] sm:$0xff] %vm1025_vm3, %v8430_v28  ;;  %7121 = vrcp.f32 %v1243_v45  ;;  %v1242_v6 = vadd.f32 1.0, %v7100_v31  ;;  %v1870_v59 = vpop.permute.xlu1 %1869  ;;  %v1536_v28 = vmul.f32 %v8525_v4, %v8560_v16 }
  0xfe   : > { %1961 = vst.msk [vmem:[#allocation2 + $0x21] sm:$0xff] %vm1959_vm5, %v1866_v58  ;;  %v7104_v2 = vpop.eup %7103  ;;  %7123 = vrcp.f32 %v793_v46  ;;  %v1245_v24 = vadd.f32 1.0, %v7102_v22  ;;  %1960 = vst.msk [vmem:[#allocation2 + $0x19] sm:$0xff] %vm1959_vm5, %v1864_v23  ;;  %v8598_v46 = vld [vmem:[%s7628_s10 + $0xf8] sm:$0xff]  ;;  %v8603_v23 = vld [vmem:[%s7628_s10 + $0xf0] sm:$0xff] }
  0xff   : > { %v7106_v50 = vpop.eup %7105  ;;  %7125 = vrcp.f32 %v1242_v6  ;;  %v1726_v15 = vadd.f32 1.0, %v7104_v2  ;;  %1963 = vst.msk [vmem:[#allocation2 + $0x39] sm:$0xff] %vm1959_vm5, %v1870_v59  ;;  %v1868_v29 = vpop.permute.xlu0 %1867  ;;  %v8577_v63 = vsub.f32 %v1536_v28, %v1570_v54  ;;  %v6668_v2 = vld [vmem:[%s7620_s6 + $0x148] sm:$0xff]   ;;  %v8613_v59 = vld [vmem:[%s7628_s10 + $0x60] sm:$0xff]  ;;  %v6677_v54 = vld [vmem:[%s7620_s6 + $0x10] sm:$0xff]  }
 0x100   : > { %v7108_v37 = vpop.eup %7107  ;;  %7127 = vrcp.f32 %v1245_v24  ;;  %v1244_v62 = vadd.f32 1.0, %v7106_v50  ;;  %1962 = vst.msk [vmem:[#allocation2 + $0x31] sm:$0xff] %vm1959_vm5, %v1868_v29  ;;  %v5323_v28 = vmul.f32 -1.442695, %v8613_v59 }
 0x101   : > { %v7110_v34 = vpop.eup %7109  ;;  %7129 = vrcp.f32 %v1726_v15  ;;  %v1725_v11 = vadd.f32 1.0, %v7108_v37  ;;  %v5435_v52 = vmul.f32 -1.442695, %v8577_v63 }
 0x102   : > { %v7112_v36 = vpop.eup %7111  ;;  %v888_v32 = vmul.f32 %v7110_v34, %v8432_v14  ;;  %7131 = vrcp.f32 %v1244_v62  ;;  %v1874_v39 = vpop.permute.xlu1 %1873  ;;  %v8620_v62 = vld [vmem:[%s7628_s10 + $0x78] sm:$0xff] }
 0x103   : > { %v7114_v26 = vpop.eup %7113  ;;  %v887_v38 = vmul.f32 %v7112_v36, %v8434_v7  ;;  %7133 = vrcp.f32 %v1725_v11  ;;  %1965 = vst.msk [vmem:[#allocation2 + $0x51] sm:$0xff] %vm1959_vm5, %v1874_v39  ;;  %v1872_v7 = vpop.permute.xlu0 %1871 }
 0x104   : > { %v7116_v41 = vpop.eup %7115  ;;  %975 = vrot.lane.b32.xlu1 %v888_v32, %s7530_s13  ;;  %v1728_v55 = vadd.f32 1.0, %v7114_v26  ;;  %7135 = vtanh.f32 %v8569_v43  ;;  %1964 = vst.msk [vmem:[#allocation2 + $0x49] sm:$0xff] %vm1959_vm5, %v1872_v7  ;;  %v6678_v7 = vld [vmem:[%s7620_s6 + $0x18] sm:$0xff]  }
 0x105   : > { %v2059_v60 = vld [vmem:[#allocation2 + $0x21] sm:$0xff]  ;;  %v7118_v14 = vpop.eup %7117  ;;  %973 = vrot.lane.b32.xlu0 %v887_v38, %s7530_s13  ;;  %v1727_v18 = vadd.f32 1.0, %v7116_v41  ;;  %7137 = vtanh.f32 %v8573_v20  ;;  %v2058_v56 = vld [vmem:[#allocation2 + $0x19] sm:$0xff]  ;;  %v8631_v38 = vld [vmem:[%s7628_s10 + $0x70] sm:$0xff] }
 0x106   : > { %v7120_v19 = vpop.eup %7119  ;;  %7139 = vrcp.f32 %v1728_v55  ;;  %v796_v0 = vadd.f32 1.0, %v7118_v14  ;;  %v2089_v53 = vpack.c.bf16 %v2059_v60, %v2058_v56  ;;  %v1878_v1 = vpop.permute.xlu1 %1877  ;;  %v2061_v51 = vld [vmem:[#allocation2 + $0x39] sm:$0xff]  ;;  %v5325_v39 = vmul.f32 -1.442695, %v8631_v38  ;;  %v6669_v60 = vld [vmem:[%s7620_s6 + $0x150] sm:$0xff]  }
 0x107   : > { %v7122_v44 = vpop.eup %7121  ;;  %v890_v27 = vmul.f32 %v7120_v19, %v8460_v57  ;;  %7141 = vrcp.f32 %v1727_v18  ;;  %1967 = vst.msk [vmem:[#allocation2 + $0x69] sm:$0xff] %vm1959_vm5, %v1878_v1  ;;  %v1876_v58 = vpop.permute.xlu0 %1875  ;;  %v2060_v31 = vld [vmem:[#allocation2 + $0x31] sm:$0xff] }
 0x108   : > { %v7124_v3 = vpop.eup %7123  ;;  %7143 = vrcp.f32 %v796_v0  ;;  %5907 = vmatmul.mubr.bf16.vlgmr.msra.gmra.mrb[0].mxu1 %v2089_v53  ;;  %6098 = vmatprep.mubr.bf16.mxu0 %v2089_v53  ;;  %v1339_v45 = vmul.f32 %v7122_v44, %v8450_v61  ;;  %1966 = vst.msk [vmem:[#allocation2 + $0x61] sm:$0xff] %vm1959_vm5, %v1876_v58  ;;  %v2090_v6 = vpack.c.bf16 %v2061_v51, %v2060_v31 }
 0x109   : > { %v7126_v25 = vpop.eup %7125  ;;  %979 = vrot.lane.b32.xlu1 %v890_v27, %s7530_s13  ;;  %v889_v57 = vmul.f32 %v7124_v3, %v8471_v49  ;;  %7145 = vtanh.f32 %v8585_v47  ;;  %5939 = vmatpush3.bf16.msra.mxu1 %v8441_v33  ;;  %v8606_v49 = vld [vmem:[%s7628_s10 + $0x68] sm:$0xff]  ;;  %v6670_v3 = vld [vmem:[%s7620_s6 + $0x158] sm:$0xff]  }
 0x10a   : > { %v7128_v22 = vpop.eup %7127  ;;  %7147 = vpow2.f32 %v5402_v48  ;;  %v5324_v61 = vmul.f32 -1.442695, %v8606_v49  ;;  %5940 = vmatprep.subr.bf16.mxu1 %v6676_v42  ;;  %v1338_v33 = vmul.f32 %v7126_v25, %v8456_v12  ;;  %v1403_v50 = vpop.permute.xlu1 %1402  ;;  %v2063_v15 = vld [vmem:[#allocation2 + $0x51] sm:$0xff]  ;;  %5910 = vmatprep.mubr.bf16.mxu1 %v2090_v6  ;;  %v5326_v12 = vmul.f32 -1.442695, %v8620_v62 }
 0x10b   : > { %v7130_v24 = vpop.eup %7129  ;;  %977 = vrot.lane.b32.xlu0 %v889_v57, %s7530_s13  ;;  %7149 = vpow2.f32 %v5435_v52  ;;  %6099 = vmatmul.mubr.bf16.vlgmr.msra.gmra.mrb[0].mxu0 %v2090_v6  ;;  %1488 = vst.msk [vmem:[#allocation2 + $0x99] sm:$0xff] %vm1476_vm4, %v1403_v50  ;;  %v1341_v11 = vmul.f32 %v7128_v22, %v8481_v10  ;;  %v1401_v29 = vpop.permute.xlu0 %1400  ;;  %v2062_v36 = vld [vmem:[#allocation2 + $0x49] sm:$0xff] }
 0x10c   : > { %v7132_v37 = vpop.eup %7131  ;;  %7151 = vtanh.f32 %v8598_v46  ;;  %6131 = vmatpush3.bf16.msra.mxu0 %v8315_v40  ;;  %1487 = vst.msk [vmem:[#allocation2 + $0x91] sm:$0xff] %vm1476_vm4, %v1401_v29  ;;  %v2091_v26 = vpack.c.bf16 %v2063_v15, %v2062_v36  ;;  %v1822_v19 = vmul.f32 %v7130_v24, %v8475_v8 }
 0x10d   : > { %v7134_v34 = vpop.eup %7133  ;;  %1426 = vrot.lane.b32.xlu1 %v1339_v45, %s7532_s17  ;;  %7153 = vtanh.f32 %v8603_v23  ;;  %6132 = vmatprep.subr.bf16.mxu0 %v6668_v2  ;;  %v1340_v40 = vmul.f32 %v7132_v37, %v8496_v35 }
 0x10e   : > { %v8627_v32 = vpop.eup %7135  ;;  %7155 = vpow2.f32 %v5324_v61  ;;  %5941 = vmatpush3.bf16.msra.mxu1 %v6676_v42  ;;  %v1882_v14 = vpop.permute.xlu1 %1881  ;;  %v2065_v18 = vld [vmem:[#allocation2 + $0x69] sm:$0xff]  ;;  %6102 = vmatprep.mubr.bf16.mxu0 %v2091_v26  ;;  %v1821_v53 = vmul.f32 %v7134_v34, %v8489_v30 }
 0x10f   : > { %v8635_v10 = vpop.eup %7137  ;;  %1424 = vrot.lane.b32.xlu0 %v1338_v33, %s7532_s17  ;;  %v5369_v41 = vmul.f32 -1.442695, %v8627_v32  ;;  %v1084_v55 = vmul.f32 %v8627_v32, %v8627_v32  ;;  %7157 = vpow2.f32 %v5323_v28  ;;  %5942 = vmatprep.subr.bf16.mxu1 %v6677_v54  ;;  %1969 = vst.msk [vmem:[#allocation2 + $0x81] sm:$0xff] %vm1959_vm5, %v1882_v14  ;;  %v1569_v8 = vmul.f32 %v8627_v32, %v7744_v9  ;;  %v1880_v44 = vpop.permute.xlu0 %1879  ;;  %v2064_v27 = vld [vmem:[#allocation2 + $0x61] sm:$0xff] }
 0x110   : > { %v7140_v56 = vpop.eup %7139  ;;  %v5372_v0 = vmul.f32 -1.442695, %v8635_v10  ;;  %v1087_v48 = vmul.f32 %v8635_v10, %v8635_v10  ;;  %5911 = vmatmul.mubr.bf16.gmra.mrb[4].mxu1 %v2091_v26  ;;  %7159 = vpow2.f32 %v5326_v12  ;;  %6133 = vmatpush3.bf16.msra.mxu0 %v6668_v2  ;;  %v1572_v51 = vmul.f32 %v8635_v10, %v7744_v9  ;;  %1968 = vst.msk [vmem:[#allocation2 + $0x79] sm:$0xff] %vm1959_vm5, %v1880_v44 }
 0x111   : > { %v7142_v35 = vpop.eup %7141  ;;  %1430 = vrot.lane.b32.xlu1 %v1341_v11, %s7532_s17  ;;  %7161 = vpow2.f32 %v5369_v41  ;;  %v8651_v42 = vsub.f32 %v1084_v55, %v7656_v21  ;;  %v2092_v30 = vpack.c.bf16 %v2065_v18, %v2064_v27  ;;  %6134 = vmatprep.subr.bf16.mxu0 %v6669_v60  ;;  %v1824_v57 = vmul.f32 %v7140_v56, %v8523_v5  ;;  %v6671_v11 = vld [vmem:[%s7620_s6 + $0x160] sm:$0xff]  }
 0x112   : > { %v7144_v1 = vpop.eup %7143  ;;  %7163 = vpow2.f32 %v5372_v0  ;;  %v8656_v52 = vsub.f32 %v1087_v48, %v7656_v21  ;;  %5943 = vmatpush3.bf16.msra.mxu1 %v6677_v54  ;;  %v1886_v31 = vpop.permute.xlu1 %1885  ;;  %v1823_v36 = vmul.f32 %v7142_v35, %v8531_v17  ;;  %v6672_v48 = vld [vmem:[%s7620_s6 + $0x168] sm:$0xff]  }
 0x113   : > { %v8662_v25 = vpop.eup %7145  ;;  %1428 = vrot.lane.b32.xlu0 %v1340_v40, %s7532_s17  ;;  %v5401_v45 = vmul.f32 -1.442695, %v8651_v42  ;;  %v1535_v58 = vmul.f32 %v8627_v32, %v8651_v42  ;;  %7165 = vpow2.f32 %v5325_v39  ;;  %5944 = vmatprep.subr.bf16.mxu1 %v6678_v7  ;;  %1971 = vst.msk [vmem:[#allocation2 + $0x99] sm:$0xff] %vm1959_vm5, %v1886_v31  ;;  %v1884_v28 = vpop.permute.xlu0 %1883  ;;  %v892_v18 = vmul.f32 %v7144_v1, %v8525_v4 }
 0x114   : > { %v7148_v22 = vpop.eup %7147  ;;  %v5371_v6 = vmul.f32 -1.442695, %v8662_v25  ;;  %v5404_v61 = vmul.f32 -1.442695, %v8656_v52  ;;  %v1086_v2 = vmul.f32 %v8662_v25, %v8662_v25  ;;  %v1538_v24 = vmul.f32 %v8635_v10, %v8656_v52  ;;  %5914 = vmatprep.mubr.bf16.mxu1 %v2092_v30  ;;  %6103 = vmatmul.mubr.bf16.gmra.mrb[4].mxu0 %v2092_v30  ;;  %1970 = vst.msk [vmem:[#allocation2 + $0x91] sm:$0xff] %vm1959_vm5, %v1884_v28 }
 0x115   : > { %v7150_v5 = vpop.eup %7149  ;;  %1909 = vrot.lane.b32.xlu1 %v1822_v19, %s7533_s20  ;;  %v1247_v33 = vadd.f32 1.0, %v7148_v22  ;;  %7167 = vpow2.f32 %v5401_v45  ;;  %v8677_v50 = vsub.f32 %v1535_v58, %v1569_v8  ;;  %v1571_v15 = vmul.f32 %v8662_v25, %v7744_v9  ;;  %6135 = vmatpush3.bf16.msra.mxu0 %v6669_v60 }
 0x116   : > { %v8681_v54 = vpop.eup %7151  ;;  %7169 = vpow2.f32 %v5371_v6  ;;  %v8684_v37 = vsub.f32 %v1086_v2, %v7656_v21  ;;  %v1730_v12 = vadd.f32 1.0, %v7150_v5  ;;  %v8686_v34 = vsub.f32 %v1538_v24, %v1572_v51  ;;  %6136 = vmatprep.subr.bf16.mxu0 %v6670_v3  ;;  %5945 = vmatpush3.bf16.msra.mxu1 %v6678_v7  ;;  %v8697_v60 = vpop.permute.xlu1 %955  ;;  %v2067_v4 = vld [vmem:[#allocation2 + $0x81] sm:$0xff]  ;;  %v6673_v2 = vld [vmem:[%s7620_s6 + $0x170] sm:$0xff]  }
 0x117   : > { %v8690_v29 = vpop.eup %7153  ;;  %1907 = vrot.lane.b32.xlu0 %v1821_v53, %s7533_s20  ;;  %7171 = vrcp.f32 %v1247_v33  ;;  %v5434_v26 = vmul.f32 -1.442695, %v8677_v50  ;;  %v1089_v39 = vmul.f32 %v8681_v54, %v8681_v54  ;;  %v5374_v7 = vmul.f32 -1.442695, %v8681_v54  ;;  %v2066_v53 = vld [vmem:[#allocation2 + $0x79] sm:$0xff] }
 0x118   : > { %v8699_v40 = vpop.eup %7155  ;;  %7173 = vpow2.f32 %v5404_v61  ;;  %v5403_v41 = vmul.f32 -1.442695, %v8684_v37  ;;  %v5437_v55 = vmul.f32 -1.442695, %v8686_v34  ;;  %v1537_v14 = vmul.f32 %v8662_v25, %v8684_v37 }
 0x119   : > { %v8705_v17 = vpop.eup %7157  ;;  %1913 = vrot.lane.b32.xlu1 %v1824_v57, %s7533_s20  ;;  %7175 = vrcp.f32 %v1730_v12  ;;  %6137 = vmatpush3.bf16.msra.mxu0 %v6670_v3  ;;  %v1088_v0 = vmul.f32 %v8690_v29, %v8690_v29  ;;  %v8720_v1 = vsub.f32 %v1089_v39, %v7656_v21  ;;  %v5373_v45 = vmul.f32 -1.442695, %v8690_v29 }
 0x11a   : > { %v8710_v56 = vpop.eup %7159  ;;  %7177 = vpow2.f32 %v5403_v41  ;;  %v8712_v19 = vsub.f32 %v1537_v14, %v1571_v15  ;;  %6138 = vmatprep.subr.bf16.mxu0 %v6671_v11  ;;  %v2069_v30 = vld [vmem:[#allocation2 + $0x99] sm:$0xff]  ;;  %v2093_v22 = vpack.c.bf16 %v2067_v4, %v2066_v53  ;;  %v1574_v41 = vmul.f32 %v8681_v54, %v7744_v9 }
 0x11b   : > { %v7162_v35 = vpop.eup %7161  ;;  %1911 = vrot.lane.b32.xlu0 %v1823_v36, %s7533_s20  ;;  %7179 = vpow2.f32 %v5434_v26  ;;  %v8722_v51 = vpop.permute.xlu1 %959  ;;  %v2068_v58 = vld [vmem:[#allocation2 + $0x91] sm:$0xff]  ;;  %v8729_v31 = vsub.f32 %v1088_v0, %v7656_v21  ;;  %v5406_v33 = vmul.f32 -1.442695, %v8720_v1  ;;  %v1540_v39 = vmul.f32 %v8681_v54, %v8720_v1  ;;  %v6679_v14 = vld [vmem:[%s7620_s6 + $0x20] sm:$0xff]  }
 0x11c   : > { %v7164_v8 = vpop.eup %7163  ;;  %v795_v44 = vadd.f32 1.0, %v7162_v35  ;;  %7181 = vpow2.f32 %v5437_v55  ;;  %v5436_v27 = vmul.f32 -1.442695, %v8712_v19  ;;  %v2094_v61 = vpack.c.bf16 %v2069_v30, %v2068_v58  ;;  %5915 = vmatmul.mubr.bf16.gmra.mrb[8].mxu1 %v2093_v22  ;;  %6106 = vmatprep.mubr.bf16.mxu0 %v2093_v22  ;;  %v6674_v55 = vld [vmem:[%s7620_s6 + $0x178] sm:$0xff]  }
 0x11d   : > { %v8724_v3 = vpop.eup %7165  ;;  %983 = vrot.lane.b32.xlu1 %v892_v18, %s7530_s13  ;;  %v798_v57 = vadd.f32 1.0, %v7164_v8  ;;  %7183 = vpow2.f32 %v5374_v7  ;;  %6139 = vmatpush3.bf16.msra.mxu0 %v6671_v11  ;;  %v5405_v11 = vmul.f32 -1.442695, %v8729_v31  ;;  %v8744_v7 = vpop.permute.xlu0 %953  ;;  %v1539_v0 = vmul.f32 %v8690_v29, %v8729_v31 }
 0x11e   : > { %7185 = vrcp.f32 %v795_v44  ;;  %6140 = vmatprep.subr.bf16.mxu0 %v6672_v48  ;;  %5918 = vmatprep.mubr.bf16.mxu1 %v2094_v61 }
 0x11f   : > { %v7168_v6 = vpop.eup %7167  ;;  %7187 = vrcp.f32 %v798_v57  ;;  %v8733_v15 = vpop.permute.xlu1 %1406  ;;  %6107 = vmatmul.mubr.bf16.gmra.mrb[8].mxu0 %v2094_v61  ;;  %5946 = vmatprep.subr.bf16.mxu1 %v6679_v14  ;;  %v460_v57 = vadd.f32 1.0, %v8699_v40 }
 0x120   : > { %v7170_v24 = vpop.eup %7169  ;;  %v1246_v5 = vadd.f32 1.0, %v7168_v6  ;;  %7189 = vpow2.f32 %v5436_v27  ;;  %5947 = vmatpush3.bf16.msra.mxu1 %v6679_v14  ;;  %v459_v6 = vadd.f32 1.0, %v8705_v17 }
 0x121   : > { %v7172_v28 = vpop.eup %7171  ;;  %v797_v21 = vadd.f32 1.0, %v7170_v24  ;;  %7191 = vpow2.f32 %v5373_v45  ;;  %6141 = vmatpush3.bf16.msra.mxu0 %v6672_v48  ;;  %v1573_v48 = vmul.f32 %v8690_v29, %v7744_v9  ;;  %v8753_v45 = vsub.f32 %v1540_v39, %v1574_v41  ;;  %v8756_v9 = vld [vmem:[%s7620_s6 + $0x180] sm:$0xff]  }
 0x122   : > { %v7174_v12 = vpop.eup %7173  ;;  %7193 = vrcp.f32 %v1246_v5  ;;  %6142 = vmatprep.subr.bf16.mxu0 %v6673_v2 }
 0x123   : > { %v8736_v36 = vpop.eup %7175  ;;  %7195 = vrcp.f32 %v797_v21  ;;  %v1249_v26 = vadd.f32 1.0, %v7174_v12  ;;  %v8750_v35 = vpop.permute.xlu1 %1410  ;;  %v8759_v61 = vsub.f32 %v1539_v0, %v1573_v48  ;;  %v462_v48 = vadd.f32 1.0, %v8710_v56 }
 0x124   : > { %v7178_v18 = vpop.eup %7177  ;;  %7197 = vpow2.f32 %v5406_v33  ;;  %v461_v56 = vadd.f32 1.0, %v8724_v3 }
 0x125   : > { %v7180_v53 = vpop.eup %7179  ;;  %7199 = vrcp.f32 %v1249_v26  ;;  %v1248_v4 = vadd.f32 1.0, %v7178_v18  ;;  %6143 = vmatpush3.bf16.msra.mxu0 %v6673_v2  ;;  %v6681_v26 = vld [vmem:[%s7620_s6 + $0x28] sm:$0xff]   ;;  %v5438_v41 = vmul.f32 -1.442695, %v8759_v61 }
 0x126   : > { %v7182_v8 = vpop.eup %7181  ;;  %v1729_v44 = vadd.f32 1.0, %v7180_v53  ;;  %7201 = vpow2.f32 %v5405_v11  ;;  %6144 = vmatprep.subr.bf16.mxu0 %v6674_v55  ;;  %v5439_v11 = vmul.f32 -1.442695, %v8753_v45  ;;  %5948 = vmatprep.subr.bf16.mxu1 %v6681_v26 }
 0x127   : > { %v7184_v27 = vpop.eup %7183  ;;  %7203 = vrcp.f32 %v1248_v4  ;;  %v1732_v30 = vadd.f32 1.0, %v7182_v8  ;;  %v8761_v2 = vpop.permute.xlu1 %1889  ;;  %5949 = vmatpush3.bf16.msra.mxu1 %v6681_v26 }
 0x128   : > { %v7186_v58 = vpop.eup %7185  ;;  %7205 = vrcp.f32 %v1729_v44  ;;  %v800_v22 = vadd.f32 1.0, %v7184_v27 }
 0x129   : > { %v7188_v24 = vpop.eup %7187  ;;  %v891_v5 = vmul.f32 %v7186_v58, %v8627_v32  ;;  %7207 = vrcp.f32 %v1732_v30  ;;  %v8765_v21 = vpop.permute.xlu0 %957  ;;  %6145 = vmatpush3.bf16.msra.mxu0 %v6674_v55  ;;  %v1343_v32 = vmul.f32 %v7172_v28, %v8560_v16  ;;  %v8786_v30 = vld [vmem:[%s7628_s10 + $0x88] sm:$0xff] }
 0x12a   : > { %v7190_v40 = vpop.eup %7189  ;;  %v894_v33 = vmul.f32 %v7188_v24, %v8635_v10  ;;  %7209 = vrcp.f32 %v800_v22  ;;  %6178 = vmatprep.subr.bf16.mxu0 %v8756_v9  ;;  %v8798_v24 = vld [vmem:[%s7628_s10 + $0x98] sm:$0xff] }
 0x12b   : > { %v7192_v12 = vpop.eup %7191  ;;  %981 = vrot.lane.b32.xlu0 %v891_v5, %s7530_s13  ;;  %v1731_v17 = vadd.f32 1.0, %v7190_v40  ;;  %7211 = vrcp.f32 %v460_v57  ;;  %v8774_v14 = vpop.permute.xlu1 %1893  ;;  %v5328_v57 = vmul.f32 -1.442695, %v8786_v30  ;;  %v5330_v5 = vmul.f32 -1.442695, %v8798_v24  ;;  %v6683_v40 = vld [vmem:[%s7620_s6 + $0x30] sm:$0xff]  }
 0x12c   : > { %v7194_v39 = vpop.eup %7193  ;;  %987 = vrot.lane.b32.xlu1 %v894_v33, %s7530_s13  ;;  %v799_v10 = vadd.f32 1.0, %v7192_v12  ;;  %7213 = vrcp.f32 %v459_v6  ;;  %5950 = vmatprep.subr.bf16.mxu1 %v6683_v40 }
 0x12d   : > { %v7196_v55 = vpop.eup %7195  ;;  %7215 = vrcp.f32 %v1731_v17  ;;  %v8778_v53 = vpop.permute.xlu0 %1404  ;;  %v1342_v8 = vmul.f32 %v7194_v39, %v8651_v42  ;;  %v8792_v42 = vld [vmem:[%s7628_s10 + $0x80] sm:$0xff]  ;;  %v1826_v17 = vmul.f32 %v8736_v36, %v8577_v63  ;;  %5951 = vmatpush3.bf16.msra.mxu1 %v6683_v40 }
 0x12e   : > { %v7198_v18 = vpop.eup %7197  ;;  %v893_v0 = vmul.f32 %v7196_v55, %v8662_v25  ;;  %7217 = vrcp.f32 %v799_v10 }
 0x12f   : > { %v7200_v16 = vpop.eup %7199  ;;  %v1251_v28 = vadd.f32 1.0, %v7198_v18  ;;  %7219 = vpow2.f32 %v5439_v11  ;;  %v8808_v11 = vld [vmem:[%s7628_s10 + $0x90] sm:$0xff]  ;;  %v8817_v18 = vld [vmem:[%s7628_s10 + $0xa0] sm:$0xff] }
 0x130   : > { %v7202_v4 = vpop.eup %7201  ;;  %985 = vrot.lane.b32.xlu0 %v893_v0, %s7530_s13  ;;  %1434 = vrot.lane.b32.xlu1 %v1343_v32, %s7532_s17  ;;  %v1345_v25 = vmul.f32 %v7200_v16, %v8656_v52  ;;  %7221 = vpow2.f32 %v5438_v41  ;;  %v5327_v52 = vmul.f32 -1.442695, %v8792_v42  ;;  %v5329_v26 = vmul.f32 -1.442695, %v8808_v11  ;;  %v8812_v32 = vld [vmem:[%s7628_s10 + $0xa8] sm:$0xff] }
 0x131   : > { %v7204_v44 = vpop.eup %7203  ;;  %7223 = vrcp.f32 %v1251_v28  ;;  %v1250_v27 = vadd.f32 1.0, %v7202_v4  ;;  %v8789_v22 = vpop.permute.xlu0 %1408  ;;  %v5332_v10 = vmul.f32 -1.442695, %v8812_v32  ;;  %v5331_v63 = vmul.f32 -1.442695, %v8817_v18 }
 0x132   : > { %v7206_v58 = vpop.eup %7205  ;;  %7225 = vrcp.f32 %v462_v48  ;;  %v8795_v3 = vpop.permute.xlu1 %963  ;;  %v1344_v12 = vmul.f32 %v7204_v44, %v8684_v37  ;;  %v8822_v48 = vld [vmem:[%s7628_s10 + $0xb8] sm:$0xff] }
 0x133   : > { %v7208_v6 = vpop.eup %7207  ;;  %7227 = vrcp.f32 %v1250_v27  ;;  %v5334_v16 = vmul.f32 -1.442695, %v8822_v48 }
 0x134   : > { %v7210_v33 = vpop.eup %7209  ;;  %1432 = vrot.lane.b32.xlu0 %v1342_v8, %s7532_s17  ;;  %1438 = vrot.lane.b32.xlu1 %v1345_v25, %s7532_s17  ;;  %7229 = vrcp.f32 %v461_v56  ;;  %v1828_v4 = vmul.f32 %v7208_v6, %v8686_v34  ;;  %v8842_v56 = vld [vmem:[%s7628_s10 + $0xb0] sm:$0xff] }
 0x135   : > { %v7212_v39 = vpop.eup %7211  ;;  %7231 = vpow2.f32 %v5328_v57  ;;  %v1888_v37 = vpop.permute.xlu0 %1887  ;;  %v5333_v44 = vmul.f32 -1.442695, %v8842_v56 }
 0x136   : > { %v7214_v41 = vpop.eup %7213  ;;  %v556_v55 = vmul.f32 %v8606_v49, %v7212_v39  ;;  %7233 = vpow2.f32 %v5327_v52  ;;  %v1825_v49 = vmul.f32 %v7206_v58, %v8677_v50  ;;  %v8830_v8 = vpop.permute.xlu1 %1414  ;;  %v6685_v52 = vld [vmem:[%s7620_s6 + $0x38] sm:$0xff]  }
 0x137   : > { %v7216_v36 = vpop.eup %7215  ;;  %v555_v0 = vmul.f32 %v8613_v59, %v7214_v41  ;;  %7235 = vpow2.f32 %v5330_v5  ;;  %5952 = vmatprep.subr.bf16.mxu1 %v6685_v52 }
 0x138   : > { %v7218_v28 = vpop.eup %7217  ;;  %1436 = vrot.lane.b32.xlu0 %v1344_v12, %s7532_s17  ;;  %1917 = vrot.lane.b32.xlu1 %v1826_v17, %s7533_s20  ;;  %589 = vst.msk [vmem:[#allocation2 + $0xb1] sm:$0xff] %vm575_vm1, %v556_v55  ;;  %7237 = vpow2.f32 %v5329_v26  ;;  %v1827_v5 = vmul.f32 %v7216_v36, %v8712_v19  ;;  %v8869_v19 = vld [vmem:[%s7628_s10 + $0xd8] sm:$0xff] }
 0x139   : > { %v7220_v59 = vpop.eup %7219  ;;  %622 = vst.msk [vmem:[#allocation2 + $0xb1] sm:$0xff] %vm608_vm2, %v7534_v13  ;;  %7239 = vpow2.f32 %v5332_v10  ;;  %v8839_v34 = vpop.permute.xlu0 %1891  ;;  %5953 = vmatpush3.bf16.msra.mxu1 %v6685_v52  ;;  %v895_v41 = vmul.f32 %v7218_v28, %v8690_v29 }
 0x13a   : > { %588 = vst.msk [vmem:[#allocation2 + $0xa9] sm:$0xff] %vm575_vm1, %v555_v0  ;;  %v7222_v25 = vpop.eup %7221  ;;  %v1734_v50 = vadd.f32 1.0, %v7220_v59  ;;  %7241 = vpow2.f32 %v5331_v63 }
 0x13b   : > { %1039 = vst.msk [vmem:[#allocation2 + $0xb1] sm:$0xff] %vm1025_vm3, %v8697_v60  ;;  %v7224_v27 = vpop.eup %7223  ;;  %v1733_v57 = vadd.f32 1.0, %v7222_v25  ;;  %7243 = vpow2.f32 %v5334_v16  ;;  %v8850_v60 = vld [vmem:[%s7628_s10 + $0xc8] sm:$0xff] }
 0x13c   : > { %621 = vst.msk [vmem:[#allocation2 + $0xa9] sm:$0xff] %vm608_vm2, %v7534_v13  ;;  %v5336_v58 = vmul.f32 -1.442695, %v8850_v60  ;;  %v7226_v6 = vpop.eup %7225  ;;  %1915 = vrot.lane.b32.xlu0 %v1825_v49, %s7533_s20  ;;  %1921 = vrot.lane.b32.xlu1 %v1828_v4, %s7533_s20  ;;  %7245 = vrcp.f32 %v1734_v50  ;;  %v1347_v55 = vmul.f32 %v7224_v27, %v8720_v1  ;;  %v5337_v50 = vmul.f32 -1.442695, %v8569_v43 }
 0x13d   : > { %1038 = vst.msk [vmem:[#allocation2 + $0xa9] sm:$0xff] %vm1025_vm3, %v8744_v7  ;;  %v896_v7 = vmul.f32 %v7210_v33, %v8681_v54  ;;  %v7228_v12 = vpop.eup %7227  ;;  %7247 = vrcp.f32 %v1733_v57  ;;  %v558_v17 = vmul.f32 %v8620_v62, %v7226_v6  ;;  %v5338_v54 = vmul.f32 -1.442695, %v8869_v19  ;;  %v8872_v33 = vpop.permute.xlu0 %961  ;;  %v8879_v62 = vld [vmem:[%s7620_s6 + $0x80] sm:$0xff]  }
 0x13e   : > { %1490 = vst.msk [vmem:[#allocation2 + $0xb1] sm:$0xff] %vm1476_vm4, %v8733_v15  ;;  %1489 = vst.msk [vmem:[#allocation2 + $0xa9] sm:$0xff] %vm1476_vm4, %v8778_v53  ;;  %v8863_v15 = vld [vmem:[%s7628_s10 + $0xc0] sm:$0xff]  ;;  %v7230_v53 = vpop.eup %7229  ;;  %7249 = vpow2.f32 %v5333_v44  ;;  %5986 = vmatprep.subr.bf16.mxu1 %v8879_v62 }
 0x13f   : > { %1973 = vst.msk [vmem:[#allocation2 + $0xb1] sm:$0xff] %vm1959_vm5, %v8761_v2  ;;  %v5335_v40 = vmul.f32 -1.442695, %v8863_v15  ;;  %1972 = vst.msk [vmem:[#allocation2 + $0xa9] sm:$0xff] %vm1959_vm5, %v1888_v37  ;;  %v8874_v2 = vpop.permute.xlu1 %1897  ;;  %v7232_v26 = vpop.eup %7231  ;;  %v557_v39 = vmul.f32 %v8631_v38, %v7230_v53  ;;  %7251 = vpow2.f32 %v5336_v58 }
 0x140   : > { %591 = vst.msk [vmem:[#allocation2 + $0xc9] sm:$0xff] %vm575_vm1, %v558_v17  ;;  %v7234_v10 = vpop.eup %7233  ;;  %1919 = vrot.lane.b32.xlu0 %v1827_v5, %s7533_s20  ;;  %991 = vrot.lane.b32.xlu1 %v896_v7, %s7530_s13  ;;  %v464_v37 = vadd.f32 1.0, %v7232_v26  ;;  %v3457_v17 = vld [vmem:[#allocation2 + $0x1a] sm:$0xff] }
 0x141   : > { %624 = vst.msk [vmem:[#allocation2 + $0xc9] sm:$0xff] %vm608_vm2, %v7534_v13  ;;  %7253 = vpow2.f32 %v5335_v40  ;;  %v7236_v63 = vpop.eup %7235  ;;  %v463_v38 = vadd.f32 1.0, %v7234_v10  ;;  %v8895_v29 = vpop.permute.xlu0 %1412 }
 0x142   : > { %1041 = vst.msk [vmem:[#allocation2 + $0xc9] sm:$0xff] %vm1025_vm3, %v8722_v51  ;;  %7255 = vpow2.f32 %v5338_v54  ;;  %v7238_v36 = vpop.eup %7237  ;;  %v466_v1 = vadd.f32 1.0, %v7236_v63  ;;  %v3458_v54 = vld [vmem:[#allocation2 + $0x22] sm:$0xff] }
 0x143   : > { %590 = vst.msk [vmem:[#allocation2 + $0xc1] sm:$0xff] %vm575_vm1, %v557_v39  ;;  %7257 = vrcp.f32 %v464_v37  ;;  %v7240_v0 = vpop.eup %7239  ;;  %v465_v16 = vadd.f32 1.0, %v7238_v36  ;;  %v8906_v4 = vpop.permute.xlu1 %967 }
 0x144   : > { %623 = vst.msk [vmem:[#allocation2 + $0xc1] sm:$0xff] %vm608_vm2, %v7534_v13  ;;  %7259 = vrcp.f32 %v463_v38  ;;  %v7242_v28 = vpop.eup %7241  ;;  %989 = vrot.lane.b32.xlu0 %v895_v41, %s7530_s13  ;;  %1442 = vrot.lane.b32.xlu1 %v1347_v55, %s7532_s17  ;;  %v5342_v41 = vmul.f32 -1.442695, %v8598_v46  ;;  %v5341_v38 = vmul.f32 -1.442695, %v8603_v23 }
 0x145   : > { %1492 = vst.msk [vmem:[#allocation2 + $0xc9] sm:$0xff] %vm1476_vm4, %v8750_v35  ;;  %v1346_v35 = vmul.f32 %v7228_v12, %v8729_v31  ;;  %7261 = vrcp.f32 %v466_v1  ;;  %v7244_v59 = vpop.eup %7243  ;;  %v467_v25 = vadd.f32 1.0, %v7242_v28  ;;  %v8911_v27 = vpop.permute.xlu0 %1895 }
 0x146   : > { %1040 = vst.msk [vmem:[#allocation2 + $0xc1] sm:$0xff] %vm1025_vm3, %v8765_v21  ;;  %v2071_v51 = vld [vmem:[#allocation2 + $0xb1] sm:$0xff]  ;;  %v2070_v49 = vld [vmem:[#allocation2 + $0xa9] sm:$0xff]  ;;  %v468_v21 = vadd.f32 1.0, %v7240_v0  ;;  %7263 = vrcp.f32 %v465_v16  ;;  %v7246_v44 = vpop.eup %7245  ;;  %v470_v31 = vadd.f32 1.0, %v7244_v59  ;;  %v3489_v0 = vpack.c.bf16 %v3458_v54, %v3457_v17 }
 0x147   : > { %1975 = vst.msk [vmem:[#allocation2 + $0xc9] sm:$0xff] %vm1959_vm5, %v8774_v14  ;;  %v2095_v14 = vpack.c.bf16 %v2071_v51, %v2070_v49  ;;  %v7248_v57 = vpop.eup %7247  ;;  %v1830_v58 = vmul.f32 %v7246_v44, %v8753_v45 }
 0x148   : > { %1491 = vst.msk [vmem:[#allocation2 + $0xc1] sm:$0xff] %vm1476_vm4, %v8789_v22  ;;  %7265 = vrcp.f32 %v468_v21  ;;  %v5340_v22 = vmul.f32 -1.442695, %v8573_v20  ;;  %v7250_v52 = vpop.eup %7249  ;;  %1440 = vrot.lane.b32.xlu0 %v1346_v35, %s7532_s17 }
 0x149   : > { %1974 = vst.msk [vmem:[#allocation2 + $0xc1] sm:$0xff] %vm1959_vm5, %v8839_v34  ;;  %5919 = vmatmul.mubr.bf16.gmra.mrb[12].mxu1 %v2095_v14  ;;  %6110 = vmatprep.mubr.bf16.mxu0 %v2095_v14  ;;  %7267 = vrcp.f32 %v467_v25  ;;  %v1829_v34 = vmul.f32 %v7248_v57, %v8759_v61  ;;  %v7252_v43 = vpop.eup %7251  ;;  %v469_v6 = vadd.f32 1.0, %v7250_v52  ;;  %v8918_v20 = vpop.permute.xlu0 %965  ;;  %v5339_v61 = vmul.f32 -1.442695, %v8585_v47  ;;  %v6682_v14 = vld [vmem:[%s7620_s6 + $0x188] sm:$0xff]  }
 0x14a   : > { %7269 = vrcp.f32 %v470_v31  ;;  %1925 = vrot.lane.b32.xlu1 %v1830_v58, %s7533_s20  ;;  %v8920_v40 = vpop.permute.xlu1 %971  ;;  %v472_v45 = vadd.f32 1.0, %v7252_v43  ;;  %v6684_v43 = vld [vmem:[%s7620_s6 + $0x190] sm:$0xff]  }
 0x14b   : > { %7271 = vpow2.f32 %v5337_v50  ;;  %v7254_v5 = vpop.eup %7253 }
 0x14c   : > { %7273 = vpow2.f32 %v5340_v22  ;;  %v7256_v12 = vpop.eup %7255  ;;  %v471_v53 = vadd.f32 1.0, %v7254_v5  ;;  %1923 = vrot.lane.b32.xlu0 %v1829_v34, %s7533_s20  ;;  %v3463_v5 = vld [vmem:[#allocation2 + $0x62] sm:$0xff] }
 0x14d   : > { %7275 = vrcp.f32 %v469_v6  ;;  %v7258_v26 = vpop.eup %7257  ;;  %v474_v10 = vadd.f32 1.0, %v7256_v12  ;;  %v970_v47 = vpop.permute.xlu0 %969 }
 0x14e   : > { %v2073_v7 = vld [vmem:[#allocation2 + $0xc9] sm:$0xff]  ;;  %7277 = vrcp.f32 %v472_v45  ;;  %v7260_v55 = vpop.eup %7259  ;;  %v560_v37 = vmul.f32 %v8786_v30, %v7258_v26  ;;  %v1419_v51 = vpop.permute.xlu1 %1418 }
 0x14f   : > { %7279 = vrcp.f32 %v471_v53  ;;  %v7262_v36 = vpop.eup %7261  ;;  %v559_v1 = vmul.f32 %v8792_v42, %v7260_v55  ;;  %v3466_v45 = vld [vmem:[#allocation2 + $0x82] sm:$0xff]  ;;  %v6686_v53 = vld [vmem:[%s7620_s6 + $0x198] sm:$0xff]  }
 0x150   : > { %v2072_v39 = vld [vmem:[#allocation2 + $0xc1] sm:$0xff]  ;;  %7281 = vrcp.f32 %v474_v10  ;;  %v7264_v16 = vpop.eup %7263  ;;  %593 = vst.msk [vmem:[#allocation2 + $0xe1] sm:$0xff] %vm575_vm1, %v560_v37  ;;  %v562_v46 = vmul.f32 %v8798_v24, %v7262_v36 }
 0x151   : > { %v2096_v63 = vpack.c.bf16 %v2073_v7, %v2072_v39  ;;  %7283 = vpow2.f32 %v5339_v61  ;;  %626 = vst.msk [vmem:[#allocation2 + $0xe1] sm:$0xff] %vm608_vm2, %v7534_v13  ;;  %v561_v23 = vmul.f32 %v8808_v11, %v7264_v16  ;;  %v3460_v11 = vld [vmem:[#allocation2 + $0x3a] sm:$0xff]  ;;  %v1417_v49 = vpop.permute.xlu0 %1416  ;;  %v3464_v7 = vld [vmem:[#allocation2 + $0x6a] sm:$0xff] }
 0x152   : > { %v7266_v30 = vpop.eup %7265  ;;  %592 = vst.msk [vmem:[#allocation2 + $0xd9] sm:$0xff] %vm575_vm1, %v559_v1  ;;  %7285 = vpow2.f32 %v5342_v41  ;;  %595 = vst.msk [vmem:[#allocation2 + $0xf9] sm:$0xff] %vm575_vm1, %v562_v46  ;;  %v1423_v21 = vpop.permute.xlu1 %1422  ;;  %v3492_v54 = vpack.c.bf16 %v3464_v7, %v3463_v5  ;;  %v7456_v41 = vld [vmem:[%s7628_s10 + $0xd0] sm:$0xff]  ;;  %v6687_v37 = vld [vmem:[%s7620_s6 + $0x1a0] sm:$0xff]  }
 0x153   : > { %5922 = vmatprep.mubr.bf16.mxu1 %v2096_v63  ;;  %6111 = vmatmul.mubr.bf16.gmra.mrb[12].mxu0 %v2096_v63  ;;  %v7268_v42 = vpop.eup %7267  ;;  %1043 = vst.msk [vmem:[#allocation2 + $0xe1] sm:$0xff] %vm1025_vm3, %v8795_v3  ;;  %v564_v24 = vmul.f32 %v8812_v32, %v7266_v30  ;;  %7287 = vpow2.f32 %v5341_v38  ;;  %v3459_v3 = vld [vmem:[#allocation2 + $0x32] sm:$0xff]  ;;  %v3468_v38 = vld [vmem:[#allocation2 + $0x9a] sm:$0xff]  ;;  %v7457_v36 = vld [vmem:[%s7628_s10 + $0xe8] sm:$0xff] }
 0x154   : > { %6146 = vmatprep.mubr.bf16.mxu0 %v3489_v0  ;;  %625 = vst.msk [vmem:[#allocation2 + $0xd9] sm:$0xff] %vm608_vm2, %v7534_v13  ;;  %v7270_v28 = vpop.eup %7269  ;;  %628 = vst.msk [vmem:[#allocation2 + $0xf9] sm:$0xff] %vm608_vm2, %v7534_v13  ;;  %v563_v35 = vmul.f32 %v8817_v18, %v7268_v42  ;;  %v3467_v63 = vld [vmem:[#allocation2 + $0x92] sm:$0xff]  ;;  %v3469_v0 = vld [vmem:[#allocation2 + $0xaa] sm:$0xff] }
 0x155   : > { %1042 = vst.msk [vmem:[#allocation2 + $0xd9] sm:$0xff] %vm1025_vm3, %v8872_v33  ;;  %v7272_v32 = vpop.eup %7271  ;;  %1045 = vst.msk [vmem:[#allocation2 + $0xf9] sm:$0xff] %vm1025_vm3, %v8906_v4  ;;  %v3462_v33 = vld [vmem:[#allocation2 + $0x52] sm:$0xff]  ;;  %v566_v18 = vmul.f32 %v8822_v48, %v7270_v28  ;;  %v3490_v4 = vpack.c.bf16 %v3460_v11, %v3459_v3  ;;  %v1421_v44 = vpop.permute.xlu0 %1420  ;;  %v3494_v16 = vpack.c.bf16 %v3468_v38, %v3467_v63  ;;  %v6689_v30 = vld [vmem:[%s7620_s6 + $0x1a8] sm:$0xff]  }
 0x156   : > { %1494 = vst.msk [vmem:[#allocation2 + $0xe1] sm:$0xff] %vm1476_vm4, %v8830_v8  ;;  %1493 = vst.msk [vmem:[#allocation2 + $0xd9] sm:$0xff] %vm1476_vm4, %v8895_v29  ;;  %v3461_v8 = vld [vmem:[#allocation2 + $0x4a] sm:$0xff]  ;;  %v7274_v59 = vpop.eup %7273 }
 0x157   : > { %594 = vst.msk [vmem:[#allocation2 + $0xf1] sm:$0xff] %vm575_vm1, %v561_v23  ;;  %597 = vst.msk [vmem:[#allocation2 + $0x111] sm:$0xff] %vm575_vm1, %v564_v24  ;;  %v7276_v29 = vpop.eup %7275  ;;  %v476_v48 = vadd.f32 1.0, %v7274_v59  ;;  %v3491_v50 = vpack.c.bf16 %v3462_v33, %v3461_v8  ;;  %v7460_v33 = vld [vmem:[%s7628_s10 + $0xf0] sm:$0xff] }
 0x158   : > { %1977 = vst.msk [vmem:[#allocation2 + $0xe1] sm:$0xff] %vm1959_vm5, %v8874_v2  ;;  %1976 = vst.msk [vmem:[#allocation2 + $0xd9] sm:$0xff] %vm1959_vm5, %v8911_v27  ;;  %v473_v2 = vadd.f32 1.0, %v7272_v32  ;;  %v7278_v25 = vpop.eup %7277  ;;  %v1902_v27 = vpop.permute.xlu1 %1901  ;;  %v565_v31 = vmul.f32 %v8842_v56, %v7276_v29  ;;  %v7459_v32 = vld [vmem:[%s7628_s10 + $0xf8] sm:$0xff]  ;;  %v6690_v59 = vld [vmem:[%s7620_s6 + $0x1b0] sm:$0xff]  }
 0x159   : > { %627 = vst.msk [vmem:[#allocation2 + $0xf1] sm:$0xff] %vm608_vm2, %v7534_v13  ;;  %630 = vst.msk [vmem:[#allocation2 + $0x111] sm:$0xff] %vm608_vm2, %v7534_v13  ;;  %v7280_v22 = vpop.eup %7279  ;;  %v568_v57 = vmul.f32 %v8850_v60, %v7278_v25  ;;  %v3472_v29 = vld [vmem:[#allocation2 + $0xca] sm:$0xff] }
 0x15a   : > { %1044 = vst.msk [vmem:[#allocation2 + $0xf1] sm:$0xff] %vm1025_vm3, %v8918_v20  ;;  %1047 = vst.msk [vmem:[#allocation2 + $0x111] sm:$0xff] %vm1025_vm3, %v8920_v40  ;;  %7289 = vrcp.f32 %v473_v2  ;;  %v7282_v58 = vpop.eup %7281  ;;  %v567_v52 = vmul.f32 %v8863_v15, %v7280_v22  ;;  %v3465_v40 = vld [vmem:[#allocation2 + $0x7a] sm:$0xff]  ;;  %v3471_v2 = vld [vmem:[#allocation2 + $0xc2] sm:$0xff] }
 0x15b   : > { %596 = vst.msk [vmem:[#allocation2 + $0x109] sm:$0xff] %vm575_vm1, %v563_v35  ;;  %599 = vst.msk [vmem:[#allocation2 + $0x129] sm:$0xff] %vm575_vm1, %v566_v18  ;;  %6147 = vmatmul.mubr.bf16.vlgmr.msra.gmra.mrb[0].mxu0 %v3490_v4  ;;  %7291 = vrcp.f32 %v476_v48  ;;  %v7284_v56 = vpop.eup %7283  ;;  %v570_v34 = vmul.f32 %v8869_v19, %v7282_v58  ;;  %v3493_v61 = vpack.c.bf16 %v3466_v45, %v3465_v40  ;;  %v7458_v35 = vld [vmem:[%s7628_s10 + $0xe0] sm:$0xff] }
 0x15c   : > { %1496 = vst.msk [vmem:[#allocation2 + $0xf9] sm:$0xff] %vm1476_vm4, %v1419_v51  ;;  %1495 = vst.msk [vmem:[#allocation2 + $0xf1] sm:$0xff] %vm1476_vm4, %v1417_v49  ;;  %6150 = vmatprep.mubr.bf16.mxu0 %v3491_v50  ;;  %6179 = vmatpush3.bf16.msra.mxu0 %v8756_v9  ;;  %v7286_v60 = vpop.eup %7285  ;;  %v475_v9 = vadd.f32 1.0, %v7284_v56  ;;  %v6692_v50 = vld [vmem:[%s7620_s6 + $0x1b8] sm:$0xff]   ;;  %v9026_v22 = vld [vmem:[%s7620_s6 + $0x1c0] sm:$0xff]  }
 0x15d   : > { %629 = vst.msk [vmem:[#allocation2 + $0x109] sm:$0xff] %vm608_vm2, %v7534_v13  ;;  %632 = vst.msk [vmem:[#allocation2 + $0x129] sm:$0xff] %vm608_vm2, %v7534_v13  ;;  %6180 = vmatprep.subr.bf16.mxu0 %v6682_v14  ;;  %v7288_v15 = vpop.eup %7287  ;;  %v478_v19 = vadd.f32 1.0, %v7286_v60  ;;  %v1900_v26 = vpop.permute.xlu0 %1899 }
 0x15e   : > { %1046 = vst.msk [vmem:[#allocation2 + $0x109] sm:$0xff] %vm1025_vm3, %v970_v47  ;;  %7293 = vrcp.f32 %v475_v9  ;;  %v477_v17 = vadd.f32 1.0, %v7288_v15  ;;  %v3470_v47 = vld [vmem:[#allocation2 + $0xb2] sm:$0xff] }
 0x15f   : > { %1498 = vst.msk [vmem:[#allocation2 + $0x111] sm:$0xff] %vm1476_vm4, %v1423_v21  ;;  %1497 = vst.msk [vmem:[#allocation2 + $0x109] sm:$0xff] %vm1476_vm4, %v1421_v44  ;;  %v2075_v6 = vld [vmem:[#allocation2 + $0xe1] sm:$0xff]  ;;  %v2074_v20 = vld [vmem:[#allocation2 + $0xd9] sm:$0xff]  ;;  %7295 = vrcp.f32 %v478_v19  ;;  %v3495_v24 = vpack.c.bf16 %v3470_v47, %v3469_v0 }
 0x160   : > { %1979 = vst.msk [vmem:[#allocation2 + $0xf9] sm:$0xff] %vm1959_vm5, %v1902_v27  ;;  %v2097_v12 = vpack.c.bf16 %v2075_v6, %v2074_v20  ;;  %6181 = vmatpush3.bf16.msra.mxu0 %v6682_v14  ;;  %7297 = vrcp.f32 %v477_v17  ;;  %1978 = vst.msk [vmem:[#allocation2 + $0xf1] sm:$0xff] %vm1959_vm5, %v1900_v26  ;;  %v3473_v4 = vld [vmem:[#allocation2 + $0xda] sm:$0xff]  ;;  %v3474_v48 = vld [vmem:[#allocation2 + $0xe2] sm:$0xff]  ;;  %v3496_v14 = vpack.c.bf16 %v3472_v29, %v3471_v2 }
 0x161   : > { %598 = vst.msk [vmem:[#allocation2 + $0x121] sm:$0xff] %vm575_vm1, %v565_v31  ;;  %601 = vst.msk [vmem:[#allocation2 + $0x141] sm:$0xff] %vm575_vm1, %v568_v57  ;;  %6182 = vmatprep.subr.bf16.mxu0 %v6684_v43  ;;  %v3497_v44 = vpack.c.bf16 %v3474_v48, %v3473_v4 }
 0x162   : > { %631 = vst.msk [vmem:[#allocation2 + $0x121] sm:$0xff] %vm608_vm2, %v7534_v13  ;;  %634 = vst.msk [vmem:[#allocation2 + $0x141] sm:$0xff] %vm608_vm2, %v7534_v13  ;;  %5923 = vmatmul.mubr.bf16.gmra.mrb[16].mxu1 %v2097_v12 }
 0x163   : > { %600 = vst.msk [vmem:[#allocation2 + $0x139] sm:$0xff] %vm575_vm1, %v567_v52  ;;  %603 = vst.msk [vmem:[#allocation2 + $0x159] sm:$0xff] %vm575_vm1, %v570_v34  ;;  %6151 = vmatmul.mubr.bf16.gmra.mrb[4].mxu0 %v3492_v54 }
 0x164   : > { %633 = vst.msk [vmem:[#allocation2 + $0x139] sm:$0xff] %vm608_vm2, %v7534_v13  ;;  %636 = vst.msk [vmem:[#allocation2 + $0x159] sm:$0xff] %vm608_vm2, %v7534_v13  ;;  %v7290_v39 = vpop.eup %7289  ;;  %6154 = vmatprep.mubr.bf16.mxu0 %v3493_v61  ;;  %6183 = vmatpush3.bf16.msra.mxu0 %v6684_v43  ;;  %v1906_v46 = vpop.permute.xlu1 %1905 }
 0x165   : > { %v7292_v10 = vpop.eup %7291  ;;  %v569_v55 = vmul.f32 %v7456_v41, %v7290_v39  ;;  %6184 = vmatprep.subr.bf16.mxu0 %v6686_v53  ;;  %1981 = vst.msk [vmem:[#allocation2 + $0x111] sm:$0xff] %vm1959_vm5, %v1906_v46  ;;  %v1904_v42 = vpop.permute.xlu0 %1903 }
 0x166   : > { %v572_v1 = vmul.f32 %v7457_v36, %v7292_v10  ;;  %1980 = vst.msk [vmem:[#allocation2 + $0x109] sm:$0xff] %vm1959_vm5, %v1904_v42 }
 0x167   : > { %602 = vst.msk [vmem:[#allocation2 + $0x151] sm:$0xff] %vm575_vm1, %v569_v55  ;;  %v2077_v51 = vld [vmem:[#allocation2 + $0xf9] sm:$0xff]  ;;  %v2076_v28 = vld [vmem:[#allocation2 + $0xf1] sm:$0xff] }
 0x168   : > { %635 = vst.msk [vmem:[#allocation2 + $0x151] sm:$0xff] %vm608_vm2, %v7534_v13  ;;  %6185 = vmatpush3.bf16.msra.mxu0 %v6686_v53  ;;  %v7294_v23 = vpop.eup %7293  ;;  %v2098_v11 = vpack.c.bf16 %v2077_v51, %v2076_v28  ;;  %v3475_v57 = vld [vmem:[#allocation2 + $0xf2] sm:$0xff]  ;;  %v3476_v58 = vld [vmem:[#allocation2 + $0xfa] sm:$0xff] }
 0x169   : > { %605 = vst.msk [vmem:[#allocation2 + $0x171] sm:$0xff] %vm575_vm1, %v572_v1  ;;  %6186 = vmatprep.subr.bf16.mxu0 %v6687_v37  ;;  %v7296_v3 = vpop.eup %7295  ;;  %v571_v49 = vmul.f32 %v7458_v35, %v7294_v23 }
 0x16a   : > { %638 = vst.msk [vmem:[#allocation2 + $0x171] sm:$0xff] %vm608_vm2, %v7534_v13  ;;  %v7298_v21 = vpop.eup %7297  ;;  %v574_v8 = vmul.f32 %v7459_v32, %v7296_v3  ;;  %5926 = vmatprep.mubr.bf16.mxu1 %v2098_v11 }
 0x16b   : > { %6155 = vmatmul.mubr.bf16.gmra.mrb[8].mxu0 %v3494_v16  ;;  %604 = vst.msk [vmem:[#allocation2 + $0x169] sm:$0xff] %vm575_vm1, %v571_v49  ;;  %v573_v18 = vmul.f32 %v7460_v33, %v7298_v21 }
 0x16c   : > { %6158 = vmatprep.mubr.bf16.mxu0 %v3495_v24  ;;  %6187 = vmatpush3.bf16.msra.mxu0 %v6687_v37  ;;  %637 = vst.msk [vmem:[#allocation2 + $0x169] sm:$0xff] %vm608_vm2, %v7534_v13  ;;  %v2079_v25 = vld [vmem:[#allocation2 + $0x111] sm:$0xff] }
 0x16d   : > { %6188 = vmatprep.subr.bf16.mxu0 %v6689_v30  ;;  %607 = vst.msk [vmem:[#allocation2 + $0x189] sm:$0xff] %vm575_vm1, %v574_v8  ;;  %606 = vst.msk [vmem:[#allocation2 + $0x181] sm:$0xff] %vm575_vm1, %v573_v18  ;;  %v2078_v27 = vld [vmem:[#allocation2 + $0x109] sm:$0xff]  ;;  %v3478_v56 = vld [vmem:[#allocation2 + $0x112] sm:$0xff] }
 0x16e   : > { %640 = vst.msk [vmem:[#allocation2 + $0x189] sm:$0xff] %vm608_vm2, %v7534_v13  ;;  %639 = vst.msk [vmem:[#allocation2 + $0x181] sm:$0xff] %vm608_vm2, %v7534_v13  ;;  %v2099_v31 = vpack.c.bf16 %v2079_v25, %v2078_v27  ;;  %v3477_v52 = vld [vmem:[#allocation2 + $0x10a] sm:$0xff]  ;;  %v9028_v13 = vpack.c.bf16 %v3476_v58, %v3475_v57  ;;  %v1994_v58 = vld [vmem:[#allocation2 + $0x18] sm:$0xff] }
 0x16f   : > { %v3499_v43 = vpack.c.bf16 %v3478_v56, %v3477_v52  ;;  %v9077_v25 = vld [vmem:[#allocation2 + $0x8] sm:$0xff]  ;;  %v1995_v52 = vld [vmem:[#allocation2 + $0x20] sm:$0xff]  ;;  %v1996_v56 = vld [vmem:[#allocation2 + $0x30] sm:$0xff] }
 0x170   : > { %6189 = vmatpush3.bf16.msra.mxu0 %v6689_v30  ;;  %5927 = vmatmul.mubr.bf16.gmra.mrb[20].mxu1 %v2099_v31 }
 0x171   : > { %6190 = vmatprep.subr.bf16.mxu0 %v6690_v59 }
 0x173   : > { %6159 = vmatmul.mubr.bf16.gmra.mrb[12].mxu0 %v3496_v14 }
 0x174   : > { %6162 = vmatprep.mubr.bf16.mxu0 %v3497_v44  ;;  %6191 = vmatpush3.bf16.msra.mxu0 %v6690_v59  ;;  %v1992_v59 = vld [vmem:[#allocation2] sm:$0xff] }
 0x175   : > { %6192 = vmatprep.subr.bf16.mxu0 %v6692_v50 }
 0x176   : > { %v976_v34 = vpop.permute.xlu1 %975 }
 0x177   : > { %1049 = vst.msk [vmem:[#allocation2 + $0x129] sm:$0xff] %vm1025_vm3, %v976_v34  ;;  %v974_v60 = vpop.permute.xlu0 %973  ;;  %v1997_v34 = vld [vmem:[#allocation2 + $0x38] sm:$0xff] }
 0x178   : > { %6193 = vmatpush3.bf16.msra.mxu0 %v6692_v50  ;;  %1048 = vst.msk [vmem:[#allocation2 + $0x121] sm:$0xff] %vm1025_vm3, %v974_v60  ;;  %v2024_v50 = vpack.c.bf16 %v9077_v25, %v1992_v59  ;;  %v6691_v60 = vld [vmem:[%s7620_s6 + $0x88] sm:$0xff]  }
 0x179   : > { %6226 = vmatprep.subr.bf16.mxu0 %v9026_v22 }
 0x17b   : > { %6163 = vmatmul.mubr.bf16.gmra.mrb[16].mxu0 %v9028_v13  ;;  %v980_v6 = vpop.permute.xlu1 %979 }
 0x17c   : > { %6166 = vmatprep.mubr.bf16.mxu0 %v3499_v43  ;;  %1051 = vst.msk [vmem:[#allocation2 + $0x141] sm:$0xff] %vm1025_vm3, %v980_v6  ;;  %v9089_v43 = vpack.c.bf16 %v1995_v52, %v1994_v58  ;;  %v9092_v6 = vpack.c.bf16 %v1997_v34, %v1996_v56  ;;  %v9153_v58 = vld [vmem:[%s7620_s6 + $0x200] sm:$0xff]  }
 0x17d   : > { %v978_v5 = vpop.permute.xlu0 %977 }
 0x17e   : > { %1050 = vst.msk [vmem:[#allocation2 + $0x139] sm:$0xff] %vm1025_vm3, %v978_v5 }
 0x17f   : > { %v1427_v7 = vpop.permute.xlu1 %1426 }
 0x180   : > { %1500 = vst.msk [vmem:[#allocation2 + $0x129] sm:$0xff] %vm1476_vm4, %v1427_v7 }
 0x181   : > { %v1425_v9 = vpop.permute.xlu0 %1424 }
 0x182   : > { %1499 = vst.msk [vmem:[#allocation2 + $0x121] sm:$0xff] %vm1476_vm4, %v1425_v9 }
 0x183   : > { %v1431_v15 = vpop.permute.xlu1 %1430 }
 0x184   : > { %1502 = vst.msk [vmem:[#allocation2 + $0x141] sm:$0xff] %vm1476_vm4, %v1431_v15  ;;  %v6693_v15 = vld [vmem:[%s7620_s6 + $0x90] sm:$0xff]  }
 0x185   : > { %v1429_v20 = vpop.permute.xlu0 %1428 }
 0x186   : > { %1501 = vst.msk [vmem:[#allocation2 + $0x139] sm:$0xff] %vm1476_vm4, %v1429_v20  ;;  %v1998_v20 = vld [vmem:[#allocation2 + $0x48] sm:$0xff] }
 0x187   : > { %v1910_v40 = vpop.permute.xlu1 %1909 }
 0x188   : > { %1983 = vst.msk [vmem:[#allocation2 + $0x129] sm:$0xff] %vm1959_vm5, %v1910_v40  ;;  %v1999_v40 = vld [vmem:[#allocation2 + $0x50] sm:$0xff] }
 0x189   : > { %v1908_v45 = vpop.permute.xlu0 %1907 }
 0x18a   : > { %1982 = vst.msk [vmem:[#allocation2 + $0x121] sm:$0xff] %vm1959_vm5, %v1908_v45  ;;  %v2000_v45 = vld [vmem:[#allocation2 + $0x60] sm:$0xff] }
 0x18b   : > { %v1914_v19 = vpop.permute.xlu1 %1913 }
 0x18c   : > { %1985 = vst.msk [vmem:[#allocation2 + $0x141] sm:$0xff] %vm1959_vm5, %v1914_v19  ;;  %v2001_v19 = vld [vmem:[#allocation2 + $0x68] sm:$0xff] }
 0x18d   : > { %v1912_v12 = vpop.permute.xlu0 %1911 }
 0x18e   : > { %1984 = vst.msk [vmem:[#allocation2 + $0x139] sm:$0xff] %vm1959_vm5, %v1912_v12  ;;  %v9099_v12 = vpack.c.bf16 %v1999_v40, %v1998_v20 }
 0x18f   : > { %v984_v17 = vpop.permute.xlu1 %983  ;;  %v2081_v54 = vld [vmem:[#allocation2 + $0x129] sm:$0xff] }
 0x190   : > { %v3480_v53 = vld [vmem:[#allocation2 + $0x12a] sm:$0xff]  ;;  %1053 = vst.msk [vmem:[#allocation2 + $0x159] sm:$0xff] %vm1025_vm3, %v984_v17  ;;  %v9102_v17 = vpack.c.bf16 %v2001_v19, %v2000_v45 }
 0x191   : > { %v2080_v61 = vld [vmem:[#allocation2 + $0x121] sm:$0xff] }
 0x192   : > { %v3479_v26 = vld [vmem:[#allocation2 + $0x122] sm:$0xff]  ;;  %v9045_v39 = vpack.c.bf16 %v2081_v54, %v2080_v61 }
 0x193   : > { %v9047_v10 = vpack.c.bf16 %v3480_v53, %v3479_v26  ;;  %v2083_v41 = vld [vmem:[#allocation2 + $0x141] sm:$0xff]  ;;  %v2002_v53 = vld [vmem:[#allocation2 + $0x78] sm:$0xff] }
 0x194   : > { %v3482_v55 = vld [vmem:[#allocation2 + $0x142] sm:$0xff]  ;;  %5930 = vmatprep.mubr.bf16.mxu1 %v9045_v39 }
 0x195   : > { %6167 = vmatmul.mubr.bf16.gmra.mrb[20].mxu0 %v9047_v10  ;;  %v2082_v37 = vld [vmem:[#allocation2 + $0x139] sm:$0xff]  ;;  %v6698_v26 = vld [vmem:[%s7620_s6 + $0x1c8] sm:$0xff]  }
 0x196   : > { %v3481_v63 = vld [vmem:[#allocation2 + $0x13a] sm:$0xff]  ;;  %v9051_v38 = vpack.c.bf16 %v2083_v41, %v2082_v37  ;;  %v2004_v41 = vld [vmem:[#allocation2 + $0x90] sm:$0xff] }
 0x197   : > { %v9053_v36 = vpack.c.bf16 %v3482_v55, %v3481_v63  ;;  %v6695_v54 = vld [vmem:[%s7620_s6 + $0xa0] sm:$0xff]   ;;  %v2005_v55 = vld [vmem:[#allocation2 + $0x98] sm:$0xff]  ;;  %v6697_v63 = vld [vmem:[%s7620_s6 + $0xa8] sm:$0xff]  }
 0x198   : > { %5931 = vmatmul.mubr.bf16.gmra.mrb[24].mxu1 %v9051_v38  ;;  %v2003_v61 = vld [vmem:[#allocation2 + $0x80] sm:$0xff]  ;;  %v2018_v52 = vld [vmem:[#allocation2 + $0x138] sm:$0xff] }
 0x199   : > { %6170 = vmatprep.mubr.bf16.mxu0 %v9053_v36  ;;  %v9110_v37 = vpack.c.bf16 %v2003_v61, %v2002_v53  ;;  %v2019_v56 = vld [vmem:[#allocation2 + $0x140] sm:$0xff] }
 0x19a   : > { %v2541_v61 = vld [vmem:[#allocation2 + $0x1a] sm:$0xff] }
 0x19d   : > { %v982_v1 = vpop.permute.xlu0 %981 }
 0x19e   : > { %1052 = vst.msk [vmem:[#allocation2 + $0x151] sm:$0xff] %vm1025_vm3, %v982_v1  ;;  %v988_v0 = vpop.permute.xlu1 %987  ;;  %v9114_v1 = vpack.c.bf16 %v2005_v55, %v2004_v41  ;;  %v2543_v41 = vld [vmem:[#allocation2 + $0x32] sm:$0xff]  ;;  %v2544_v55 = vld [vmem:[#allocation2 + $0x3a] sm:$0xff] }
 0x19f   : > { %1055 = vst.msk [vmem:[#allocation2 + $0x171] sm:$0xff] %vm1025_vm3, %v988_v0  ;;  %v6700_v0 = vld [vmem:[%s7620_s6 + $0x1d0] sm:$0xff]  }
 0x1a2   : > { %v986_v47 = vpop.permute.xlu0 %985  ;;  %v1435_v51 = vpop.permute.xlu1 %1434 }
 0x1a3   : > { %1054 = vst.msk [vmem:[#allocation2 + $0x169] sm:$0xff] %vm1025_vm3, %v986_v47  ;;  %v6699_v47 = vld [vmem:[%s7620_s6 + $0xb0] sm:$0xff]  }
 0x1a4   : > { %1504 = vst.msk [vmem:[#allocation2 + $0x159] sm:$0xff] %vm1476_vm4, %v1435_v51  ;;  %v2006_v51 = vld [vmem:[#allocation2 + $0xa8] sm:$0xff] }
 0x1a6   : > { %v1433_v16 = vpop.permute.xlu0 %1432  ;;  %v1439_v46 = vpop.permute.xlu1 %1438 }
 0x1a7   : > { %1503 = vst.msk [vmem:[#allocation2 + $0x151] sm:$0xff] %vm1476_vm4, %v1433_v16  ;;  %1506 = vst.msk [vmem:[#allocation2 + $0x171] sm:$0xff] %vm1476_vm4, %v1439_v46  ;;  %v2007_v16 = vld [vmem:[#allocation2 + $0xb0] sm:$0xff]  ;;  %v6702_v46 = vld [vmem:[%s7620_s6 + $0x1d8] sm:$0xff]  }
 0x1aa   : > { %v1437_v30 = vpop.permute.xlu0 %1436  ;;  %v1918_v23 = vpop.permute.xlu1 %1917 }
 0x1ab   : > { %1505 = vst.msk [vmem:[#allocation2 + $0x169] sm:$0xff] %vm1476_vm4, %v1437_v30  ;;  %v2009_v30 = vld [vmem:[#allocation2 + $0xc8] sm:$0xff] }
 0x1ac   : > { %1987 = vst.msk [vmem:[#allocation2 + $0x159] sm:$0xff] %vm1959_vm5, %v1918_v23  ;;  %v9123_v23 = vpack.c.bf16 %v2007_v16, %v2006_v51  ;;  %v9176_v51 = vpack.c.bf16 %v2544_v55, %v2543_v41 }
 0x1ae   : > { %v1916_v42 = vpop.permute.xlu0 %1915  ;;  %v1922_v24 = vpop.permute.xlu1 %1921 }
 0x1af   : > { %1986 = vst.msk [vmem:[#allocation2 + $0x151] sm:$0xff] %vm1959_vm5, %v1916_v42  ;;  %1989 = vst.msk [vmem:[#allocation2 + $0x171] sm:$0xff] %vm1959_vm5, %v1922_v24  ;;  %v6701_v42 = vld [vmem:[%s7620_s6 + $0xb8] sm:$0xff]  }
 0x1b2   : > { %v1920_v28 = vpop.permute.xlu0 %1919  ;;  %v992_v3 = vpop.permute.xlu1 %991 }
 0x1b3   : > { %1988 = vst.msk [vmem:[#allocation2 + $0x169] sm:$0xff] %vm1959_vm5, %v1920_v28  ;;  %v2085_v11 = vld [vmem:[#allocation2 + $0x159] sm:$0xff] }
 0x1b4   : > { %1057 = vst.msk [vmem:[#allocation2 + $0x189] sm:$0xff] %vm1025_vm3, %v992_v3  ;;  %v3484_v35 = vld [vmem:[#allocation2 + $0x15a] sm:$0xff] }
 0x1b5   : > { %v6703_v28 = vld [vmem:[%s7620_s6 + $0x1e0] sm:$0xff]  }
 0x1b6   : > { %v990_v49 = vpop.permute.xlu0 %989  ;;  %v2084_v21 = vld [vmem:[#allocation2 + $0x151] sm:$0xff]  ;;  %v1443_v8 = vpop.permute.xlu1 %1442  ;;  %v9132_v3 = vld [vmem:[%s7620_s6 + $0xc0] sm:$0xff]  }
 0x1b7   : > { %v3483_v32 = vld [vmem:[#allocation2 + $0x152] sm:$0xff]  ;;  %1056 = vst.msk [vmem:[#allocation2 + $0x181] sm:$0xff] %vm1025_vm3, %v990_v49  ;;  %v9070_v33 = vpack.c.bf16 %v2085_v11, %v2084_v21  ;;  %v6705_v49 = vld [vmem:[%s7620_s6 + $0x1e8] sm:$0xff]  }
 0x1b8   : > { %v9072_v18 = vpack.c.bf16 %v3484_v35, %v3483_v32  ;;  %1508 = vst.msk [vmem:[#allocation2 + $0x189] sm:$0xff] %vm1476_vm4, %v1443_v8  ;;  %v2087_v2 = vld [vmem:[#allocation2 + $0x171] sm:$0xff]  ;;  %v2011_v35 = vld [vmem:[#allocation2 + $0xe0] sm:$0xff] }
 0x1b9   : > { %v3486_v29 = vld [vmem:[#allocation2 + $0x172] sm:$0xff]  ;;  %5934 = vmatprep.mubr.bf16.mxu1 %v9070_v33 }
 0x1ba   : > { %6171 = vmatmul.mubr.bf16.gmra.mrb[24].mxu0 %v9072_v18  ;;  %v1441_v4 = vpop.permute.xlu0 %1440  ;;  %v2086_v48 = vld [vmem:[#allocation2 + $0x169] sm:$0xff]  ;;  %v2010_v11 = vld [vmem:[#allocation2 + $0xd8] sm:$0xff] }
 0x1bb   : > { %v3485_v14 = vld [vmem:[#allocation2 + $0x16a] sm:$0xff]  ;;  %1507 = vst.msk [vmem:[#allocation2 + $0x181] sm:$0xff] %vm1476_vm4, %v1441_v4  ;;  %v9081_v44 = vpack.c.bf16 %v2087_v2, %v2086_v48  ;;  %v2013_v32 = vld [vmem:[#allocation2 + $0xf8] sm:$0xff]  ;;  %v9137_v8 = vpack.c.bf16 %v2011_v35, %v2010_v11  ;;  %v2547_v35 = vld [vmem:[#allocation2 + $0x62] sm:$0xff] }
 0x1bc   : > { %v9083_v27 = vpack.c.bf16 %v3486_v29, %v3485_v14  ;;  %v1926_v31 = vpop.permute.xlu1 %1925  ;;  %v2012_v21 = vld [vmem:[#allocation2 + $0xf0] sm:$0xff]  ;;  %v2014_v29 = vld [vmem:[#allocation2 + $0x108] sm:$0xff]  ;;  %v6708_v48 = vld [vmem:[%s7620_s6 + $0x1f8] sm:$0xff]  }
 0x1bd   : > { %1991 = vst.msk [vmem:[#allocation2 + $0x189] sm:$0xff] %vm1959_vm5, %v1926_v31  ;;  %5935 = vmatmul.mubr.bf16.gmra.mrb[28].mxu1 %v9081_v44  ;;  %v9140_v59 = vpack.c.bf16 %v2013_v32, %v2012_v21  ;;  %v6706_v2 = vld [vmem:[%s7620_s6 + $0x1f0] sm:$0xff]   ;;  %v2016_v14 = vld [vmem:[#allocation2 + $0x120] sm:$0xff]  ;;  %v2022_v20 = vld [vmem:[#allocation2 + $0x168] sm:$0xff] }
 0x1be   : > { %6174 = vmatprep.mubr.bf16.mxu0 %v9083_v27  ;;  %v1924_v57 = vpop.permute.xlu0 %1923  ;;  %5954 = vmatprep.mubr.bf16.mxu1 %v2024_v50  ;;  %v2015_v4 = vld [vmem:[#allocation2 + $0x110] sm:$0xff]  ;;  %v2017_v50 = vld [vmem:[#allocation2 + $0x128] sm:$0xff] }
 0x1bf   : > { %1990 = vst.msk [vmem:[#allocation2 + $0x181] sm:$0xff] %vm1959_vm5, %v1924_v57  ;;  %v9148_v31 = vpack.c.bf16 %v2015_v4, %v2014_v29  ;;  %v9150_v57 = vpack.c.bf16 %v2017_v50, %v2016_v14  ;;  %v2020_v34 = vld [vmem:[#allocation2 + $0x150] sm:$0xff]  ;;  %v4074_v29 = vld [vmem:[#allocation2 + $0x61] sm:$0xff] }
 0x1c0   : > { %v2023_v40 = vld [vmem:[#allocation2 + $0x170] sm:$0xff]  ;;  %v6711_v14 = vld [vmem:[%s7620_s6 + $0xe0] sm:$0xff]  }
 0x1c1   : > { %v9168_v19 = vpack.c.bf16 %v2023_v40, %v2022_v20  ;;  %v2546_v11 = vld [vmem:[#allocation2 + $0x52] sm:$0xff]  ;;  %v4075_v4 = vld [vmem:[#allocation2 + $0x69] sm:$0xff] }
 0x1c2   : > { %v4104_v50 = vpack.c.bf16 %v4075_v4, %v4074_v29  ;;  %v6713_v20 = vld [vmem:[%s7620_s6 + $0xe8] sm:$0xff]   ;;  %v2557_v29 = vld [vmem:[#allocation2 + $0xda] sm:$0xff] }
 0x1c3   : > { %v2558_v4 = vld [vmem:[#allocation2 + $0xe2] sm:$0xff] }
 0x1c4   : > { %v3488_v5 = vld [vmem:[#allocation2 + $0x18a] sm:$0xff] }
 0x1c5   : > { %5955 = vmatmul.mubr.bf16.vlgmr.msra.gmra.mrb[0].mxu1 %v9089_v43 }
 0x1c6   : > { %5987 = vmatpush3.bf16.msra.mxu1 %v8879_v62  ;;  %5958 = vmatprep.mubr.bf16.mxu1 %v9092_v6  ;;  %v3487_v7 = vld [vmem:[#allocation2 + $0x182] sm:$0xff]  ;;  %v6694_v62 = vld [vmem:[%s7620_s6 + $0x98] sm:$0xff]  }
 0x1c7   : > { %v3504_v9 = vpack.c.bf16 %v3488_v5, %v3487_v7  ;;  %5988 = vmatprep.subr.bf16.mxu1 %v6691_v60  ;;  %v9160_v5 = vpack.c.bf16 %v2019_v56, %v2018_v52  ;;  %v2549_v52 = vld [vmem:[#allocation2 + $0x7a] sm:$0xff]  ;;  %v2550_v56 = vld [vmem:[#allocation2 + $0x82] sm:$0xff] }
 0x1c9   : > { %6175 = vmatmul.mubr.bf16.gmra.mrb[28].mxu0 %v3504_v9  ;;  %v2539_v9 = vld [vmem:[#allocation2 + $0x2] sm:$0xff] }
 0x1ca   : > { %6194 = vmatprep.mubr.bf16.mxu0 %v9092_v6  ;;  %5989 = vmatpush3.bf16.msra.mxu1 %v6691_v60  ;;  %v2021_v60 = vld [vmem:[#allocation2 + $0x158] sm:$0xff] }
 0x1cb   : > { %5990 = vmatprep.subr.bf16.mxu1 %v6693_v15  ;;  %v9162_v7 = vpack.c.bf16 %v2021_v60, %v2020_v34  ;;  %v6714_v34 = vld [vmem:[%s7620_s6 + $0x208] sm:$0xff]   ;;  %v2551_v60 = vld [vmem:[#allocation2 + $0x92] sm:$0xff] }
 0x1cd   : > { %5959 = vmatmul.mubr.bf16.gmra.mrb[4].mxu1 %v9099_v12 }
 0x1ce   : > { %5962 = vmatprep.mubr.bf16.mxu1 %v9102_v17  ;;  %5991 = vmatpush3.bf16.msra.mxu1 %v6693_v15  ;;  %v2540_v15 = vld [vmem:[#allocation2 + $0xa] sm:$0xff] }
 0x1cf   : > { %5992 = vmatprep.subr.bf16.mxu1 %v6694_v62  ;;  %v2571_v45 = vpack.c.bf16 %v2540_v15, %v2539_v9  ;;  %v2552_v9 = vld [vmem:[#allocation2 + $0x9a] sm:$0xff]  ;;  %v9191_v15 = vpack.c.bf16 %v2550_v56, %v2549_v52 }
 0x1d0   : > { %v9195_v40 = vpack.c.bf16 %v2552_v9, %v2551_v60  ;;  %v4084_v52 = vld [vmem:[#allocation2 + $0xd9] sm:$0xff]  ;;  %v4085_v56 = vld [vmem:[#allocation2 + $0xe1] sm:$0xff]  ;;  %v4086_v60 = vld [vmem:[#allocation2 + $0xf1] sm:$0xff] }
 0x1d1   : > { %6195 = vmatmul.mubr.bf16.vlgmr.msra.gmra.mrb[0].mxu0 %v9099_v12  ;;  %v4087_v9 = vld [vmem:[#allocation2 + $0xf9] sm:$0xff] }
 0x1d2   : > { %6198 = vmatprep.mubr.bf16.mxu0 %v9102_v17  ;;  %5993 = vmatpush3.bf16.msra.mxu1 %v6694_v62  ;;  %v3792_v62 = vld [vmem:[#allocation2 + $0x180] sm:$0xff] }
 0x1d3   : > { %5994 = vmatprep.subr.bf16.mxu1 %v6695_v54  ;;  %6227 = vmatpush3.bf16.msra.mxu0 %v9026_v22  ;;  %v2008_v22 = vld [vmem:[#allocation2 + $0xc0] sm:$0xff] }
 0x1d4   : > { %6228 = vmatprep.subr.bf16.mxu0 %v6698_v26  ;;  %v9126_v24 = vpack.c.bf16 %v2009_v30, %v2008_v22  ;;  %v4071_v22 = vld [vmem:[#allocation2 + $0x39] sm:$0xff]  ;;  %v6709_v30 = vld [vmem:[%s7620_s6 + $0xd0] sm:$0xff]  }
 0x1d5   : > { %5963 = vmatmul.mubr.bf16.gmra.mrb[8].mxu1 %v9110_v37 }
 0x1d6   : > { %5966 = vmatprep.mubr.bf16.mxu1 %v9114_v1  ;;  %5995 = vmatpush3.bf16.msra.mxu1 %v6695_v54  ;;  %v3793_v54 = vld [vmem:[#allocation2 + $0x188] sm:$0xff] }
 0x1d7   : > { %5996 = vmatprep.subr.bf16.mxu1 %v6697_v63  ;;  %6229 = vmatpush3.bf16.msra.mxu0 %v6698_v26  ;;  %v9171_v53 = vpack.c.bf16 %v3793_v54, %v3792_v62  ;;  %v2542_v26 = vld [vmem:[#allocation2 + $0x22] sm:$0xff]  ;;  %v6716_v54 = vld [vmem:[%s7620_s6 + $0x210] sm:$0xff]  }
 0x1d8   : > { %6230 = vmatprep.subr.bf16.mxu0 %v6700_v0  ;;  %v4077_v62 = vld [vmem:[#allocation2 + $0x81] sm:$0xff] }
 0x1d9   : > { %6199 = vmatmul.mubr.bf16.gmra.mrb[4].mxu0 %v9110_v37 }
 0x1da   : > { %6202 = vmatprep.mubr.bf16.mxu0 %v9114_v1  ;;  %5997 = vmatpush3.bf16.msra.mxu1 %v6697_v63  ;;  %v3794_v63 = vld [vmem:[#allocation2 + $0x198] sm:$0xff] }
 0x1db   : > { %5998 = vmatprep.subr.bf16.mxu1 %v6699_v47  ;;  %6231 = vmatpush3.bf16.msra.mxu0 %v6700_v0  ;;  %v2572_v0 = vpack.c.bf16 %v2542_v26, %v2541_v61  ;;  %v3811_v16 = vpack.c.bf16 %v9077_v25, %v3794_v63  ;;  %v6710_v25 = vld [vmem:[%s7620_s6 + $0xd8] sm:$0xff]   ;;  %v2553_v63 = vld [vmem:[#allocation2 + $0xaa] sm:$0xff] }
 0x1dc   : > { %6232 = vmatprep.subr.bf16.mxu0 %v6702_v46  ;;  %v4078_v61 = vld [vmem:[#allocation2 + $0x91] sm:$0xff]  ;;  %v4079_v26 = vld [vmem:[#allocation2 + $0x99] sm:$0xff] }
 0x1dd   : > { %5967 = vmatmul.mubr.bf16.gmra.mrb[12].mxu1 %v9123_v23  ;;  %v4106_v55 = vpack.c.bf16 %v4079_v26, %v4078_v61  ;;  %v6722_v61 = vld [vmem:[%s7620_s6 + $0x238] sm:$0xff]  }
 0x1de   : > { %5970 = vmatprep.mubr.bf16.mxu1 %v9126_v24  ;;  %5999 = vmatpush3.bf16.msra.mxu1 %v6699_v47  ;;  %v6707_v47 = vld [vmem:[%s7620_s6 + $0xc8] sm:$0xff]  }
 0x1df   : > { %6000 = vmatprep.subr.bf16.mxu1 %v6701_v42  ;;  %6233 = vmatpush3.bf16.msra.mxu0 %v6702_v46  ;;  %v4070_v46 = vld [vmem:[#allocation2 + $0x31] sm:$0xff] }
 0x1e0   : > { %6234 = vmatprep.subr.bf16.mxu0 %v6703_v28 }
 0x1e1   : > { %6203 = vmatmul.mubr.bf16.gmra.mrb[8].mxu0 %v9123_v23 }
 0x1e2   : > { %6206 = vmatprep.mubr.bf16.mxu0 %v9126_v24  ;;  %6001 = vmatpush3.bf16.msra.mxu1 %v6701_v42  ;;  %v4102_v42 = vpack.c.bf16 %v4071_v22, %v4070_v46  ;;  %v2556_v46 = vld [vmem:[#allocation2 + $0xca] sm:$0xff] }
 0x1e3   : > { %6235 = vmatpush3.bf16.msra.mxu0 %v6703_v28  ;;  %6034 = vmatprep.subr.bf16.mxu1 %v9132_v3  ;;  %v2545_v28 = vld [vmem:[#allocation2 + $0x4a] sm:$0xff] }
 0x1e4   : > { %6236 = vmatprep.subr.bf16.mxu0 %v6705_v49  ;;  %v9182_v21 = vpack.c.bf16 %v2546_v11, %v2545_v28  ;;  %v4080_v28 = vld [vmem:[#allocation2 + $0xa9] sm:$0xff]  ;;  %v4081_v11 = vld [vmem:[#allocation2 + $0xb1] sm:$0xff] }
 0x1e5   : > { %5971 = vmatmul.mubr.bf16.gmra.mrb[16].mxu1 %v9137_v8 }
 0x1e6   : > { %5974 = vmatprep.mubr.bf16.mxu1 %v9140_v59 }
 0x1e7   : > { %6237 = vmatpush3.bf16.msra.mxu0 %v6705_v49  ;;  %v2548_v49 = vld [vmem:[#allocation2 + $0x6a] sm:$0xff] }
 0x1e8   : > { %6238 = vmatprep.subr.bf16.mxu0 %v6706_v2  ;;  %v9185_v32 = vpack.c.bf16 %v2548_v49, %v2547_v35  ;;  %v6719_v35 = vld [vmem:[%s7620_s6 + $0x220] sm:$0xff]  }
 0x1e9   : > { %6207 = vmatmul.mubr.bf16.gmra.mrb[12].mxu0 %v9137_v8  ;;  %v4082_v49 = vld [vmem:[#allocation2 + $0xc1] sm:$0xff] }
 0x1ea   : > { %6210 = vmatprep.mubr.bf16.mxu0 %v9140_v59 }
 0x1eb   : > { %6239 = vmatpush3.bf16.msra.mxu0 %v6706_v2  ;;  %v4073_v2 = vld [vmem:[#allocation2 + $0x51] sm:$0xff] }
 0x1ec   : > { %6240 = vmatprep.subr.bf16.mxu0 %v6708_v48 }
 0x1ed   : > { %5975 = vmatmul.mubr.bf16.gmra.mrb[20].mxu1 %v9148_v31 }
 0x1ee   : > { %5978 = vmatprep.mubr.bf16.mxu1 %v9150_v57 }
 0x1ef   : > { %6241 = vmatpush3.bf16.msra.mxu0 %v6708_v48 }
 0x1f0   : > { %6274 = vmatprep.subr.bf16.mxu0 %v9153_v58 }
 0x1f1   : > { %6211 = vmatmul.mubr.bf16.gmra.mrb[16].mxu0 %v9148_v31 }
 0x1f2   : > { %6214 = vmatprep.mubr.bf16.mxu0 %v9150_v57 }
 0x1f5   : > { %5979 = vmatmul.mubr.bf16.gmra.mrb[24].mxu1 %v9160_v5 }
 0x1f6   : > { %5982 = vmatprep.mubr.bf16.mxu1 %v9162_v7 }
 0x1f9   : > { %6215 = vmatmul.mubr.bf16.gmra.mrb[20].mxu0 %v9160_v5 }
 0x1fa   : > { %6218 = vmatprep.mubr.bf16.mxu0 %v9162_v7 }
 0x1fd   : > { %5983 = vmatmul.mubr.bf16.gmra.mrb[28].mxu1 %v9168_v19 }
 0x1fe   : > { %6002 = vmatprep.mubr.bf16.mxu1 %v2571_v45  ;;  %v4076_v45 = vld [vmem:[#allocation2 + $0x79] sm:$0xff] }
 0x1ff   : > { %v4105_v41 = vpack.c.bf16 %v4077_v62, %v4076_v45  ;;  %v9219_v45 = vpack.c.bf16 %v4087_v9, %v4086_v60  ;;  %v2561_v62 = vld [vmem:[#allocation2 + $0x10a] sm:$0xff] }
 0x201   : > { %6219 = vmatmul.mubr.bf16.gmra.mrb[24].mxu0 %v9168_v19 }
 0x202   : > { %6222 = vmatprep.mubr.bf16.mxu0 %v9171_v53 }
 0x205   : > { %6003 = vmatmul.mubr.bf16.vlgmr.msra.gmra.mrb[0].mxu1 %v2572_v0  ;;  %v2554_v0 = vld [vmem:[#allocation2 + $0xb2] sm:$0xff] }
 0x206   : > { %6035 = vmatpush3.bf16.msra.mxu1 %v9132_v3  ;;  %6006 = vmatprep.mubr.bf16.mxu1 %v9176_v51  ;;  %v4072_v3 = vld [vmem:[#allocation2 + $0x49] sm:$0xff]  ;;  %v9202_v22 = vpack.c.bf16 %v2554_v0, %v2553_v63 }
 0x207   : > { %6036 = vmatprep.subr.bf16.mxu1 %v6707_v47  ;;  %v4103_v48 = vpack.c.bf16 %v4073_v2, %v4072_v3  ;;  %v4107_v3 = vpack.c.bf16 %v4081_v11, %v4080_v28  ;;  %v4405_v0 = vld [vmem:[#allocation2 + $0x18a] sm:$0xff] }
 0x209   : > { %6223 = vmatmul.mubr.bf16.gmra.mrb[28].mxu0 %v3811_v16  ;;  %v2555_v16 = vld [vmem:[#allocation2 + $0xc2] sm:$0xff] }
 0x20a   : > { %6242 = vmatprep.mubr.bf16.mxu0 %v4102_v42  ;;  %6037 = vmatpush3.bf16.msra.mxu1 %v6707_v47  ;;  %v6718_v47 = vld [vmem:[%s7620_s6 + $0x218] sm:$0xff]   ;;  %v9205_v42 = vpack.c.bf16 %v2556_v46, %v2555_v16  ;;  %v4407_v46 = vld [vmem:[#allocation2 + $0x1a2] sm:$0xff] }
 0x20b   : > { %6038 = vmatprep.subr.bf16.mxu1 %v6709_v30 }
 0x20d   : > { %6007 = vmatmul.mubr.bf16.gmra.mrb[4].mxu1 %v9182_v21 }
 0x20e   : > { %6010 = vmatprep.mubr.bf16.mxu1 %v9185_v32  ;;  %6039 = vmatpush3.bf16.msra.mxu1 %v6709_v30  ;;  %v6717_v30 = vld [vmem:[%s7620_s6 + $0xf8] sm:$0xff]  }
 0x20f   : > { %6040 = vmatprep.subr.bf16.mxu1 %v6710_v25 }
 0x211   : > { %6243 = vmatmul.mubr.bf16.vlgmr.msra.gmra.mrb[0].mxu0 %v4103_v48  ;;  %v6720_v48 = vld [vmem:[%s7620_s6 + $0x228] sm:$0xff]  }
 0x212   : > { %6246 = vmatprep.mubr.bf16.mxu0 %v4104_v50  ;;  %6041 = vmatpush3.bf16.msra.mxu1 %v6710_v25  ;;  %v4083_v25 = vld [vmem:[#allocation2 + $0xc9] sm:$0xff]  ;;  %v7462_v50 = vld [vmem:[%s7620_s6 + $0x100] sm:$0xff]  }
 0x213   : > { %6042 = vmatprep.subr.bf16.mxu1 %v6711_v14  ;;  %6275 = vmatpush3.bf16.msra.mxu0 %v9153_v58  ;;  %v6715_v58 = vld [vmem:[%s7620_s6 + $0xf0] sm:$0xff]   ;;  %v4108_v2 = vpack.c.bf16 %v4083_v25, %v4082_v49  ;;  %v3178_v49 = vld [vmem:[#allocation2 + $0x159] sm:$0xff] }
 0x214   : > { %6276 = vmatprep.subr.bf16.mxu0 %v6714_v34  ;;  %v3179_v25 = vld [vmem:[#allocation2 + $0x169] sm:$0xff] }
 0x215   : > { %6011 = vmatmul.mubr.bf16.gmra.mrb[8].mxu1 %v9191_v15 }
 0x216   : > { %6014 = vmatprep.mubr.bf16.mxu1 %v9195_v40  ;;  %6043 = vmatpush3.bf16.msra.mxu1 %v6711_v14  ;;  %v9211_v14 = vpack.c.bf16 %v2558_v4, %v2557_v29 }
 0x217   : > { %6044 = vmatprep.subr.bf16.mxu1 %v6713_v20  ;;  %6277 = vmatpush3.bf16.msra.mxu0 %v6714_v34  ;;  %v6721_v34 = vld [vmem:[%s7620_s6 + $0x230] sm:$0xff]  }
 0x218   : > { %6278 = vmatprep.subr.bf16.mxu0 %v6716_v54 }
 0x219   : > { %6247 = vmatmul.mubr.bf16.gmra.mrb[4].mxu0 %v4105_v41  ;;  %v4088_v41 = vld [vmem:[#allocation2 + $0x109] sm:$0xff] }
 0x21a   : > { %6250 = vmatprep.mubr.bf16.mxu0 %v4106_v55  ;;  %6045 = vmatpush3.bf16.msra.mxu1 %v6713_v20  ;;  %v9217_v20 = vpack.c.bf16 %v4085_v56, %v4084_v52  ;;  %v4098_v55 = vld [vmem:[#allocation2 + $0x181] sm:$0xff] }
 0x21b   : > { %6046 = vmatprep.subr.bf16.mxu1 %v6715_v58  ;;  %6279 = vmatpush3.bf16.msra.mxu0 %v6716_v54  ;;  %v2562_v54 = vld [vmem:[#allocation2 + $0x112] sm:$0xff] }
 0x21c   : > { %6280 = vmatprep.subr.bf16.mxu0 %v6718_v47  ;;  %v9224_v26 = vpack.c.bf16 %v2562_v54, %v2561_v62 }
 0x21d   : > { %6015 = vmatmul.mubr.bf16.gmra.mrb[12].mxu1 %v9202_v22 }
 0x21e   : > { %6018 = vmatprep.mubr.bf16.mxu1 %v9205_v42  ;;  %6047 = vmatpush3.bf16.msra.mxu1 %v6715_v58  ;;  %v4089_v58 = vld [vmem:[#allocation2 + $0x111] sm:$0xff] }
 0x21f   : > { %6048 = vmatprep.subr.bf16.mxu1 %v6717_v30  ;;  %6281 = vmatpush3.bf16.msra.mxu0 %v6718_v47 }
 0x220   : > { %6282 = vmatprep.subr.bf16.mxu0 %v6719_v35 }
 0x221   : > { %6251 = vmatmul.mubr.bf16.gmra.mrb[8].mxu0 %v4107_v3  ;;  %v3180_v3 = vld [vmem:[#allocation2 + $0x171] sm:$0xff] }
 0x222   : > { %6254 = vmatprep.mubr.bf16.mxu0 %v4108_v2  ;;  %6049 = vmatpush3.bf16.msra.mxu1 %v6717_v30  ;;  %v3174_v30 = vld [vmem:[#allocation2 + $0x129] sm:$0xff]  ;;  %v3197_v29 = vpack.c.bf16 %v3180_v3, %v3179_v25 }
 0x223   : > { %6283 = vmatpush3.bf16.msra.mxu0 %v6719_v35  ;;  %6322 = vmatprep.subr.bf16.mxu1 %v7462_v50  ;;  %v3177_v35 = vld [vmem:[#allocation2 + $0x151] sm:$0xff] }
 0x224   : > { %6284 = vmatprep.subr.bf16.mxu0 %v6720_v48  ;;  %v3196_v2 = vpack.c.bf16 %v3178_v49, %v3177_v35 }
 0x225   : > { %6019 = vmatmul.mubr.bf16.gmra.mrb[16].mxu1 %v9211_v14 }
 0x226   : > { %6022 = vmatprep.mubr.bf16.mxu1 %v9028_v13  ;;  %v9228_v13 = vpack.c.bf16 %v4089_v58, %v4088_v41 }
 0x227   : > { %6285 = vmatpush3.bf16.msra.mxu0 %v6720_v48 }
 0x228   : > { %6286 = vmatprep.subr.bf16.mxu0 %v6721_v34 }
 0x229   : > { %6255 = vmatmul.mubr.bf16.gmra.mrb[12].mxu0 %v9217_v20 }
 0x22a   : > { %6258 = vmatprep.mubr.bf16.mxu0 %v9219_v45 }
 0x22b   : > { %6287 = vmatpush3.bf16.msra.mxu0 %v6721_v34 }
 0x22c   : > { %6288 = vmatprep.subr.bf16.mxu0 %v6722_v61 }
 0x22d   : > { %6023 = vmatmul.mubr.bf16.gmra.mrb[20].mxu1 %v9224_v26 }
 0x22e   : > { %6026 = vmatprep.mubr.bf16.mxu1 %v9047_v10  ;;  %v4099_v10 = vld [vmem:[#allocation2 + $0x189] sm:$0xff] }
 0x22f   : > { %6289 = vmatpush3.bf16.msra.mxu0 %v6722_v61  ;;  %v9238_v63 = vpack.c.bf16 %v4099_v10, %v4098_v55 }
 0x231   : > { %6259 = vmatmul.mubr.bf16.gmra.mrb[16].mxu0 %v9228_v13 }
 0x232   : > { %6262 = vmatprep.mubr.bf16.mxu0 %v9045_v39  ;;  %v4100_v39 = vld [vmem:[#allocation2 + $0x199] sm:$0xff] }
 0x235   : > { %6027 = vmatmul.mubr.bf16.gmra.mrb[24].mxu1 %v9053_v36  ;;  %v4101_v36 = vld [vmem:[#allocation2 + $0x1a1] sm:$0xff] }
 0x236   : > { %6030 = vmatprep.mubr.bf16.mxu1 %v9072_v18  ;;  %v7464_v18 = vld [vmem:[%s7620_s6 + $0x110] sm:$0xff]  }
 0x239   : > { %6263 = vmatmul.mubr.bf16.gmra.mrb[20].mxu0 %v9051_v38  ;;  %v4117_v38 = vpack.c.bf16 %v4101_v36, %v4100_v39 }
 0x23a   : > { %6266 = vmatprep.mubr.bf16.mxu0 %v9070_v33  ;;  %v7463_v33 = vld [vmem:[%s7620_s6 + $0x108] sm:$0xff]  }
 0x23d   : > { %6031 = vmatmul.mubr.bf16.gmra.mrb[28].mxu1 %v9083_v27  ;;  %v7466_v27 = vld [vmem:[%s7620_s6 + $0x120] sm:$0xff]  }
 0x23e   : > { %6050 = vmatprep.mubr.bf16.mxu1 %v9089_v43  ;;  %v7467_v43 = vld [vmem:[%s7620_s6 + $0x128] sm:$0xff]  }
 0x241   : > { %6267 = vmatmul.mubr.bf16.gmra.mrb[24].mxu0 %v9081_v44  ;;  %v7465_v44 = vld [vmem:[%s7620_s6 + $0x118] sm:$0xff]  }
 0x242   : > { %6270 = vmatprep.mubr.bf16.mxu0 %v9238_v63 }
 0x245   : > { %6051 = vmatmul.mubr.bf16.vlgmr.msra.gmra.mrb[0].mxu1 %v9092_v6  ;;  %v7468_v6 = vld [vmem:[%s7620_s6 + $0x130] sm:$0xff]  }
 0x246   : > { %6330 = vmatpush3.bf16.msra.mxu1 %v7462_v50  ;;  %6054 = vmatprep.mubr.bf16.mxu1 %v9099_v12  ;;  %v7469_v12 = vld [vmem:[%s7620_s6 + $0x138] sm:$0xff]  }
 0x247   : > { %6323 = vmatprep.subr.bf16.mxu1 %v7463_v33 }
 0x249   : > { %6271 = vmatmul.mubr.bf16.gmra.mrb[28].mxu0 %v4117_v38 }
 0x24a   : > { %6290 = vmatprep.mubr.bf16.mxu0 %v9176_v51  ;;  %6331 = vmatpush3.bf16.msra.mxu1 %v7463_v33  ;;  %v4398_v51 = vld [vmem:[#allocation2 + $0x13a] sm:$0xff] }
 0x24b   : > { %6324 = vmatprep.subr.bf16.mxu1 %v7464_v18 }
 0x24d   : > { %6055 = vmatmul.mubr.bf16.gmra.mrb[4].mxu1 %v9102_v17  ;;  %v4392_v17 = vld [vmem:[#allocation2 + $0xf2] sm:$0xff] }
 0x24e   : > { %6058 = vmatprep.mubr.bf16.mxu1 %v9110_v37  ;;  %6332 = vmatpush3.bf16.msra.mxu1 %v7464_v18  ;;  %v4393_v37 = vld [vmem:[#allocation2 + $0xfa] sm:$0xff] }
 0x24f   : > { %6325 = vmatprep.subr.bf16.mxu1 %v7465_v44 }
 0x251   : > { %6291 = vmatmul.mubr.bf16.vlgmr.msra.gmra.mrb[0].mxu0 %v9182_v21  ;;  %v4400_v21 = vld [vmem:[#allocation2 + $0x152] sm:$0xff] }
 0x252   : > { %6294 = vmatprep.mubr.bf16.mxu0 %v9185_v32  ;;  %6333 = vmatpush3.bf16.msra.mxu1 %v7465_v44 }
 0x253   : > { %6326 = vmatprep.subr.bf16.mxu1 %v7466_v27 }
 0x255   : > { %6059 = vmatmul.mubr.bf16.gmra.mrb[8].mxu1 %v9114_v1  ;;  %v4416_v1 = vpack.c.bf16 %v4393_v37, %v4392_v17 }
 0x256   : > { %6062 = vmatprep.mubr.bf16.mxu1 %v9123_v23  ;;  %6334 = vmatpush3.bf16.msra.mxu1 %v7466_v27  ;;  %v4396_v23 = vld [vmem:[#allocation2 + $0x122] sm:$0xff] }
 0x257   : > { %6327 = vmatprep.subr.bf16.mxu1 %v7467_v43 }
 0x259   : > { %6295 = vmatmul.mubr.bf16.gmra.mrb[4].mxu0 %v9191_v15 }
 0x25a   : > { %6298 = vmatprep.mubr.bf16.mxu0 %v9195_v40  ;;  %6335 = vmatpush3.bf16.msra.mxu1 %v7467_v43  ;;  %v4403_v40 = vld [vmem:[#allocation2 + $0x172] sm:$0xff] }
 0x25b   : > { %6328 = vmatprep.subr.bf16.mxu1 %v7468_v6 }
 0x25d   : > { %6063 = vmatmul.mubr.bf16.gmra.mrb[12].mxu1 %v9126_v24  ;;  %v4397_v24 = vld [vmem:[#allocation2 + $0x12a] sm:$0xff] }
 0x25e   : > { %6066 = vmatprep.mubr.bf16.mxu1 %v9137_v8  ;;  %6336 = vmatpush3.bf16.msra.mxu1 %v7468_v6  ;;  %v4418_v8 = vpack.c.bf16 %v4397_v24, %v4396_v23 }
 0x25f   : > { %6329 = vmatprep.subr.bf16.mxu1 %v7469_v12 }
 0x261   : > { %6299 = vmatmul.mubr.bf16.gmra.mrb[8].mxu0 %v9202_v22  ;;  %v3173_v22 = vld [vmem:[#allocation2 + $0x121] sm:$0xff] }
 0x262   : > { %6302 = vmatprep.mubr.bf16.mxu0 %v9205_v42  ;;  %6337 = vmatpush3.bf16.msra.mxu1 %v7469_v12  ;;  %v3175_v42 = vld [vmem:[#allocation2 + $0x139] sm:$0xff]  ;;  %v3194_v28 = vpack.c.bf16 %v3174_v30, %v3173_v22 }
 0x265   : > { %6067 = vmatmul.mubr.bf16.gmra.mrb[16].mxu1 %v9140_v59  ;;  %v4399_v59 = vld [vmem:[#allocation2 + $0x142] sm:$0xff] }
 0x266   : > { %6070 = vmatprep.mubr.bf16.mxu1 %v9148_v31  ;;  %v4401_v31 = vld [vmem:[#allocation2 + $0x15a] sm:$0xff]  ;;  %v4419_v32 = vpack.c.bf16 %v4399_v59, %v4398_v51 }
 0x267   : > { %v4420_v15 = vpack.c.bf16 %v4401_v31, %v4400_v21 }
 0x269   : > { %6303 = vmatmul.mubr.bf16.gmra.mrb[12].mxu0 %v9211_v14 }
 0x26a   : > { %6306 = vmatprep.mubr.bf16.mxu0 %v4416_v1 }
 0x26d   : > { %6071 = vmatmul.mubr.bf16.gmra.mrb[20].mxu1 %v9150_v57  ;;  %v4402_v57 = vld [vmem:[#allocation2 + $0x16a] sm:$0xff] }
 0x26e   : > { %6074 = vmatprep.mubr.bf16.mxu1 %v9160_v5  ;;  %v4404_v5 = vld [vmem:[#allocation2 + $0x182] sm:$0xff]  ;;  %v4421_v47 = vpack.c.bf16 %v4403_v40, %v4402_v57 }
 0x26f   : > { %v4422_v16 = vpack.c.bf16 %v4405_v0, %v4404_v5 }
 0x271   : > { %6307 = vmatmul.mubr.bf16.gmra.mrb[16].mxu0 %v9224_v26 }
 0x272   : > { %6310 = vmatprep.mubr.bf16.mxu0 %v4418_v8 }
 0x275   : > { %6075 = vmatmul.mubr.bf16.gmra.mrb[24].mxu1 %v9162_v7  ;;  %v4406_v7 = vld [vmem:[#allocation2 + $0x19a] sm:$0xff] }
 0x276   : > { %6078 = vmatprep.mubr.bf16.mxu1 %v9168_v19  ;;  %v4423_v19 = vpack.c.bf16 %v4407_v46, %v4406_v7 }
 0x279   : > { %6311 = vmatmul.mubr.bf16.gmra.mrb[20].mxu0 %v4419_v32 }
 0x27a   : > { %6314 = vmatprep.mubr.bf16.mxu0 %v4420_v15 }
 0x27d   : > { %6079 = vmatmul.mubr.bf16.gmra.mrb[28].mxu1 %v9171_v53  ;;  %v3176_v53 = vld [vmem:[#allocation2 + $0x141] sm:$0xff] }
 0x27e   : > { %6114 = vmatprep.mubr.bf16.mxu1 %v9217_v20  ;;  %v3195_v11 = vpack.c.bf16 %v3176_v53, %v3175_v42 }
 0x281   : > { %6315 = vmatmul.mubr.bf16.gmra.mrb[24].mxu0 %v4421_v47 }
 0x282   : > { %6318 = vmatprep.mubr.bf16.mxu0 %v4422_v16 }
 0x285   : > { %6115 = vmatmul.mubr.bf16.vlgmr.msra.gmra.mrb[16].mxu1 %v9219_v45 }
 0x286   : > { %6118 = vmatprep.mubr.bf16.mxu1 %v9228_v13 }
 0x289   : > { %6319 = vmatmul.mubr.bf16.gmra.mrb[28].mxu0 %v4423_v19 }
 0x28d   : > { %6119 = vmatmul.mubr.bf16.gmra.mrb[20].mxu1 %v3194_v28 }
 0x28e   : > { %6122 = vmatprep.mubr.bf16.mxu1 %v3195_v11 }
 0x295   : > { %6123 = vmatmul.mubr.bf16.gmra.mrb[24].mxu1 %v3196_v2 }
 0x296   : > { %6126 = vmatprep.mubr.bf16.mxu1 %v3197_v29 }
 0x29d   : > { %6127 = vmatmul.mubr.bf16.gmra.mrb[28].mxu1 %v9238_v63 }
 0x318   : > { %v6052_v4 = vpop.f32.mrb[0].mxu1 }
 0x319   : > { %v2992_v48 = vpop.f32.mrb[1].mxu1 }
 0x31a   : > { %v6053_v14 = vpop.f32.mrb[2].mxu1 }
 0x31b   : > { %v2995_v50 = vpop.f32.mrb[3].mxu1 }
 0x320   : > { %v6056_v52 = vpop.f32.mrb[4].mxu1 }
 0x321   : > { %v3008_v56 = vpop.f32.mrb[5].mxu1 }
 0x322   : > { %v6057_v34 = vpop.f32.mrb[6].mxu1 }
 0x323   : > { %v3011_v60 = vpop.f32.mrb[7].mxu1 }
 0x324   : > { %v6292_v9 = vpop.f32.mrb[0].mxu0 }
 0x325   : > { %v9277_v20 = vadd.f32 %v6292_v9, %v6052_v4  ;;  %v4523_v45 = vpop.f32.mrb[1].mxu0 }
 0x326   : > { %v9279_v62 = vadd.f32 %v4523_v45, %v2992_v48  ;;  %v6293_v54 = vpop.f32.mrb[2].mxu0 }
 0x327   : > { %v9281_v61 = vadd.f32 %v6293_v54, %v6053_v14  ;;  %v4526_v26 = vpop.f32.mrb[3].mxu0  ;;  %v4686_v38 = vsel %vm4682_vm6, %v9277_v20, 0.0 }
 0x328   : > { %v9283_v41 = vadd.f32 %v4526_v26, %v2995_v50  ;;  %v6060_v58 = vpop.f32.mrb[8].mxu1  ;;  %v4683_v55 = vsel %vm4682_vm6, %v9279_v62, 0.0 }
 0x329   : > { %v3024_v13 = vpop.f32.mrb[9].mxu1  ;;  %v4688_v43 = vsel %vm4682_vm6, %v9281_v61, 0.0 }
 0x32a   : > { %v4684_v10 = vsel %vm4682_vm6, %v9283_v41, 0.0  ;;  %v6061_v63 = vpop.f32.mrb[10].mxu1 }
 0x32b   : > { %v4685_v39 = vadd.f32 %v4684_v10, %v4683_v55  ;;  %v3027_v36 = vpop.f32.mrb[11].mxu1 }
 0x32c   : > { %v6296_v33 = vpop.f32.mrb[4].mxu0 }
 0x32d   : > { %v4687_v18 = vadd.f32 %v4686_v38, %v4685_v39  ;;  %v9291_v44 = vadd.f32 %v6296_v33, %v6056_v52  ;;  %v4539_v27 = vpop.f32.mrb[5].mxu0 }
 0x32e   : > { %v9295_v6 = vadd.f32 %v4539_v27, %v3008_v56  ;;  %v6297_v12 = vpop.f32.mrb[6].mxu0 }
 0x32f   : > { %v4689_v17 = vadd.f32 %v4688_v43, %v4687_v18  ;;  %v9297_v37 = vadd.f32 %v6297_v12, %v6057_v34  ;;  %v4542_v1 = vpop.f32.mrb[7].mxu0  ;;  %v4694_v0 = vsel %vm4682_vm6, %v9291_v44, 0.0 }
 0x330   : > { %v4690_v23 = vsel %vm4682_vm6, %v9295_v6, 0.0  ;;  %v9301_v24 = vadd.f32 %v4542_v1, %v3011_v60  ;;  %v6064_v8 = vpop.f32.mrb[12].mxu1 }
 0x331   : > { %v4691_v51 = vadd.f32 %v4690_v23, %v4689_v17  ;;  %v3040_v59 = vpop.f32.mrb[13].mxu1  ;;  %v4696_v30 = vsel %vm4682_vm6, %v9297_v37, 0.0 }
 0x332   : > { %v4692_v21 = vsel %vm4682_vm6, %v9301_v24, 0.0  ;;  %v6065_v31 = vpop.f32.mrb[14].mxu1 }
 0x333   : > { %v4693_v32 = vadd.f32 %v4692_v21, %v4691_v51  ;;  %v3043_v15 = vpop.f32.mrb[15].mxu1 }
 0x334   : > { %v6300_v57 = vpop.f32.mrb[8].mxu0 }
 0x335   : > { %v9305_v40 = vadd.f32 %v6300_v57, %v6060_v58  ;;  %v4555_v5 = vpop.f32.mrb[9].mxu0  ;;  %v4695_v7 = vadd.f32 %v4694_v0, %v4693_v32 }
 0x336   : > { %v9309_v47 = vadd.f32 %v4555_v5, %v3024_v13  ;;  %v6301_v16 = vpop.f32.mrb[10].mxu0 }
 0x337   : > { %v9311_v46 = vadd.f32 %v6301_v16, %v6061_v63  ;;  %v4558_v19 = vpop.f32.mrb[11].mxu0  ;;  %v4697_v42 = vadd.f32 %v4696_v30, %v4695_v7  ;;  %v4702_v56 = vsel %vm4682_vm6, %v9305_v40, 0.0 }
 0x338   : > { %v9313_v22 = vadd.f32 %v4558_v19, %v3027_v36  ;;  %v4698_v53 = vsel %vm4682_vm6, %v9309_v47, 0.0 }
 0x339   : > { %v4699_v3 = vadd.f32 %v4698_v53, %v4697_v42  ;;  %v4704_v45 = vsel %vm4682_vm6, %v9311_v46, 0.0 }
 0x33a   : > { %v4700_v4 = vsel %vm4682_vm6, %v9313_v22, 0.0 }
 0x33b   : > { %v4701_v14 = vadd.f32 %v4700_v4, %v4699_v3 }
 0x33c   : > { %v6304_v28 = vpop.f32.mrb[12].mxu0 }
 0x33d   : > { %v9319_v11 = vadd.f32 %v6304_v28, %v6064_v8  ;;  %v4571_v35 = vpop.f32.mrb[13].mxu0  ;;  %v4703_v60 = vadd.f32 %v4702_v56, %v4701_v14 }
 0x33e   : > { %v9321_v49 = vadd.f32 %v4571_v35, %v3040_v59  ;;  %v6305_v25 = vpop.f32.mrb[14].mxu0 }
 0x33f   : > { %v9323_v2 = vadd.f32 %v6305_v25, %v6065_v31  ;;  %v4574_v29 = vpop.f32.mrb[15].mxu0  ;;  %v4705_v54 = vadd.f32 %v4704_v45, %v4703_v60  ;;  %v4710_v18 = vsel %vm4682_vm6, %v9319_v11, 0.0 }
 0x340   : > { %v9327_v48 = vadd.f32 %v4574_v29, %v3043_v15  ;;  %v4706_v26 = vsel %vm4682_vm6, %v9321_v49, 0.0 }
 0x341   : > { %v4707_v10 = vadd.f32 %v4706_v26, %v4705_v54  ;;  %v4712_v8 = vsel %vm4682_vm6, %v9323_v2, 0.0 }
 0x342   : > { %v4708_v39 = vsel %vm4682_vm6, %v9327_v48, 0.0 }
 0x343   : > { %v4709_v36 = vadd.f32 %v4708_v39, %v4707_v10 }
 0x344   : > { %v6308_v50 = vpop.f32.mrb[16].mxu0 }
 0x345   : > { %v4587_v52 = vpop.f32.mrb[17].mxu0  ;;  %v4711_v43 = vadd.f32 %v4710_v18, %v4709_v36 }
 0x346   : > { %v6309_v34 = vpop.f32.mrb[18].mxu0 }
 0x347   : > { %v4590_v9 = vpop.f32.mrb[19].mxu0  ;;  %v4713_v21 = vadd.f32 %v4712_v8, %v4711_v43 }
 0x34c   : > { %v6312_v58 = vpop.f32.mrb[20].mxu0 }
 0x34d   : > { %v4603_v13 = vpop.f32.mrb[21].mxu0 }
 0x34e   : > { %v6313_v55 = vpop.f32.mrb[22].mxu0 }
 0x34f   : > { %v4606_v63 = vpop.f32.mrb[23].mxu0 }
 0x354   : > { %v6316_v38 = vpop.f32.mrb[24].mxu0 }
 0x355   : > { %v4619_v33 = vpop.f32.mrb[25].mxu0 }
 0x356   : > { %v6317_v27 = vpop.f32.mrb[26].mxu0 }
 0x357   : > { %v4622_v12 = vpop.f32.mrb[27].mxu0 }
 0x358   : > { %v6116_v17 = vpop.f32.mrb[16].mxu1 }
 0x359   : > { %v9339_v1 = vadd.f32 %v6308_v50, %v6116_v17  ;;  %v3362_v23 = vpop.f32.mrb[17].mxu1 }
 0x35a   : > { %v9343_v51 = vadd.f32 %v4587_v52, %v3362_v23  ;;  %v6117_v59 = vpop.f32.mrb[18].mxu1 }
 0x35b   : > { %v9345_v31 = vadd.f32 %v6309_v34, %v6117_v59  ;;  %v3365_v32 = vpop.f32.mrb[19].mxu1  ;;  %v4718_v53 = vsel %vm4682_vm6, %v9339_v1, 0.0 }
 0x35c   : > { %v4714_v15 = vsel %vm4682_vm6, %v9343_v51, 0.0  ;;  %v9349_v57 = vadd.f32 %v4590_v9, %v3365_v32  ;;  %v6320_v5 = vpop.f32.mrb[28].mxu0 }
 0x35d   : > { %v4715_v0 = vadd.f32 %v4714_v15, %v4713_v21  ;;  %v4635_v16 = vpop.f32.mrb[29].mxu0  ;;  %v4720_v29 = vsel %vm4682_vm6, %v9345_v31, 0.0 }
 0x35e   : > { %v4716_v7 = vsel %vm4682_vm6, %v9349_v57, 0.0  ;;  %v6321_v19 = vpop.f32.mrb[30].mxu0 }
 0x35f   : > { %v4717_v30 = vadd.f32 %v4716_v7, %v4715_v0  ;;  %v4638_v42 = vpop.f32.mrb[31].mxu0 }
 0x360   : > { %v6120_v28 = vpop.f32.mrb[20].mxu1 }
 0x361   : > { %v4719_v35 = vadd.f32 %v4718_v53, %v4717_v30  ;;  %v6358_v25 = vadd.f32 %v6312_v58, %v6120_v28  ;;  %v3378_v3 = vpop.f32.mrb[21].mxu1 }
 0x362   : > { %v6359_v4 = vadd.f32 %v4603_v13, %v3378_v3  ;;  %v6121_v14 = vpop.f32.mrb[22].mxu1 }
 0x363   : > { %v4721_v50 = vadd.f32 %v4720_v29, %v4719_v35  ;;  %v6360_v52 = vadd.f32 %v6313_v55, %v6121_v14  ;;  %v3381_v56 = vpop.f32.mrb[23].mxu1  ;;  %v4726_v26 = vsel %vm4682_vm6, %v6358_v25, 0.0 }
 0x364   : > { %v4722_v34 = vsel %vm4682_vm6, %v6359_v4, 0.0  ;;  %v6361_v60 = vadd.f32 %v4606_v63, %v3381_v56 }
 0x365   : > { %v4723_v9 = vadd.f32 %v4722_v34, %v4721_v50  ;;  %v4728_v18 = vsel %vm4682_vm6, %v6360_v52, 0.0 }
 0x366   : > { %v4724_v45 = vsel %vm4682_vm6, %v6361_v60, 0.0 }
 0x367   : > { %v4725_v54 = vadd.f32 %v4724_v45, %v4723_v9 }
 0x368   : > { %v6124_v10 = vpop.f32.mrb[24].mxu1 }
 0x369   : > { %v4727_v58 = vadd.f32 %v4726_v26, %v4725_v54  ;;  %v6362_v39 = vadd.f32 %v6316_v38, %v6124_v10  ;;  %v3394_v36 = vpop.f32.mrb[25].mxu1 }
 0x36a   : > { %v6363_v13 = vadd.f32 %v4619_v33, %v3394_v36  ;;  %v6125_v43 = vpop.f32.mrb[26].mxu1 }
 0x36b   : > { %v4729_v17 = vadd.f32 %v4728_v18, %v4727_v58  ;;  %v6364_v55 = vadd.f32 %v6317_v27, %v6125_v43  ;;  %v3397_v23 = vpop.f32.mrb[27].mxu1  ;;  %v4734_v15 = vsel %vm4682_vm6, %v6362_v39, 0.0 }
 0x36c   : > { %v4730_v8 = vsel %vm4682_vm6, %v6363_v13, 0.0  ;;  %v6365_v63 = vadd.f32 %v4622_v12, %v3397_v23 }
 0x36d   : > { %v4731_v59 = vadd.f32 %v4730_v8, %v4729_v17  ;;  %v4736_v53 = vsel %vm4682_vm6, %v6364_v55, 0.0 }
 0x36e   : > { %v4732_v21 = vsel %vm4682_vm6, %v6365_v63, 0.0 }
 0x36f   : > { %v4733_v32 = vadd.f32 %v4732_v21, %v4731_v59 }
 0x370   : > { %v6128_v0 = vpop.f32.mrb[28].mxu1 }
 0x371   : > { %v4735_v7 = vadd.f32 %v4734_v15, %v4733_v32  ;;  %v6366_v38 = vadd.f32 %v6320_v5, %v6128_v0  ;;  %v3410_v30 = vpop.f32.mrb[29].mxu1 }
 0x372   : > { %v6367_v33 = vadd.f32 %v4635_v16, %v3410_v30  ;;  %v6129_v28 = vpop.f32.mrb[30].mxu1 }
 0x373   : > { %v4737_v35 = vadd.f32 %v4736_v53, %v4735_v7  ;;  %v6368_v27 = vadd.f32 %v6321_v19, %v6129_v28  ;;  %v3413_v3 = vpop.f32.mrb[31].mxu1  ;;  %v4742_v34 = vsel %vm4682_vm6, %v6366_v38, 0.0 }
 0x374   : > { %v4738_v29 = vsel %vm4682_vm6, %v6367_v33, 0.0  ;;  %v6369_v12 = vadd.f32 %v4638_v42, %v3413_v3 }
 0x375   : > { %v4739_v14 = vadd.f32 %v4738_v29, %v4737_v35  ;;  %v4744_v5 = vsel %vm4682_vm6, %v6368_v27, 0.0 }
 0x376   : > { %v4740_v50 = vsel %vm4682_vm6, %v6369_v12, 0.0 }
 0x377   : > { %v4741_v56 = vadd.f32 %v4740_v50, %v4739_v14 }
 0x379   : > { %v4743_v9 = vadd.f32 %v4742_v34, %v4741_v56 }
 0x37b   : > { %v4745_v45 = vadd.f32 %v4744_v5, %v4743_v9 }
 0x37d   : > { %v4746_v54 = vrot.slane %v4745_v45, 4 }
 0x37f   : > { %v4747_v26 = vadd.f32 %v4746_v54, %v4745_v45 }
 0x381   : > { %v4748_v16 = vrot.slane %v4747_v26, 2 }
 0x383   : > { %v4749_v10 = vadd.f32 %v4748_v16, %v4747_v26 }
 0x385   : > { %v4750_v58 = vrot.slane %v4749_v10, 1 }
 0x387   : > { %v4751_v19 = vadd.f32 %v4750_v58, %v4749_v10 }
 0x389   : > { %v9369_v36 = vmul.f32 0.00390625, %v4751_v19 }
 0x38b   : > { %v9373_v42 = vsub.f32 %v9343_v51, %v9369_v36  ;;  %v9377_v18 = vsub.f32 %v9349_v57, %v9369_v36  ;;  %v9381_v43 = vsub.f32 %v9339_v1, %v9369_v36  ;;  %v9385_v17 = vsub.f32 %v9345_v31, %v9369_v36 }
 0x38c   : > { %v9388_v23 = vsub.f32 %v6359_v4, %v9369_v36  ;;  %v9391_v8 = vsub.f32 %v6361_v60, %v9369_v36  ;;  %v9394_v51 = vsub.f32 %v6358_v25, %v9369_v36  ;;  %v9397_v57 = vsub.f32 %v6360_v52, %v9369_v36 }
 0x38d   : > { %v9400_v59 = vsub.f32 %v6363_v13, %v9369_v36  ;;  %v9403_v1 = vsub.f32 %v6365_v63, %v9369_v36  ;;  %v9406_v31 = vsub.f32 %v6362_v39, %v9369_v36  ;;  %v9409_v4 = vsub.f32 %v6364_v55, %v9369_v36 }
 0x38e   : > { %v9412_v60 = vsub.f32 %v6367_v33, %v9369_v36  ;;  %v9415_v25 = vsub.f32 %v6369_v12, %v9369_v36  ;;  %v9418_v52 = vsub.f32 %v6366_v38, %v9369_v36  ;;  %v9421_v13 = vsub.f32 %v6368_v27, %v9369_v36 }
 0x38f   : > { %v9425_v63 = vsub.f32 %v9279_v62, %v9369_v36  ;;  %v9429_v39 = vsub.f32 %v9283_v41, %v9369_v36  ;;  %v9433_v55 = vsub.f32 %v9277_v20, %v9369_v36  ;;  %v9437_v21 = vsub.f32 %v9281_v61, %v9369_v36 }
 0x390   : > { %v9445_v62 = vsub.f32 %v9295_v6, %v9369_v36  ;;  %v9451_v20 = vsub.f32 %v9301_v24, %v9369_v36  ;;  %v9459_v30 = vsub.f32 %v9291_v44, %v9369_v36  ;;  %v9466_v24 = vsub.f32 %v9297_v37, %v9369_v36 }
 0x391   : > { %v4785_v32 = vmul.f32 %v9425_v63, %v9425_v63  ;;  %v4786_v15 = vmul.f32 %v9429_v39, %v9429_v39  ;;  %v4787_v41 = vmul.f32 %v9433_v55, %v9433_v55  ;;  %v4788_v61 = vmul.f32 %v9437_v21, %v9437_v21 }
 0x392   : > { %v4789_v6 = vmul.f32 %v9445_v62, %v9445_v62  ;;  %v4790_v28 = vmul.f32 %v9451_v20, %v9451_v20  ;;  %v9473_v44 = vsub.f32 %v9309_v47, %v9369_v36  ;;  %v4791_v3 = vmul.f32 %v9459_v30, %v9459_v30 }
 0x393   : > { %v4817_v0 = vsel %vm4682_vm6, %v4785_v32, 0.0  ;;  %v4818_v7 = vsel %vm4682_vm6, %v4786_v15, 0.0  ;;  %v4820_v53 = vsel %vm4682_vm6, %v4787_v41, 0.0  ;;  %v4822_v35 = vsel %vm4682_vm6, %v4788_v61, 0.0 }
 0x394   : > { %v4819_v38 = vadd.f32 %v4818_v7, %v4817_v0  ;;  %v4824_v29 = vsel %vm4682_vm6, %v4789_v6, 0.0  ;;  %v9480_v37 = vsub.f32 %v9313_v22, %v9369_v36  ;;  %v4792_v14 = vmul.f32 %v9466_v24, %v9466_v24 }
 0x395   : > { %v4826_v50 = vsel %vm4682_vm6, %v4790_v28, 0.0  ;;  %v9487_v47 = vsub.f32 %v9305_v40, %v9369_v36  ;;  %v4793_v34 = vmul.f32 %v9473_v44, %v9473_v44  ;;  %v4828_v9 = vsel %vm4682_vm6, %v4791_v3, 0.0 }
 0x396   : > { %v4821_v33 = vadd.f32 %v4820_v53, %v4819_v38  ;;  %v9494_v22 = vsub.f32 %v9311_v46, %v9369_v36  ;;  %v4794_v45 = vmul.f32 %v9480_v37, %v9480_v37  ;;  %v4830_v54 = vsel %vm4682_vm6, %v4792_v14, 0.0 }
 0x397   : > { %v9501_v40 = vsub.f32 %v9321_v49, %v9369_v36  ;;  %v4795_v16 = vmul.f32 %v9487_v47, %v9487_v47  ;;  %v4832_v10 = vsel %vm4682_vm6, %v4793_v34, 0.0  ;;  %v9508_v46 = vsub.f32 %v9327_v48, %v9369_v36 }
 0x398   : > { %v4823_v27 = vadd.f32 %v4822_v35, %v4821_v33  ;;  %v4796_v19 = vmul.f32 %v9494_v22, %v9494_v22  ;;  %v4834_v32 = vsel %vm4682_vm6, %v4794_v45, 0.0  ;;  %v9515_v49 = vsub.f32 %v9319_v11, %v9369_v36 }
 0x399   : > { %v4797_v41 = vmul.f32 %v9501_v40, %v9501_v40  ;;  %v4836_v61 = vsel %vm4682_vm6, %v4795_v16, 0.0  ;;  %v9522_v48 = vsub.f32 %v9323_v2, %v9369_v36  ;;  %v4798_v7 = vmul.f32 %v9508_v46, %v9508_v46 }
 0x39a   : > { %v4825_v12 = vadd.f32 %v4824_v29, %v4823_v27  ;;  %v4838_v38 = vsel %vm4682_vm6, %v4796_v19, 0.0  ;;  %v4799_v11 = vmul.f32 %v9515_v49, %v9515_v49  ;;  %v4801_v2 = vmul.f32 %v9373_v42, %v9373_v42 }
 0x39b   : > { %v4840_v53 = vsel %vm4682_vm6, %v4797_v41, 0.0  ;;  %v4800_v28 = vmul.f32 %v9522_v48, %v9522_v48  ;;  %v4842_v35 = vsel %vm4682_vm6, %v4798_v7, 0.0  ;;  %v4802_v29 = vmul.f32 %v9377_v18, %v9377_v18 }
 0x39c   : > { %v4827_v56 = vadd.f32 %v4826_v50, %v4825_v12  ;;  %v4844_v36 = vsel %vm4682_vm6, %v4799_v11, 0.0  ;;  %v4803_v50 = vmul.f32 %v9381_v43, %v9381_v43 }
 0x39d   : > { %v4846_v12 = vsel %vm4682_vm6, %v4800_v28, 0.0 }
 0x39e   : > { %v4829_v5 = vadd.f32 %v4828_v9, %v4827_v56  ;;  %v4848_v56 = vsel %vm4682_vm6, %v4801_v2, 0.0  ;;  %v4804_v9 = vmul.f32 %v9385_v17, %v9385_v17 }
 0x3a0   : > { %v4831_v26 = vadd.f32 %v4830_v54, %v4829_v5  ;;  %v4850_v5 = vsel %vm4682_vm6, %v4802_v29, 0.0  ;;  %v4805_v54 = vmul.f32 %v9388_v23, %v9388_v23 }
 0x3a2   : > { %v4833_v58 = vadd.f32 %v4832_v10, %v4831_v26  ;;  %v4852_v26 = vsel %vm4682_vm6, %v4803_v50, 0.0  ;;  %v4806_v10 = vmul.f32 %v9391_v8, %v9391_v8 }
 0x3a4   : > { %v4835_v15 = vadd.f32 %v4834_v32, %v4833_v58  ;;  %v4854_v58 = vsel %vm4682_vm6, %v4804_v9, 0.0  ;;  %v4807_v32 = vmul.f32 %v9394_v51, %v9394_v51 }
 0x3a6   : > { %v4837_v0 = vadd.f32 %v4836_v61, %v4835_v15  ;;  %v4856_v15 = vsel %vm4682_vm6, %v4805_v54, 0.0  ;;  %v4808_v61 = vmul.f32 %v9397_v57, %v9397_v57 }
 0x3a8   : > { %v4839_v6 = vadd.f32 %v4838_v38, %v4837_v0  ;;  %v4858_v0 = vsel %vm4682_vm6, %v4806_v10, 0.0  ;;  %v4809_v38 = vmul.f32 %v9400_v59, %v9400_v59 }
 0x3aa   : > { %v4841_v33 = vadd.f32 %v4840_v53, %v4839_v6  ;;  %v4860_v6 = vsel %vm4682_vm6, %v4807_v32, 0.0  ;;  %v4810_v53 = vmul.f32 %v9403_v1, %v9403_v1 }
 0x3ac   : > { %v4843_v27 = vadd.f32 %v4842_v35, %v4841_v33  ;;  %v4862_v33 = vsel %vm4682_vm6, %v4808_v61, 0.0  ;;  %v4811_v35 = vmul.f32 %v9406_v31, %v9406_v31 }
 0x3ae   : > { %v4845_v3 = vadd.f32 %v4844_v36, %v4843_v27  ;;  %v4864_v27 = vsel %vm4682_vm6, %v4809_v38, 0.0  ;;  %v4812_v36 = vmul.f32 %v9409_v4, %v9409_v4 }
 0x3b0   : > { %v4847_v14 = vadd.f32 %v4846_v12, %v4845_v3  ;;  %v4866_v3 = vsel %vm4682_vm6, %v4810_v53, 0.0  ;;  %v4813_v12 = vmul.f32 %v9412_v60, %v9412_v60 }
 0x3b2   : > { %v4849_v34 = vadd.f32 %v4848_v56, %v4847_v14  ;;  %v4868_v14 = vsel %vm4682_vm6, %v4811_v35, 0.0  ;;  %v4814_v56 = vmul.f32 %v9415_v25, %v9415_v25 }
 0x3b4   : > { %v4851_v45 = vadd.f32 %v4850_v5, %v4849_v34  ;;  %v4870_v34 = vsel %vm4682_vm6, %v4812_v36, 0.0  ;;  %v4815_v5 = vmul.f32 %v9418_v52, %v9418_v52 }
 0x3b6   : > { %v4853_v16 = vadd.f32 %v4852_v26, %v4851_v45  ;;  %v4872_v45 = vsel %vm4682_vm6, %v4813_v12, 0.0  ;;  %v4816_v26 = vmul.f32 %v9421_v13, %v9421_v13 }
 0x3b8   : > { %v4855_v19 = vadd.f32 %v4854_v58, %v4853_v16  ;;  %v4874_v16 = vsel %vm4682_vm6, %v4814_v56, 0.0  ;;  %v4876_v58 = vsel %vm4682_vm6, %v4815_v5, 0.0  ;;  %v4878_v32 = vsel %vm4682_vm6, %v4816_v26, 0.0 }
 0x3ba   : > { %v4857_v41 = vadd.f32 %v4856_v15, %v4855_v19 }
 0x3bc   : > { %v4859_v7 = vadd.f32 %v4858_v0, %v4857_v41 }
 0x3be   : > { %v4861_v11 = vadd.f32 %v4860_v6, %v4859_v7 }
 0x3c0   : > { %v4863_v28 = vadd.f32 %v4862_v33, %v4861_v11 }
 0x3c2   : > { %v4865_v2 = vadd.f32 %v4864_v27, %v4863_v28 }
 0x3c4   : > { %v4867_v29 = vadd.f32 %v4866_v3, %v4865_v2 }
 0x3c6   : > { %v4869_v50 = vadd.f32 %v4868_v14, %v4867_v29 }
 0x3c8   : > { %v4871_v9 = vadd.f32 %v4870_v34, %v4869_v50 }
 0x3ca   : > { %v4873_v54 = vadd.f32 %v4872_v45, %v4871_v9 }
 0x3cc   : > { %v4875_v10 = vadd.f32 %v4874_v16, %v4873_v54 }
 0x3ce   : > { %v4877_v19 = vadd.f32 %v4876_v58, %v4875_v10 }
 0x3d0   : > { %v4879_v15 = vadd.f32 %v4878_v32, %v4877_v19 }
 0x3d2   : > { %v4880_v41 = vrot.slane %v4879_v15, 4 }
 0x3d4   : > { %v4881_v61 = vadd.f32 %v4880_v41, %v4879_v15 }
 0x3d6   : > { %v4882_v0 = vrot.slane %v4881_v61, 2 }
 0x3d8   : > { %v4883_v7 = vadd.f32 %v4882_v0, %v4881_v61 }
 0x3da   : > { %v4884_v38 = vrot.slane %v4883_v7, 1 }
 0x3dc   : > { %v4885_v6 = vadd.f32 %v4884_v38, %v4883_v7 }
 0x3de   : > { %v4886_v11 = vmul.f32 0.00390625, %v4885_v6 }
 0x3e0   : > { %v4887_v53 = vadd.f32 1e-05, %v4886_v11 }
 0x3e2   : > { %7299 = vrsqrt.f32 %v4887_v53 }
 0x3ec   : > { %v9583_v33 = vpop.eup %7299 }
 0x3ed   : > { %v9587_v28 = vmul.f32 %v9583_v33, %v9425_v63  ;;  %v9591_v35 = vmul.f32 %v9583_v33, %v9429_v39  ;;  %v9595_v27 = vmul.f32 %v9583_v33, %v9433_v55  ;;  %v9599_v2 = vmul.f32 %v9583_v33, %v9437_v21 }
 0x3ee   : > { %v9603_v36 = vmul.f32 %v9583_v33, %v9445_v62  ;;  %v9607_v63 = vmul.f32 %v9583_v33, %v9451_v20  ;;  %v9611_v39 = vmul.f32 %v9583_v33, %v9418_v52  ;;  %v9615_v55 = vmul.f32 %v9583_v33, %v9421_v13 }
 0x3ef   : > { %v9619_v21 = vmul.f32 %v9583_v33, %v9459_v30  ;;  %v5640_v3 = vmul.f32 -1.442695, %v9587_v28  ;;  %v5641_v62 = vmul.f32 -1.442695, %v9591_v35  ;;  %v5642_v29 = vmul.f32 -1.442695, %v9595_v27 }
 0x3f0   : > { %9918 = vst [vmem:[#allocation6_spill] sm:$0xff] %v9615_v55  ;;  %v9626_v20 = vmul.f32 %v9583_v33, %v9466_v24  ;;  %v5643_v52 = vmul.f32 -1.442695, %v9599_v2  ;;  %v9631_v13 = vmul.f32 %v9583_v33, %v9473_v44  ;;  %v5644_v30 = vmul.f32 -1.442695, %v9603_v36 }
 0x3f1   : > { %7301 = vpow2.f32 %v5640_v3  ;;  %v9636_v12 = vmul.f32 %v9583_v33, %v9480_v37  ;;  %v5645_v14 = vmul.f32 -1.442695, %v9607_v63  ;;  %v9641_v24 = vmul.f32 %v9583_v33, %v9487_v47 }
 0x3f2   : > { %7303 = vpow2.f32 %v5641_v62  ;;  %v5646_v50 = vmul.f32 -1.442695, %v9619_v21  ;;  %v9646_v44 = vmul.f32 %v9583_v33, %v9494_v22  ;;  %v5647_v56 = vmul.f32 -1.442695, %v9626_v20 }
 0x3f3   : > { %7305 = vpow2.f32 %v5642_v29  ;;  %v9651_v37 = vmul.f32 %v9583_v33, %v9501_v40  ;;  %v5648_v34 = vmul.f32 -1.442695, %v9631_v13  ;;  %v9656_v47 = vmul.f32 %v9583_v33, %v9508_v46 }
 0x3f4   : > { %7307 = vpow2.f32 %v5643_v52  ;;  %v5649_v9 = vmul.f32 -1.442695, %v9636_v12  ;;  %v9661_v22 = vmul.f32 %v9583_v33, %v9515_v49  ;;  %v5650_v5 = vmul.f32 -1.442695, %v9641_v24 }
 0x3f5   : > { %7309 = vpow2.f32 %v5644_v30  ;;  %v9666_v40 = vmul.f32 %v9583_v33, %v9522_v48  ;;  %v5651_v45 = vmul.f32 -1.442695, %v9646_v44  ;;  %v9671_v46 = vmul.f32 %v9583_v33, %v9373_v42 }
 0x3f6   : > { %7311 = vpow2.f32 %v5645_v14  ;;  %v5652_v54 = vmul.f32 -1.442695, %v9651_v37  ;;  %v9676_v49 = vmul.f32 %v9583_v33, %v9377_v18  ;;  %v5653_v26 = vmul.f32 -1.442695, %v9656_v47 }
 0x3f7   : > { %7313 = vpow2.f32 %v5646_v50  ;;  %v9683_v48 = vmul.f32 %v9583_v33, %v9381_v43  ;;  %v5654_v42 = vmul.f32 -1.442695, %v9661_v22  ;;  %v9690_v58 = vmul.f32 %v9583_v33, %v9385_v17 }
 0x3f8   : > { %7315 = vpow2.f32 %v5647_v56  ;;  %v5655_v18 = vmul.f32 -1.442695, %v9666_v40  ;;  %v9697_v32 = vmul.f32 %v9583_v33, %v9388_v23  ;;  %v5656_v43 = vmul.f32 -1.442695, %v9671_v46 }
 0x3f9   : > { %7317 = vpow2.f32 %v5648_v34  ;;  %v9704_v41 = vmul.f32 %v9583_v33, %v9391_v8  ;;  %v5657_v17 = vmul.f32 -1.442695, %v9676_v49  ;;  %v9709_v0 = vmul.f32 %v9583_v33, %v9394_v51 }
 0x3fa   : > { %7319 = vpow2.f32 %v5649_v9  ;;  %v5658_v23 = vmul.f32 -1.442695, %v9683_v48  ;;  %v9714_v38 = vmul.f32 %v9583_v33, %v9397_v57  ;;  %v5659_v8 = vmul.f32 -1.442695, %v9690_v58 }
 0x3fb   : > { %v9679_v16 = vpop.eup %7301  ;;  %7321 = vpow2.f32 %v5650_v5  ;;  %v9719_v11 = vmul.f32 %v9583_v33, %v9400_v59  ;;  %v5660_v51 = vmul.f32 -1.442695, %v9697_v32  ;;  %v9724_v3 = vmul.f32 %v9583_v33, %v9403_v1 }
 0x3fc   : > { %v9686_v10 = vpop.eup %7303  ;;  %7323 = vpow2.f32 %v5651_v45  ;;  %v5661_v57 = vmul.f32 -1.442695, %v9704_v41  ;;  %v9729_v29 = vmul.f32 %v9583_v33, %v9406_v31  ;;  %v5662_v59 = vmul.f32 -1.442695, %v9709_v0 }
 0x3fd   : > { %v9693_v19 = vpop.eup %7305  ;;  %7325 = vpow2.f32 %v5652_v54  ;;  %v9734_v30 = vmul.f32 %v9583_v33, %v9409_v4  ;;  %v5663_v1 = vmul.f32 -1.442695, %v9714_v38  ;;  %v9739_v50 = vmul.f32 %v9583_v33, %v9412_v60 }
 0x3fe   : > { %v9700_v15 = vpop.eup %7307  ;;  %7327 = vpow2.f32 %v5653_v26  ;;  %v5664_v31 = vmul.f32 -1.442695, %v9719_v11  ;;  %v9744_v34 = vmul.f32 %v9583_v33, %v9415_v25  ;;  %v5665_v4 = vmul.f32 -1.442695, %v9724_v3 }
 0x3ff   : > { %v7310_v61 = vpop.eup %7309  ;;  %7329 = vpow2.f32 %v5654_v42  ;;  %v5666_v5 = vmul.f32 -1.442695, %v9729_v29  ;;  %v5667_v60 = vmul.f32 -1.442695, %v9734_v30  ;;  %v5668_v26 = vmul.f32 -1.442695, %v9739_v50 }
 0x400   : > { %v7312_v7 = vpop.eup %7311  ;;  %7331 = vpow2.f32 %v5655_v18  ;;  %v5669_v25 = vmul.f32 -1.442695, %v9744_v34  ;;  %v5670_v18 = vmul.f32 -1.442695, %v9611_v39 }
 0x401   : > { %v7314_v6 = vpop.eup %7313  ;;  %7333 = vpow2.f32 %v5656_v43 }
 0x402   : > { %v7316_v53 = vpop.eup %7315  ;;  %7335 = vpow2.f32 %v5657_v17  ;;  %v5671_v17 = vmul.f32 -1.442695, %v9615_v55 }
 0x403   : > { %v7318_v62 = vpop.eup %7317  ;;  %7337 = vpow2.f32 %v5658_v23 }
 0x404   : > { %v7320_v52 = vpop.eup %7319  ;;  %7339 = vpow2.f32 %v5659_v8  ;;  %v5017_v8 = vadd.f32 1.0, %v9679_v16  ;;  %v5022_v16 = vadd.f32 1.0, %v7312_v7 }
 0x405   : > { %v7322_v14 = vpop.eup %7321  ;;  %7341 = vpow2.f32 %v5660_v51 }
 0x406   : > { %v7324_v56 = vpop.eup %7323  ;;  %7343 = vpow2.f32 %v5661_v57  ;;  %v5018_v57 = vadd.f32 1.0, %v9686_v10  ;;  %v5023_v10 = vadd.f32 1.0, %v7314_v6  ;;  %v5027_v7 = vadd.f32 1.0, %v7322_v14 }
 0x407   : > { %v7326_v9 = vpop.eup %7325  ;;  %7345 = vpow2.f32 %v5662_v59  ;;  %v5028_v6 = vadd.f32 1.0, %v7324_v56 }
 0x408   : > { %v7328_v45 = vpop.eup %7327  ;;  %7347 = vpow2.f32 %v5663_v1  ;;  %v5019_v1 = vadd.f32 1.0, %v9693_v19  ;;  %v5024_v19 = vadd.f32 1.0, %v7316_v53  ;;  %v5029_v53 = vadd.f32 1.0, %v7326_v9 }
 0x409   : > { %v7330_v54 = vpop.eup %7329  ;;  %7349 = vpow2.f32 %v5664_v31 }
 0x40a   : > { %v7332_v42 = vpop.eup %7331  ;;  %7351 = vpow2.f32 %v5665_v4  ;;  %v5020_v4 = vadd.f32 1.0, %v9700_v15 }
 0x40b   : > { %v7334_v33 = vpop.eup %7333  ;;  %7353 = vpow2.f32 %v5666_v5  ;;  %v5032_v56 = vadd.f32 1.0, %v7332_v42 }
 0x40c   : > { %v7336_v43 = vpop.eup %7335  ;;  %7355 = vpow2.f32 %v5667_v60  ;;  %v5021_v60 = vadd.f32 1.0, %v7310_v61  ;;  %v5026_v61 = vadd.f32 1.0, %v7320_v52  ;;  %v5031_v52 = vadd.f32 1.0, %v7330_v54 }
 0x40d   : > { %v7338_v23 = vpop.eup %7337  ;;  %7357 = vpow2.f32 %v5668_v26 }
 0x40e   : > { %v7340_v51 = vpop.eup %7339  ;;  %7359 = vpow2.f32 %v5669_v25  ;;  %v5035_v42 = vadd.f32 1.0, %v7338_v23 }
 0x40f   : > { %v9755_v59 = vpop.eup %7341  ;;  %7361 = vpow2.f32 %v5670_v18 }
 0x410   : > { %v9758_v31 = vpop.eup %7343  ;;  %7363 = vpow2.f32 %v5671_v17  ;;  %v5025_v17 = vadd.f32 1.0, %v7318_v62  ;;  %v5030_v62 = vadd.f32 1.0, %v7328_v45 }
 0x411   : > { %v9761_v5 = vpop.eup %7345  ;;  %7365 = vrcp.f32 %v5017_v8 }
 0x412   : > { %v9763_v26 = vpop.eup %7347  ;;  %7367 = vrcp.f32 %v5018_v57 }
 0x413   : > { %v9765_v25 = vpop.eup %7349  ;;  %7369 = vrcp.f32 %v5019_v1 }
 0x414   : > { %v9767_v18 = vpop.eup %7351  ;;  %7371 = vrcp.f32 %v5020_v4 }
 0x415   : > { %v9769_v55 = vpop.eup %7353  ;;  %7373 = vrcp.f32 %v5021_v60 }
 0x416   : > { %v9771_v15 = vpop.eup %7355  ;;  %7375 = vrcp.f32 %v5022_v16 }
 0x417   : > { %v9773_v8 = vpop.eup %7357  ;;  %7377 = vrcp.f32 %v5023_v10  ;;  %v5033_v10 = vadd.f32 1.0, %v7334_v33  ;;  %v5036_v33 = vadd.f32 1.0, %v7340_v51 }
 0x418   : > { %v9775_v57 = vpop.eup %7359  ;;  %7379 = vrcp.f32 %v5024_v19 }
 0x419   : > { %v9777_v1 = vpop.eup %7361  ;;  %7381 = vrcp.f32 %v5025_v17  ;;  %v5034_v17 = vadd.f32 1.0, %v7336_v43  ;;  %v5037_v43 = vadd.f32 1.0, %v9755_v59 }
 0x41a   : > { %v9779_v4 = vpop.eup %7363  ;;  %7383 = vrcp.f32 %v5026_v61 }
 0x41b   : > { %v7366_v60 = vpop.eup %7365  ;;  %7385 = vrcp.f32 %v5027_v7 }
 0x41c   : > { %v7368_v14 = vpop.eup %7367  ;;  %7387 = vrcp.f32 %v5028_v6  ;;  %v5113_v9 = vmul.f32 %v7366_v60, %v9587_v28  ;;  %v5038_v6 = vadd.f32 1.0, %v9758_v31  ;;  %v5041_v60 = vadd.f32 1.0, %v9765_v25 }
 0x41d   : > { %v7370_v16 = vpop.eup %7369  ;;  %7389 = vrcp.f32 %v5029_v53  ;;  %v5114_v45 = vmul.f32 %v7368_v14, %v9591_v35  ;;  %v5039_v53 = vadd.f32 1.0, %v9761_v5  ;;  %v5043_v14 = vadd.f32 1.0, %v9769_v55 }
 0x41e   : > { %v7372_v19 = vpop.eup %7371  ;;  %7391 = vrcp.f32 %v5030_v62  ;;  %v5115_v61 = vmul.f32 %v7370_v16, %v9595_v27  ;;  %5145 = vst.msk [vmem:[%s9786_s23] sm:$0xff] %vm4682_vm6, %v5113_v9  ;;  %v5040_v62 = vadd.f32 1.0, %v9763_v26  ;;  %v5045_v9 = vadd.f32 1.0, %v9773_v8 }
 0x41f   : > { %v7374_v54 = vpop.eup %7373  ;;  %7393 = vrcp.f32 %v5031_v52  ;;  %v5116_v7 = vmul.f32 %v7372_v19, %v9599_v2  ;;  %5146 = vst.msk [vmem:[%s9786_s23 + $0x8] sm:$0xff] %vm4682_vm6, %v5114_v45  ;;  %v5042_v52 = vadd.f32 1.0, %v9767_v18  ;;  %v5046_v16 = vadd.f32 1.0, %v9775_v57 }
 0x420   : > { %v7376_v28 = vpop.eup %7375  ;;  %7395 = vrcp.f32 %v5032_v56  ;;  %v5117_v35 = vmul.f32 %v7374_v54, %v9603_v36  ;;  %5147 = vst.msk [vmem:[%s9786_s23 + $0x10] sm:$0xff] %vm4682_vm6, %v5115_v61  ;;  %v5044_v56 = vadd.f32 1.0, %v9771_v15  ;;  %v5048_v45 = vadd.f32 1.0, %v9779_v4 }
 0x421   : > { %v7378_v27 = vpop.eup %7377  ;;  %7397 = vrcp.f32 %v5033_v10  ;;  %v5118_v23 = vmul.f32 %v7376_v28, %v9607_v63  ;;  %5148 = vst.msk [vmem:[%s9786_s23 + $0x18] sm:$0xff] %vm4682_vm6, %v5116_v7  ;;  %v5047_v10 = vadd.f32 1.0, %v9777_v1 }
 0x422   : > { %v7380_v2 = vpop.eup %7379  ;;  %7399 = vrcp.f32 %v5034_v17  ;;  %v5119_v51 = vmul.f32 %v7378_v27, %v9619_v21  ;;  %5149 = vst.msk [vmem:[%s9786_s23 + $0x20] sm:$0xff] %vm4682_vm6, %v5117_v35 }
 0x423   : > { %v7382_v36 = vpop.eup %7381  ;;  %7401 = vrcp.f32 %v5035_v42  ;;  %v5120_v59 = vmul.f32 %v7380_v2, %v9626_v20  ;;  %5150 = vst.msk [vmem:[%s9786_s23 + $0x28] sm:$0xff] %vm4682_vm6, %v5118_v23 }
 0x424   : > { %v7384_v63 = vpop.eup %7383  ;;  %7403 = vrcp.f32 %v5036_v33  ;;  %v5121_v31 = vmul.f32 %v7382_v36, %v9631_v13  ;;  %5151 = vst.msk [vmem:[%s9786_s23 + $0x30] sm:$0xff] %vm4682_vm6, %v5119_v51 }
 0x425   : > { %v7386_v21 = vpop.eup %7385  ;;  %7405 = vrcp.f32 %v5037_v43  ;;  %v5122_v5 = vmul.f32 %v7384_v63, %v9636_v12  ;;  %5152 = vst.msk [vmem:[%s9786_s23 + $0x38] sm:$0xff] %vm4682_vm6, %v5120_v59 }
 0x426   : > { %v7388_v20 = vpop.eup %7387  ;;  %7407 = vrcp.f32 %v5038_v6  ;;  %v5123_v26 = vmul.f32 %v7386_v21, %v9641_v24  ;;  %5153 = vst.msk [vmem:[%s9786_s23 + $0x40] sm:$0xff] %vm4682_vm6, %v5121_v31  ;;  %v9919_v6 = vld [vmem:[#allocation6_spill] sm:$0xff] }
 0x427   : > { %v7390_v13 = vpop.eup %7389  ;;  %7409 = vrcp.f32 %v5039_v53  ;;  %v5124_v25 = vmul.f32 %v7388_v20, %v9646_v44  ;;  %5154 = vst.msk [vmem:[%s9786_s23 + $0x48] sm:$0xff] %vm4682_vm6, %v5122_v5 }
 0x428   : > { %v7392_v12 = vpop.eup %7391  ;;  %7411 = vrcp.f32 %v5040_v62  ;;  %v5125_v18 = vmul.f32 %v7390_v13, %v9651_v37  ;;  %5155 = vst.msk [vmem:[%s9786_s23 + $0x50] sm:$0xff] %vm4682_vm6, %v5123_v26 }
 0x429   : > { %v7394_v24 = vpop.eup %7393  ;;  %7413 = vrcp.f32 %v5041_v60  ;;  %v5126_v55 = vmul.f32 %v7392_v12, %v9656_v47  ;;  %5156 = vst.msk [vmem:[%s9786_s23 + $0x58] sm:$0xff] %vm4682_vm6, %v5124_v25 }
 0x42a   : > { %v7396_v44 = vpop.eup %7395  ;;  %7415 = vrcp.f32 %v5042_v52  ;;  %v5127_v15 = vmul.f32 %v7394_v24, %v9661_v22  ;;  %5157 = vst.msk [vmem:[%s9786_s23 + $0x60] sm:$0xff] %vm4682_vm6, %v5125_v18 }
 0x42b   : > { %v7398_v37 = vpop.eup %7397  ;;  %7417 = vrcp.f32 %v5043_v14  ;;  %v5128_v8 = vmul.f32 %v7396_v44, %v9666_v40  ;;  %5158 = vst.msk [vmem:[%s9786_s23 + $0x68] sm:$0xff] %vm4682_vm6, %v5126_v55 }
 0x42c   : > { %v7400_v47 = vpop.eup %7399  ;;  %7419 = vrcp.f32 %v5044_v56  ;;  %v5129_v57 = vmul.f32 %v7398_v37, %v9671_v46  ;;  %5159 = vst.msk [vmem:[%s9786_s23 + $0x70] sm:$0xff] %vm4682_vm6, %v5127_v15 }
 0x42d   : > { %v7402_v22 = vpop.eup %7401  ;;  %7421 = vrcp.f32 %v5045_v9  ;;  %v5130_v1 = vmul.f32 %v7400_v47, %v9676_v49  ;;  %5160 = vst.msk [vmem:[%s9786_s23 + $0x78] sm:$0xff] %vm4682_vm6, %v5128_v8 }
 0x42e   : > { %v7404_v40 = vpop.eup %7403  ;;  %7423 = vrcp.f32 %v5046_v16  ;;  %v5131_v19 = vmul.f32 %v7402_v22, %v9683_v48  ;;  %5161 = vst.msk [vmem:[%s9786_s23 + $0x80] sm:$0xff] %vm4682_vm6, %v5129_v57 }
 0x42f   : > { %v7406_v4 = vpop.eup %7405  ;;  %7425 = vrcp.f32 %v5047_v10  ;;  %v5132_v46 = vmul.f32 %v7404_v40, %v9690_v58  ;;  %5162 = vst.msk [vmem:[%s9786_s23 + $0x88] sm:$0xff] %vm4682_vm6, %v5130_v1 }
 0x430   : > { %v7408_v17 = vpop.eup %7407  ;;  %7427 = vrcp.f32 %v5048_v45  ;;  %v5133_v49 = vmul.f32 %v7406_v4, %v9697_v32  ;;  %5163 = vst.msk [vmem:[%s9786_s23 + $0x90] sm:$0xff] %vm4682_vm6, %v5131_v19 }
 0x431   : > { %v7410_v61 = vpop.eup %7409  ;;  %v5134_v48 = vmul.f32 %v7408_v17, %v9704_v41  ;;  %5164 = vst.msk [vmem:[%s9786_s23 + $0x98] sm:$0xff] %vm4682_vm6, %v5132_v46 }
 0x432   : > { %v7412_v54 = vpop.eup %7411  ;;  %v5135_v42 = vmul.f32 %v7410_v61, %v9709_v0  ;;  %5165 = vst.msk [vmem:[%s9786_s23 + $0xa0] sm:$0xff] %vm4682_vm6, %v5133_v49 }
 0x433   : > { %v7414_v58 = vpop.eup %7413  ;;  %v5136_v7 = vmul.f32 %v7412_v54, %v9714_v38  ;;  %5166 = vst.msk [vmem:[%s9786_s23 + $0xa8] sm:$0xff] %vm4682_vm6, %v5134_v48 }
 0x434   : > { %v7416_v32 = vpop.eup %7415  ;;  %v5137_v28 = vmul.f32 %v7414_v58, %v9719_v11  ;;  %5167 = vst.msk [vmem:[%s9786_s23 + $0xb0] sm:$0xff] %vm4682_vm6, %v5135_v42 }
 0x435   : > { %v7418_v41 = vpop.eup %7417  ;;  %v5138_v33 = vmul.f32 %v7416_v32, %v9724_v3  ;;  %5168 = vst.msk [vmem:[%s9786_s23 + $0xb8] sm:$0xff] %vm4682_vm6, %v5136_v7 }
 0x436   : > { %v7420_v0 = vpop.eup %7419  ;;  %v5139_v35 = vmul.f32 %v7418_v41, %v9729_v29  ;;  %5169 = vst.msk [vmem:[%s9786_s23 + $0xc0] sm:$0xff] %vm4682_vm6, %v5137_v28 }
 0x437   : > { %v7422_v38 = vpop.eup %7421  ;;  %v5140_v11 = vmul.f32 %v7420_v0, %v9734_v30  ;;  %5170 = vst.msk [vmem:[%s9786_s23 + $0xc8] sm:$0xff] %vm4682_vm6, %v5138_v33 }
 0x438   : > { %v7424_v27 = vpop.eup %7423  ;;  %v5141_v43 = vmul.f32 %v7422_v38, %v9739_v50  ;;  %5171 = vst.msk [vmem:[%s9786_s23 + $0xd0] sm:$0xff] %vm4682_vm6, %v5139_v35 }
 0x439   : > { %v7426_v3 = vpop.eup %7425  ;;  %v5142_v23 = vmul.f32 %v7424_v27, %v9744_v34  ;;  %5172 = vst.msk [vmem:[%s9786_s23 + $0xd8] sm:$0xff] %vm4682_vm6, %v5140_v11 }
 0x43a   : > { %v7428_v29 = vpop.eup %7427  ;;  %v5143_v2 = vmul.f32 %v7426_v3, %v9611_v39  ;;  %5173 = vst.msk [vmem:[%s9786_s23 + $0xe0] sm:$0xff] %vm4682_vm6, %v5141_v43 }
 0x43b   : > { %v5144_v51 = vmul.f32 %v7428_v29, %v9919_v6  ;;  %5174 = vst.msk [vmem:[%s9786_s23 + $0xe8] sm:$0xff] %vm4682_vm6, %v5142_v23 }
 0x43c   : > { %5175 = vst.msk [vmem:[%s9786_s23 + $0xf0] sm:$0xff] %vm4682_vm6, %v5143_v2 }
 0x43d   : > { %5176 = vst.msk [vmem:[%s9786_s23 + $0xf8] sm:$0xff] %vm4682_vm6, %v5144_v51 }
 0x43e PF: > { %s14_s16 = sadd.s32 1, %s7527_s16   ;;  %s9920_s12 = smov %s7519_s14 }
 0x43f   : > { %p11_p3 = scmp.ge.s32.totalorder %s14_s16, 6   ;;  %s9921_s13 = smov %s7523_s15 }
 0x440   : > { %s9922_s14 = smov %s9925_s18  ;;  %s9923_s15 = smov %s9929_s19 }
 0x441   :  { %13 = sbr.rel (!%p11_p3) target bundleno = 3 (0x3), region = 81 }
 0x448   :  { %5206 = vsyncpa [#allocation4], 1 }
 0x449   :  { %5208 = vsyncpa [#allocation4 + $0x1], 1 }

</bundles_post_ra>
